<compile_context>
chip_gen: v7x
topology: tpu7x:2x2x1
jax: 0.10.0
libtpu: 0.0.40
codegen_flags: <defaults>
</compile_context>

<pallas_src>
import functools

import jax
import jax.numpy as jnp
from jax.experimental import pallas as pl
from jax.experimental.pallas import tpu as pltpu


def _round_up(x, m):
    return (x + m - 1) // m * m


# ----------------------------------------------------------------------------
# Fused decoder kernel: 4 matmuls + 3 ReLUs in one kernel body.
# All weight/bias refs are full (padded) arrays, resident in VMEM.
# x_ref / o_ref are (tm, Kp0) / (tm, Np4) blocks of the batch.
# ----------------------------------------------------------------------------
def _decoder_kernel(x_ref,
                    w1_ref, b1_ref,
                    w2_ref, b2_ref,
                    w3_ref, b3_ref,
                    w4_ref, b4_ref,
                    o_ref):
    h = x_ref[...]
    h = jnp.maximum(
        jnp.dot(h, w1_ref[...], preferred_element_type=jnp.float32) + b1_ref[...],
        0.0)
    h = jnp.maximum(
        jnp.dot(h, w2_ref[...], preferred_element_type=jnp.float32) + b2_ref[...],
        0.0)
    h = jnp.maximum(
        jnp.dot(h, w3_ref[...], preferred_element_type=jnp.float32) + b3_ref[...],
        0.0)
    h = jnp.dot(h, w4_ref[...], preferred_element_type=jnp.float32) + b4_ref[...]
    o_ref[...] = h.astype(o_ref.dtype)


# ----------------------------------------------------------------------------
# Parameter handling
# ----------------------------------------------------------------------------
def init_decoder_params(key, input_dim, output_dim):
    """Deterministic init mimicking nn.Linear default (uniform +/- 1/sqrt(fan_in))."""
    dims = [(input_dim, 2000), (2000, 500), (500, 500), (500, output_dim)]
    params = []
    for (fan_in, fan_out) in dims:
        key, kw, kb = jax.random.split(key, 3)
        bound = 1.0 / jnp.sqrt(fan_in)
        w = jax.random.uniform(kw, (fan_in, fan_out), jnp.float32, -bound, bound)
        b = jax.random.uniform(kb, (fan_out,), jnp.float32, -bound, bound)
        params.append((w, b))
    return params


def pad_decoder_params(params):
    """Zero-pad every (K, N) weight to (round_up(K,128), round_up(N,128)) and
    every bias to (1, round_up(N,128)).  Done ONCE, outside the hot path.
    Zero padding is mathematically inert for y = x @ W + b followed by ReLU
    (padded lanes stay exactly 0 and never leak into the real lanes)."""
    padded = []
    for (w, b) in params:
        K, N = w.shape
        Kp, Np = _round_up(K, 128), _round_up(N, 128)
        wp = jnp.zeros((Kp, Np), jnp.float32).at[:K, :N].set(w)
        bp = jnp.zeros((1, Np), jnp.float32).at[0, :N].set(b)
        padded.append((wp, bp))
    return padded


# ----------------------------------------------------------------------------
# Fused forward
# ----------------------------------------------------------------------------
@functools.partial(jax.jit, static_argnums=(2,))
def decoder_forward(padded_params, x, output_dim):
    """Full Decoder forward in ONE pallas_call.

    padded_params: list of 4 (wp, bp) pairs (already lane-padded).
    x: (M, input_dim) float32.
    """
    flat = tuple(t for wb in padded_params for t in wb)
    K0p = flat[0].shape[0]          # padded input feature dim (multiple of 128)
    N4p = flat[-2].shape[1]         # padded output feature dim (>= 128)

    M, K = x.shape
    # Batch tile: big enough to keep the MXU busy, small enough that the
    # (tm x 2048) fp32 intermediate comfortably fits in vregs/VMEM.
    tm = min(256, _round_up(M, 8))
    Mp = _round_up(M, tm)

    # Pad the input once per call (tiny: Mp x K0p).
    xp = jnp.zeros((Mp, K0p), jnp.float32).at[:M, :K].set(x)

    grid = (Mp // tm,)

    in_specs = [pl.BlockSpec((tm, K0p), lambda i: (i, 0))]
    for (wp, bp) in padded_params:
        # Full-array blocks with a constant index_map -> weights/biases stay
        # resident in VMEM across all grid steps (no re-DMA per batch tile).
        in_specs.append(pl.BlockSpec(wp.shape, lambda i: (0, 0)))
        in_specs.append(pl.BlockSpec(bp.shape, lambda i: (0, 0)))

    out = pl.pallas_call(
        _decoder_kernel,
        out_shape=jax.ShapeDtypeStruct((Mp, N4p), jnp.float32),
        grid_spec=pltpu.PrefetchScalarGridSpec(
            num_scalar_prefetch=0,
            grid=grid,
            in_specs=in_specs,
            out_specs=pl.BlockSpec((tm, N4p), lambda i: (i, 0)),
        ),
        compiler_params=pltpu.CompilerParams(
            dimension_semantics=("parallel",),
            # ~13 MB of (double-buffered) weights + activation tiles; 32 MiB
            # is safe on v5e/v6e and leaves headroom under v7x's 64 MiB VMEM.
            vmem_limit_bytes=32 * 1024 * 1024,
        ),
    )(xp, *flat)

    # Lane-dense (>=128 wide) write inside the kernel; slice to logical dims here.
    return out[:M, :output_dim]


def decoder_reference(params, x):
    h = x
    n_layers = len(params)
    for idx, (w, b) in enumerate(params):
        h = h @ w + b
        if idx < n_layers - 1:
            h = jnp.maximum(h, 0.0)
    return h


if __name__ == "__main__":
    key = jax.random.PRNGKey(0)
    k_params, k_x = jax.random.split(key)

    batch = 8
    input_dim = 32
    output_dim = 16

    params = init_decoder_params(k_params, input_dim, output_dim)
    padded_params = pad_decoder_params(params)   # padded ONCE, reused every call
    x = jax.random.normal(k_x, (batch, input_dim), jnp.float32)

    out = decoder_forward(padded_params, x, output_dim)
    out = jax.block_until_ready(out)

    ref = decoder_reference(params, x)
    assert out.shape == (batch, output_dim), out.shape
    assert jnp.allclose(out, ref, atol=1e-3, rtol=1e-3), (
        float(jnp.max(jnp.abs(out - ref)))
    )

    print("KERNEL_OK")
</pallas_src>

<mosaic_0001>
module attributes {stable_mosaic.version = 11 : i64} {
  func.func @_decoder_kernel(%arg0: i32, %arg1: memref<8x128xf32, #tpu.memory_space<vmem>>, %arg2: memref<128x2048xf32, #tpu.memory_space<vmem>>, %arg3: memref<1x2048xf32, #tpu.memory_space<vmem>>, %arg4: memref<2048x512xf32, #tpu.memory_space<vmem>>, %arg5: memref<1x512xf32, #tpu.memory_space<vmem>>, %arg6: memref<512x512xf32, #tpu.memory_space<vmem>>, %arg7: memref<1x512xf32, #tpu.memory_space<vmem>>, %arg8: memref<512x128xf32, #tpu.memory_space<vmem>>, %arg9: memref<1x128xf32, #tpu.memory_space<vmem>>, %arg10: memref<8x128xf32, #tpu.memory_space<vmem>>) attributes {dimension_semantics = [#tpu.dimension_semantics<parallel>], iteration_bounds = array<i64: 1>, scalar_prefetch = 0 : i64, scratch_operands = 0 : i64, tpu.core_type = #tpu.core_type<tc>, window_params = [{transform_indices = @transform_0, window_bounds = array<i64: 8, 128>}, {pipeline_mode = #tpu.pipeline_mode<synchronous>, transform_indices = @transform_1, window_bounds = array<i64: 128, 2048>}, {pipeline_mode = #tpu.pipeline_mode<synchronous>, transform_indices = @transform_2, window_bounds = array<i64: 1, 2048>}, {pipeline_mode = #tpu.pipeline_mode<synchronous>, transform_indices = @transform_3, window_bounds = array<i64: 2048, 512>}, {pipeline_mode = #tpu.pipeline_mode<synchronous>, transform_indices = @transform_4, window_bounds = array<i64: 1, 512>}, {pipeline_mode = #tpu.pipeline_mode<synchronous>, transform_indices = @transform_5, window_bounds = array<i64: 512, 512>}, {pipeline_mode = #tpu.pipeline_mode<synchronous>, transform_indices = @transform_6, window_bounds = array<i64: 1, 512>}, {pipeline_mode = #tpu.pipeline_mode<synchronous>, transform_indices = @transform_7, window_bounds = array<i64: 512, 128>}, {pipeline_mode = #tpu.pipeline_mode<synchronous>, transform_indices = @transform_8, window_bounds = array<i64: 1, 128>}, {transform_indices = @transform_9, window_bounds = array<i64: 8, 128>}]} {
    %c0 = arith.constant 0 : index
    %c0_0 = arith.constant 0 : index
    %0 = vector.load %arg1[%c0, %c0_0] : memref<8x128xf32, #tpu.memory_space<vmem>>, vector<8x128xf32>
    %c0_1 = arith.constant 0 : index
    %c0_2 = arith.constant 0 : index
    %1 = vector.load %arg2[%c0_1, %c0_2] : memref<128x2048xf32, #tpu.memory_space<vmem>>, vector<128x2048xf32>
    %cst = arith.constant dense<0.000000e+00> : vector<8x2048xf32>
    %2 = tpu.matmul %0, %1, %cst {dimension_numbers = #tpu.dot_dimension_numbers<[1], [0], [0], [1], [0, 0, 1, 1], [], []>} : vector<8x128xf32>, vector<128x2048xf32>, vector<8x2048xf32> -> vector<8x2048xf32>
    %c0_3 = arith.constant 0 : index
    %c0_4 = arith.constant 0 : index
    %3 = vector.load %arg3[%c0_3, %c0_4] : memref<1x2048xf32, #tpu.memory_space<vmem>>, vector<1x2048xf32>
    %4 = vector.broadcast %3 : vector<1x2048xf32> to vector<8x2048xf32>
    %5 = arith.addf %2, %4 : vector<8x2048xf32>
    %cst_5 = arith.constant 0.000000e+00 : f32
    %6 = vector.broadcast %cst_5 : f32 to vector<8x2048xf32>
    %7 = arith.maximumf %5, %6 : vector<8x2048xf32>
    %c0_6 = arith.constant 0 : index
    %c0_7 = arith.constant 0 : index
    %8 = vector.load %arg4[%c0_6, %c0_7] : memref<2048x512xf32, #tpu.memory_space<vmem>>, vector<2048x512xf32>
    %cst_8 = arith.constant dense<0.000000e+00> : vector<8x512xf32>
    %9 = tpu.matmul %7, %8, %cst_8 {dimension_numbers = #tpu.dot_dimension_numbers<[1], [0], [0], [1], [0, 0, 1, 1], [], []>} : vector<8x2048xf32>, vector<2048x512xf32>, vector<8x512xf32> -> vector<8x512xf32>
    %c0_9 = arith.constant 0 : index
    %c0_10 = arith.constant 0 : index
    %10 = vector.load %arg5[%c0_9, %c0_10] : memref<1x512xf32, #tpu.memory_space<vmem>>, vector<1x512xf32>
    %11 = vector.broadcast %10 : vector<1x512xf32> to vector<8x512xf32>
    %12 = arith.addf %9, %11 : vector<8x512xf32>
    %cst_11 = arith.constant 0.000000e+00 : f32
    %13 = vector.broadcast %cst_11 : f32 to vector<8x512xf32>
    %14 = arith.maximumf %12, %13 : vector<8x512xf32>
    %c0_12 = arith.constant 0 : index
    %c0_13 = arith.constant 0 : index
    %15 = vector.load %arg6[%c0_12, %c0_13] : memref<512x512xf32, #tpu.memory_space<vmem>>, vector<512x512xf32>
    %cst_14 = arith.constant dense<0.000000e+00> : vector<8x512xf32>
    %16 = tpu.matmul %14, %15, %cst_14 {dimension_numbers = #tpu.dot_dimension_numbers<[1], [0], [0], [1], [0, 0, 1, 1], [], []>} : vector<8x512xf32>, vector<512x512xf32>, vector<8x512xf32> -> vector<8x512xf32>
    %c0_15 = arith.constant 0 : index
    %c0_16 = arith.constant 0 : index
    %17 = vector.load %arg7[%c0_15, %c0_16] : memref<1x512xf32, #tpu.memory_space<vmem>>, vector<1x512xf32>
    %18 = vector.broadcast %17 : vector<1x512xf32> to vector<8x512xf32>
    %19 = arith.addf %16, %18 : vector<8x512xf32>
    %cst_17 = arith.constant 0.000000e+00 : f32
    %20 = vector.broadcast %cst_17 : f32 to vector<8x512xf32>
    %21 = arith.maximumf %19, %20 : vector<8x512xf32>
    %c0_18 = arith.constant 0 : index
    %c0_19 = arith.constant 0 : index
    %22 = vector.load %arg8[%c0_18, %c0_19] : memref<512x128xf32, #tpu.memory_space<vmem>>, vector<512x128xf32>
    %cst_20 = arith.constant dense<0.000000e+00> : vector<8x128xf32>
    %23 = tpu.matmul %21, %22, %cst_20 {dimension_numbers = #tpu.dot_dimension_numbers<[1], [0], [0], [1], [0, 0, 1, 1], [], []>} : vector<8x512xf32>, vector<512x128xf32>, vector<8x128xf32> -> vector<8x128xf32>
    %c0_21 = arith.constant 0 : index
    %c0_22 = arith.constant 0 : index
    %24 = vector.load %arg9[%c0_21, %c0_22] : memref<1x128xf32, #tpu.memory_space<vmem>>, vector<1x128xf32>
    %25 = vector.broadcast %24 : vector<1x128xf32> to vector<8x128xf32>
    %26 = arith.addf %23, %25 : vector<8x128xf32>
    %c0_23 = arith.constant 0 : index
    %c0_24 = arith.constant 0 : index
    %27 = vector.load %arg10[%c0_23, %c0_24] : memref<8x128xf32, #tpu.memory_space<vmem>>, vector<8x128xf32>
    tpu.vector_store %arg10[%c0_23, %c0_24], %26 {strides = array<i32>} : memref<8x128xf32, #tpu.memory_space<vmem>>, vector<8x128xf32>,
    return
  }
  func.func @transform_0(%arg0: i32) -> (i32, i32) {
    %c0_i32 = arith.constant 0 : i32
    %c0_i32_0 = arith.constant 0 : i32
    return %arg0, %c0_i32 : i32, i32
  }
  func.func @transform_1(%arg0: i32) -> (i32, i32) {
    %c0_i32 = arith.constant 0 : i32
    %c0_i32_0 = arith.constant 0 : i32
    %c0_i32_1 = arith.constant 0 : i32
    return %c0_i32, %c0_i32_0 : i32, i32
  }
  func.func @transform_2(%arg0: i32) -> (i32, i32) {
    %c0_i32 = arith.constant 0 : i32
    %c0_i32_0 = arith.constant 0 : i32
    %c0_i32_1 = arith.constant 0 : i32
    return %c0_i32, %c0_i32_0 : i32, i32
  }
  func.func @transform_3(%arg0: i32) -> (i32, i32) {
    %c0_i32 = arith.constant 0 : i32
    %c0_i32_0 = arith.constant 0 : i32
    %c0_i32_1 = arith.constant 0 : i32
    return %c0_i32, %c0_i32_0 : i32, i32
  }
  func.func @transform_4(%arg0: i32) -> (i32, i32) {
    %c0_i32 = arith.constant 0 : i32
    %c0_i32_0 = arith.constant 0 : i32
    %c0_i32_1 = arith.constant 0 : i32
    return %c0_i32, %c0_i32_0 : i32, i32
  }
  func.func @transform_5(%arg0: i32) -> (i32, i32) {
    %c0_i32 = arith.constant 0 : i32
    %c0_i32_0 = arith.constant 0 : i32
    %c0_i32_1 = arith.constant 0 : i32
    return %c0_i32, %c0_i32_0 : i32, i32
  }
  func.func @transform_6(%arg0: i32) -> (i32, i32) {
    %c0_i32 = arith.constant 0 : i32
    %c0_i32_0 = arith.constant 0 : i32
    %c0_i32_1 = arith.constant 0 : i32
    return %c0_i32, %c0_i32_0 : i32, i32
  }
  func.func @transform_7(%arg0: i32) -> (i32, i32) {
    %c0_i32 = arith.constant 0 : i32
    %c0_i32_0 = arith.constant 0 : i32
    %c0_i32_1 = arith.constant 0 : i32
    return %c0_i32, %c0_i32_0 : i32, i32
  }
  func.func @transform_8(%arg0: i32) -> (i32, i32) {
    %c0_i32 = arith.constant 0 : i32
    %c0_i32_0 = arith.constant 0 : i32
    %c0_i32_1 = arith.constant 0 : i32
    return %c0_i32, %c0_i32_0 : i32, i32
  }
  func.func @transform_9(%arg0: i32) -> (i32, i32) {
    %c0_i32 = arith.constant 0 : i32
    %c0_i32_0 = arith.constant 0 : i32
    return %arg0, %c0_i32 : i32, i32
  }
}

</mosaic_0001>

<bundles_post_ra>
// kernel: decoder_forward.1
= control target key start
LH: loop header
LB: loop body
LE: loop exit
PB: predicated region body
PF: predicated region fallthrough
CT: control target
= control target key end

     0   :  { %14 = vsyncpa [#allocation3], 0  ;;  %s6306_s0 = inlined_call_operand.vmem [shape: f32[8,128], index: 0, kind: input, shape index: {}]   ;;  %s6307_s1 = inlined_call_operand.hbm [shape: f32[128,2048], index: 1, kind: input, shape index: {}]   ;;  %s6308_s2 = inlined_call_operand.hbm [shape: f32[1,2048], index: 2, kind: input, shape index: {}]   ;;  %s6309_s3 = inlined_call_operand.hbm [shape: f32[2048,512], index: 3, kind: input, shape index: {}]   ;;  %s6310_s4 = inlined_call_operand.hbm [shape: f32[1,512], index: 4, kind: input, shape index: {}]   ;;  %s6311_s5 = inlined_call_operand.hbm [shape: f32[512,512], index: 5, kind: input, shape index: {}]   ;;  %s6312_s6 = inlined_call_operand.hbm [shape: f32[1,512], index: 6, kind: input, shape index: {}]   ;;  %s6313_s7 = inlined_call_operand.hbm [shape: f32[512,128], index: 7, kind: input, shape index: {}]   ;;  %s6314_s8 = inlined_call_operand.hbm [shape: f32[1,128], index: 8, kind: input, shape index: {}]   ;;  %s6315_s9 = inlined_call_operand.hbm [shape: f32[8,128], index: 9, kind: output, shape index: {}]  }
   0x1   :  { %15 = vsyncpa [#allocation6], 0 }
   0x2   :  { %16 = vsyncpa [#allocation9], 0 }
   0x3   :  { %17 = vsyncpa [#allocation12], 0 }
   0x4   :  { %18 = vsyncpa [#allocation15], 0 }
   0x5   :  { %19 = vsyncpa [#allocation4], 0  ;;  %s5980_s30 = smov [#allocation5]   ;;  %s5981_s11 = smov [#allocation8]  }
   0x6   :  { %s40_s10 = sshll.u32 %s5980_s30, 4  ;;  %s62_s12 = sshll.u32 %s5981_s11, 4  ;;  %s41_s10 = int_to_ptr.vmem [resolvable:$true] %s40_s10  ;;  %s63_s12 = int_to_ptr.vmem [resolvable:$true] %s62_s12 }
   0x7   :  { %s5770_s15 = scalar_lea.hbm %s6308_s2, 256 }
   0x8   :  { %p5771_p0 = scmp.ne.s32.totalorder %s6308_s2, %s5770_s15  ;;  %p5774_p1 = scmp.lt.u32.totalorder %s5770_s15, %s6308_s2 }
   0xa   :  { %p5776_p2 = pnand %p5774_p1, %p5771_p0 }
   0xc   :  { %5779 = shalt.err (!%p5776_p2)
}
   0xd   :  { %s5780_s20 = scalar_lea.vmem %s41_s10, 256  ;;  %p5785_p4 = scmp.lt.s32.totalorder %s41_s10, %s41_s10 }
   0xe   :  { %p5781_p3 = scmp.ne.s32.totalorder %s41_s10, %s5780_s20  ;;  %p5786_p5 = scmp.lt.s32.totalorder %s5780_s20, %s5780_s20 }
  0x10   :  { %p5787_p6 = por %p5786_p5, %p5785_p4 }
  0x12   :  { %p5788_p7 = pnand %p5787_p6, %p5781_p3 }
  0x14   :  { %5791 = shalt.err (!%p5788_p7)
}
  0x15   :  { %43 = dma.hbm_to_vmem [thread:$0]  %s6308_s2, 256, %s41_s10, [#allocation6]  }
  0x16   :  { %s5792_s25 = scalar_lea.hbm %s6310_s4, 64 }
  0x17   :  { %p5793_p8 = scmp.ne.s32.totalorder %s6310_s4, %s5792_s25  ;;  %p5796_p9 = scmp.lt.u32.totalorder %s5792_s25, %s6310_s4 }
  0x19   :  { %p5798_p10 = pnand %p5796_p9, %p5793_p8 }
  0x1b   :  { %5801 = shalt.err (!%p5798_p10)
}
  0x1c   :  { %s5802_s30 = scalar_lea.vmem %s63_s12, 64  ;;  %p5807_p12 = scmp.lt.s32.totalorder %s63_s12, %s63_s12 }
  0x1d   :  { %p5803_p11 = scmp.ne.s32.totalorder %s63_s12, %s5802_s30  ;;  %p5808_p13 = scmp.lt.s32.totalorder %s5802_s30, %s5802_s30 }
  0x1f   :  { %p5809_p0 = por %p5808_p13, %p5807_p12 }
  0x21   :  { %p5810_p1 = pnand %p5809_p0, %p5803_p11 }
  0x23   :  { %5813 = shalt.err (!%p5810_p1)
}
  0x24   :  { %65 = dma.hbm_to_vmem [thread:$0]  %s6310_s4, 64, %s63_s12, [#allocation9]  }
  0x25   :  { %s5982_s11 = smov [#allocation11]   ;;  %s5983_s14 = smov [#allocation2]  }
  0x26   :  { %s84_s13 = sshll.u32 %s5982_s11, 4  ;;  %s27_s15 = sshll.u32 %s5983_s14, 4  ;;  %s85_s13 = int_to_ptr.vmem [resolvable:$true] %s84_s13  ;;  %s6069_s15 = int_to_ptr.vmem [resolvable:$true] %s27_s15 }
  0x27   :  { %s5814_s18 = scalar_lea.hbm %s6312_s6, 64 }
  0x28   :  { %p5815_p2 = scmp.ne.s32.totalorder %s6312_s6, %s5814_s18  ;;  %p5818_p3 = scmp.lt.u32.totalorder %s5814_s18, %s6312_s6 }
  0x2a   :  { %p5820_p4 = pnand %p5818_p3, %p5815_p2 }
  0x2c   :  { %5823 = shalt.err (!%p5820_p4)
}
  0x2d   :  { %s5824_s4 = scalar_lea.vmem %s85_s13, 64  ;;  %p5829_p6 = scmp.lt.s32.totalorder %s85_s13, %s85_s13 }
  0x2e   :  { %p5825_p5 = scmp.ne.s32.totalorder %s85_s13, %s5824_s4  ;;  %p5830_p7 = scmp.lt.s32.totalorder %s5824_s4, %s5824_s4 }
  0x30   :  { %p5831_p8 = por %p5830_p7, %p5829_p6 }
  0x32   :  { %p5832_p9 = pnand %p5831_p8, %p5825_p5 }
  0x34   :  { %5835 = shalt.err (!%p5832_p9)
}
  0x35   :  { %87 = dma.hbm_to_vmem [thread:$0]  %s6312_s6, 64, %s85_s13, [#allocation12]  }
  0x36   :  { %s5836_s26 = scalar_lea.hbm %s6307_s1, 32768 }
  0x37   :  { %p5837_p10 = scmp.ne.s32.totalorder %s6307_s1, %s5836_s26  ;;  %p5840_p11 = scmp.lt.u32.totalorder %s5836_s26, %s6307_s1 }
  0x39   :  { %p5842_p12 = pnand %p5840_p11, %p5837_p10 }
  0x3b   :  { %5845 = shalt.err (!%p5842_p12)
}
  0x3c   :  { %s5846_s2 = scalar_lea.vmem %s6069_s15, 32768  ;;  %p5851_p0 = scmp.lt.s32.totalorder %s6069_s15, %s6069_s15 }
  0x3d   :  { %p5847_p13 = scmp.ne.s32.totalorder %s6069_s15, %s5846_s2  ;;  %p5852_p1 = scmp.lt.s32.totalorder %s5846_s2, %s5846_s2 }
  0x3f   :  { %p5853_p2 = por %p5852_p1, %p5851_p0 }
  0x41   :  { %p5854_p3 = pnand %p5853_p2, %p5847_p13 }
  0x43   :  { %5857 = shalt.err (!%p5854_p3)
}
  0x44   :  { %s5984_s6 = smov 2048   ;;  %s5985_s10 = smov 128  }
  0x45   :  { %33 = dma.hbm_to_vmem [thread:$0]  %s6307_s1, 32768, %s6069_s15, [#allocation3], %s5984_s6, %s5984_s6, %s5985_s10  }
  0x46   :  { %s5986_s14 = smov [#allocation7]   ;;  %s5858_s19 = scalar_lea.hbm %s6309_s3, 131072 }
  0x47   :  { %s49_s16 = sshll.u32 %s5986_s14, 4  ;;  %p5859_p4 = scmp.ne.s32.totalorder %s6309_s3, %s5858_s19  ;;  %s50_s16 = int_to_ptr.vmem [resolvable:$true] %s49_s16 }
  0x48   :  { %p5862_p5 = scmp.lt.u32.totalorder %s5858_s19, %s6309_s3 }
  0x4a   :  { %p5864_p6 = pnand %p5862_p5, %p5859_p4 }
  0x4c   :  { %5867 = shalt.err (!%p5864_p6)
}
  0x4d   :  { %s5868_s12 = scalar_lea.vmem %s50_s16, 131072  ;;  %p5873_p8 = scmp.lt.s32.totalorder %s50_s16, %s50_s16 }
  0x4e   :  { %p5869_p7 = scmp.ne.s32.totalorder %s50_s16, %s5868_s12  ;;  %p5874_p9 = scmp.lt.s32.totalorder %s5868_s12, %s5868_s12 }
  0x50   :  { %p5875_p10 = por %p5874_p9, %p5873_p8 }
  0x52   :  { %p5876_p11 = pnand %p5875_p10, %p5869_p7 }
  0x54   :  { %5879 = shalt.err (!%p5876_p11)
}
  0x55   :  { %s5987_s1 = smov 512   ;;  %s5988_s15 = smov 32  }
  0x56   :  { %55 = dma.hbm_to_vmem [thread:$0]  %s6309_s3, 131072, %s50_s16, [#allocation6], %s5987_s1, %s5987_s1, %s5988_s15  }
  0x57   :  { %s5989_s25 = smov [#allocation10]   ;;  %s5990_s27 = smov [#allocation13]  }
  0x58   :  { %s71_s26 = sshll.u32 %s5989_s25, 4  ;;  %s93_s28 = sshll.u32 %s5990_s27, 4  ;;  %s72_s26 = int_to_ptr.vmem [resolvable:$true] %s71_s26  ;;  %s94_s28 = int_to_ptr.vmem [resolvable:$true] %s93_s28 }
  0x59   :  { %s5880_s2 = scalar_lea.hbm %s6311_s5, 32768 }
  0x5a   :  { %p5881_p12 = scmp.ne.s32.totalorder %s6311_s5, %s5880_s2  ;;  %p5884_p13 = scmp.lt.u32.totalorder %s5880_s2, %s6311_s5 }
  0x5c   :  { %p5886_p0 = pnand %p5884_p13, %p5881_p12 }
  0x5e   :  { %5889 = shalt.err (!%p5886_p0)
}
  0x5f   :  { %s5890_s3 = scalar_lea.vmem %s72_s26, 32768  ;;  %p5895_p2 = scmp.lt.s32.totalorder %s72_s26, %s72_s26 }
  0x60   :  { %p5891_p1 = scmp.ne.s32.totalorder %s72_s26, %s5890_s3  ;;  %p5896_p3 = scmp.lt.s32.totalorder %s5890_s3, %s5890_s3 }
  0x62   :  { %p5897_p4 = por %p5896_p3, %p5895_p2 }
  0x64   :  { %p5898_p5 = pnand %p5897_p4, %p5891_p1 }
  0x66   :  { %5901 = shalt.err (!%p5898_p5)
}
  0x67   :  { %77 = dma.hbm_to_vmem [thread:$0]  %s6311_s5, 32768, %s72_s26, [#allocation9], %s5987_s1, %s5987_s1, %s5988_s15  }
  0x68   :  { %s5902_s20 = scalar_lea.hbm %s6313_s7, 8192 }
  0x69   :  { %p5903_p6 = scmp.ne.s32.totalorder %s6313_s7, %s5902_s20  ;;  %p5906_p7 = scmp.lt.u32.totalorder %s5902_s20, %s6313_s7 }
  0x6b   :  { %p5908_p8 = pnand %p5906_p7, %p5903_p6 }
  0x6d   :  { %5911 = shalt.err (!%p5908_p8)
}
  0x6e   :  { %s5912_s23 = scalar_lea.vmem %s94_s28, 8192  ;;  %p5917_p10 = scmp.lt.s32.totalorder %s94_s28, %s94_s28 }
  0x6f   :  { %p5913_p9 = scmp.ne.s32.totalorder %s94_s28, %s5912_s23  ;;  %p5918_p11 = scmp.lt.s32.totalorder %s5912_s23, %s5912_s23 }
  0x71   :  { %p5919_p12 = por %p5918_p11, %p5917_p10 }
  0x73   :  { %p5920_p13 = pnand %p5919_p12, %p5913_p9 }
  0x75   :  { %5923 = shalt.err (!%p5920_p13)
}
  0x76   :  { %s5991_s5 = smov 8   ;;  %s5992_s24 = smov [#allocation14]  }
  0x77   :  { %99 = dma.hbm_to_vmem [thread:$0]  %s6313_s7, 8192, %s94_s28, [#allocation12], %s5985_s10, %s5985_s10, %s5991_s5  }
  0x78   :  { %s106_s25 = sshll.u32 %s5992_s24, 4  ;;  %s5924_s29 = scalar_lea.hbm %s6314_s8, 16  ;;  %s107_s25 = int_to_ptr.vmem [resolvable:$true] %s106_s25 }
  0x79   :  { %p5925_p0 = scmp.ne.s32.totalorder %s6314_s8, %s5924_s29  ;;  %p5928_p1 = scmp.lt.u32.totalorder %s5924_s29, %s6314_s8 }
  0x7b   :  { %p5930_p2 = pnand %p5928_p1, %p5925_p0 }
  0x7d   :  { %5933 = shalt.err (!%p5930_p2)
}
  0x7e   :  { %s5934_s13 = scalar_lea.vmem %s107_s25, 16  ;;  %s5938_s7 = scalar_lea.vmem %s107_s25, 32 }
  0x7f   :  { %p5935_p3 = scmp.ne.s32.totalorder %s107_s25, %s5934_s13  ;;  %p5939_p4 = scmp.lt.s32.totalorder %s107_s25, %s107_s25 }
  0x80   :  { %p5940_p5 = scmp.lt.s32.totalorder %s5938_s7, %s5934_s13 }
  0x82   :  { %p5941_p6 = por %p5940_p5, %p5939_p4 }
  0x84   :  { %p5942_p7 = pnand %p5941_p6, %p5935_p3 }
  0x86   :  { %5945 = shalt.err (!%p5942_p7)
}
  0x87   :  { %109 = dma.hbm_to_vmem [thread:$0]  %s6314_s8, 16, %s107_s25, [#allocation15]  }
  0x88   :  { %5968 = dma.done.wait [#allocation3], 32768  }
  0x89   :  { %5969 = vsyncadd [#allocation3], 4294934528 }
  0x8a   :  { %5970 = dma.done.wait [#allocation6], 131328  }
  0x8b   :  { %5971 = vsyncadd [#allocation6], 4294835968 }
  0x8c   :  { %5972 = dma.done.wait [#allocation9], 32832  }
  0x8d   :  { %5973 = vsyncadd [#allocation9], 4294934464 }
  0x8e   :  { %5974 = dma.done.wait [#allocation12], 8256  }
  0x8f   :  { %5975 = vsyncadd [#allocation12], 4294959040 }
  0x90   :  { %5976 = dma.done.wait [#allocation15], 16  }
  0x91   :  { %5977 = vsyncadd [#allocation15], 4294967280  ;;  %v5993_v0 = vmov 0.0   ;;  %v136_v1 = vld [vmem:[#allocation2 + $0x8] sm:$0xff]  ;;  %v135_v3 = vld [vmem:[#allocation2] sm:$0xff] }
  0x92   :  { %539 = vmatprep.mubr.f32.mxu0 %v5993_v0  ;;  %610 = vmatprep.mubr.f32.mxu1 %v5993_v0  ;;  %v152_v2 = vld [vmem:[#allocation2 + $0x88] sm:$0xff]  ;;  %v151_v5 = vld [vmem:[#allocation2 + $0x80] sm:$0xff]  ;;  %v138_v28 = vld [vmem:[#allocation2 + $0x18] sm:$0xff] }
  0x93   :  { %v4113_v4 = vpack.c.bf16 %v152_v2, %v136_v1  ;;  %v168_v6 = vld [vmem:[#allocation2 + $0x108] sm:$0xff]  ;;  %v4115_v8 = vpack.c.bf16 %v151_v5, %v135_v3  ;;  %v167_v10 = vld [vmem:[#allocation2 + $0x100] sm:$0xff]  ;;  %v154_v29 = vld [vmem:[#allocation2 + $0x98] sm:$0xff] }
  0x94   :  { %v184_v7 = vld [vmem:[#allocation2 + $0x188] sm:$0xff]  ;;  %v183_v11 = vld [vmem:[#allocation2 + $0x180] sm:$0xff]  ;;  %v137_v30 = vld [vmem:[#allocation2 + $0x10] sm:$0xff]  ;;  %v4145_v32 = vpack.c.bf16 %v154_v29, %v138_v28 }
  0x95   :  { %v4117_v9 = vpack.c.bf16 %v184_v7, %v168_v6  ;;  %v200_v12 = vld [vmem:[#allocation2 + $0x208] sm:$0xff]  ;;  %4114 = vmatprep.subr.bf16.mxu0 %v4113_v4  ;;  %v4119_v14 = vpack.c.bf16 %v183_v11, %v167_v10  ;;  %v199_v16 = vld [vmem:[#allocation2 + $0x200] sm:$0xff]  ;;  %v153_v33 = vld [vmem:[#allocation2 + $0x90] sm:$0xff] }
  0x96   :  { %v216_v13 = vld [vmem:[#allocation2 + $0x288] sm:$0xff]  ;;  %4116 = vmatpush1.bf16.msra.mxu0 %v4115_v8  ;;  %v215_v17 = vld [vmem:[#allocation2 + $0x280] sm:$0xff]  ;;  %v170_v34 = vld [vmem:[#allocation2 + $0x118] sm:$0xff]  ;;  %v4147_v37 = vpack.c.bf16 %v153_v33, %v137_v30  ;;  %4146 = vmatprep.subr.bf16.mxu1 %v4145_v32 }
  0x97   :  { %4118 = vmatprep.subr.bf16.mxu0 %v4117_v9  ;;  %v4121_v15 = vpack.c.bf16 %v216_v13, %v200_v12  ;;  %v232_v18 = vld [vmem:[#allocation2 + $0x308] sm:$0xff]  ;;  %v4123_v20 = vpack.c.bf16 %v215_v17, %v199_v16  ;;  %v231_v22 = vld [vmem:[#allocation2 + $0x300] sm:$0xff]  ;;  %v186_v35 = vld [vmem:[#allocation2 + $0x198] sm:$0xff] }
  0x98   :  { %v248_v19 = vld [vmem:[#allocation2 + $0x388] sm:$0xff]  ;;  %v247_v23 = vld [vmem:[#allocation2 + $0x380] sm:$0xff]  ;;  %v4149_v38 = vpack.c.bf16 %v186_v35, %v170_v34  ;;  %v169_v39 = vld [vmem:[#allocation2 + $0x110] sm:$0xff]  ;;  %4148 = vmatpush1.bf16.msra.mxu1 %v4147_v37 }
  0x99   :  { %v4125_v21 = vpack.c.bf16 %v248_v19, %v232_v18  ;;  %v264_v24 = vld [vmem:[#allocation2 + $0x408] sm:$0xff]  ;;  %v263_v26 = vld [vmem:[#allocation2 + $0x400] sm:$0xff]  ;;  %v4127_v31 = vpack.c.bf16 %v247_v23, %v231_v22  ;;  %v185_v40 = vld [vmem:[#allocation2 + $0x190] sm:$0xff] }
  0x9a   :  { %4120 = vmatpush1.bf16.msra.mxu0 %v4119_v14  ;;  %v280_v25 = vld [vmem:[#allocation2 + $0x488] sm:$0xff]  ;;  %v279_v27 = vld [vmem:[#allocation2 + $0x480] sm:$0xff]  ;;  %v202_v41 = vld [vmem:[#allocation2 + $0x218] sm:$0xff]  ;;  %v4151_v45 = vpack.c.bf16 %v185_v40, %v169_v39  ;;  %4150 = vmatprep.subr.bf16.mxu1 %v4149_v38 }
  0x9b   :  { %4122 = vmatprep.subr.bf16.mxu0 %v4121_v15  ;;  %v4129_v36 = vpack.c.bf16 %v280_v25, %v264_v24  ;;  %v296_v42 = vld [vmem:[#allocation2 + $0x508] sm:$0xff]  ;;  %v218_v44 = vld [vmem:[#allocation2 + $0x298] sm:$0xff]  ;;  %v4131_v46 = vpack.c.bf16 %v279_v27, %v263_v26  ;;  %v295_v47 = vld [vmem:[#allocation2 + $0x500] sm:$0xff] }
  0x9c   :  { %v312_v43 = vld [vmem:[#allocation2 + $0x588] sm:$0xff]  ;;  %v4153_v48 = vpack.c.bf16 %v218_v44, %v202_v41  ;;  %v201_v49 = vld [vmem:[#allocation2 + $0x210] sm:$0xff]  ;;  %v311_v52 = vld [vmem:[#allocation2 + $0x580] sm:$0xff]  ;;  %4152 = vmatpush1.bf16.msra.mxu1 %v4151_v45 }
  0x9d   :  { %v217_v50 = vld [vmem:[#allocation2 + $0x290] sm:$0xff]  ;;  %v4133_v51 = vpack.c.bf16 %v312_v43, %v296_v42  ;;  %v234_v53 = vld [vmem:[#allocation2 + $0x318] sm:$0xff]  ;;  %v328_v55 = vld [vmem:[#allocation2 + $0x608] sm:$0xff]  ;;  %v4135_v58 = vpack.c.bf16 %v311_v52, %v295_v47 }
  0x9e   :  { %4124 = vmatpush1.bf16.msra.mxu0 %v4123_v20  ;;  %v250_v54 = vld [vmem:[#allocation2 + $0x398] sm:$0xff]  ;;  %v344_v56 = vld [vmem:[#allocation2 + $0x688] sm:$0xff]  ;;  %v4155_v57 = vpack.c.bf16 %v217_v50, %v201_v49  ;;  %v327_v59 = vld [vmem:[#allocation2 + $0x600] sm:$0xff]  ;;  %4154 = vmatprep.subr.bf16.mxu1 %v4153_v48 }
  0x9f   :  { %4126 = vmatprep.subr.bf16.mxu0 %v4125_v21  ;;  %v4157_v60 = vpack.c.bf16 %v250_v54, %v234_v53  ;;  %v233_v61 = vld [vmem:[#allocation2 + $0x310] sm:$0xff]  ;;  %v4137_v63 = vpack.c.bf16 %v344_v56, %v328_v55  ;;  %v343_v1 = vld [vmem:[#allocation2 + $0x680] sm:$0xff]  ;;  %v266_v2 = vld [vmem:[#allocation2 + $0x418] sm:$0xff] }
  0xa0   :  { %v249_v62 = vld [vmem:[#allocation2 + $0x390] sm:$0xff]  ;;  %v282_v3 = vld [vmem:[#allocation2 + $0x498] sm:$0xff]  ;;  %v360_v4 = vld [vmem:[#allocation2 + $0x708] sm:$0xff]  ;;  %4156 = vmatpush1.bf16.msra.mxu1 %v4155_v57  ;;  %v4139_v7 = vpack.c.bf16 %v343_v1, %v327_v59 }
  0xa1   :  { %v376_v5 = vld [vmem:[#allocation2 + $0x788] sm:$0xff]  ;;  %v4159_v6 = vpack.c.bf16 %v249_v62, %v233_v61  ;;  %v359_v8 = vld [vmem:[#allocation2 + $0x700] sm:$0xff]  ;;  %4158 = vmatprep.subr.bf16.mxu1 %v4157_v60  ;;  %v4161_v9 = vpack.c.bf16 %v282_v3, %v266_v2  ;;  %v265_v10 = vld [vmem:[#allocation2 + $0x410] sm:$0xff] }
  0xa2   :  { %4128 = vmatpush1.bf16.msra.mxu0 %v4127_v31  ;;  %v281_v11 = vld [vmem:[#allocation2 + $0x490] sm:$0xff]  ;;  %v4141_v12 = vpack.c.bf16 %v376_v5, %v360_v4  ;;  %v375_v13 = vld [vmem:[#allocation2 + $0x780] sm:$0xff]  ;;  %v298_v14 = vld [vmem:[#allocation2 + $0x518] sm:$0xff] }
  0xa3   :  { %4130 = vmatprep.subr.bf16.mxu0 %v4129_v36  ;;  %v314_v15 = vld [vmem:[#allocation2 + $0x598] sm:$0xff]  ;;  %v140_v16 = vld [vmem:[#allocation2 + $0x28] sm:$0xff]  ;;  %v4163_v18 = vpack.c.bf16 %v281_v11, %v265_v10  ;;  %v4143_v19 = vpack.c.bf16 %v375_v13, %v359_v8  ;;  %v297_v21 = vld [vmem:[#allocation2 + $0x510] sm:$0xff] }
  0xa4   :  { %v156_v17 = vld [vmem:[#allocation2 + $0xa8] sm:$0xff]  ;;  %4160 = vmatpush1.bf16.msra.mxu1 %v4159_v6  ;;  %v4165_v20 = vpack.c.bf16 %v314_v15, %v298_v14  ;;  %v313_v22 = vld [vmem:[#allocation2 + $0x590] sm:$0xff]  ;;  %v330_v23 = vld [vmem:[#allocation2 + $0x618] sm:$0xff] }
  0xa5   :  { %4162 = vmatprep.subr.bf16.mxu1 %v4161_v9  ;;  %v346_v24 = vld [vmem:[#allocation2 + $0x698] sm:$0xff]  ;;  %v4177_v25 = vpack.c.bf16 %v156_v17, %v140_v16  ;;  %v139_v26 = vld [vmem:[#allocation2 + $0x20] sm:$0xff]  ;;  %v172_v28 = vld [vmem:[#allocation2 + $0x128] sm:$0xff]  ;;  %v4167_v31 = vpack.c.bf16 %v313_v22, %v297_v21 }
  0xa6   :  { %4132 = vmatpush1.bf16.msra.mxu0 %v4131_v46  ;;  %v155_v27 = vld [vmem:[#allocation2 + $0xa0] sm:$0xff]  ;;  %v188_v29 = vld [vmem:[#allocation2 + $0x1a8] sm:$0xff]  ;;  %v4169_v32 = vpack.c.bf16 %v346_v24, %v330_v23  ;;  %v329_v33 = vld [vmem:[#allocation2 + $0x610] sm:$0xff] }
  0xa7   :  { %4134 = vmatprep.subr.bf16.mxu0 %v4133_v51  ;;  %v6156_v30 = vld [vmem:[%s6306_s0] sm:$0xff]  ;;  %v345_v34 = vld [vmem:[#allocation2 + $0x690] sm:$0xff]  ;;  %v362_v35 = vld [vmem:[#allocation2 + $0x718] sm:$0xff]  ;;  %v4179_v36 = vpack.c.bf16 %v155_v27, %v139_v26  ;;  %v4181_v38 = vpack.c.bf16 %v188_v29, %v172_v28  ;;  %s5994_s0 = smov [#allocation16]  }
  0xa8   :  { %4164 = vmatpush1.bf16.msra.mxu1 %v4163_v18  ;;  %v378_v37 = vld [vmem:[#allocation2 + $0x798] sm:$0xff]  ;;  %v171_v39 = vld [vmem:[#allocation2 + $0x120] sm:$0xff]  ;;  %v204_v41 = vld [vmem:[#allocation2 + $0x228] sm:$0xff]  ;;  %v4171_v43 = vpack.c.bf16 %v345_v34, %v329_v33  ;;  %s4029_s3 = sshll.u32 %s5994_s0, 4  ;;  %s4030_s3 = int_to_ptr.vmem [resolvable:$true] %s4029_s3 }
  0xa9   :  { %4166 = vmatprep.subr.bf16.mxu1 %v4165_v20  ;;  %v187_v40 = vld [vmem:[#allocation2 + $0x1a0] sm:$0xff]  ;;  %v220_v42 = vld [vmem:[#allocation2 + $0x2a8] sm:$0xff]  ;;  %v4173_v44 = vpack.c.bf16 %v378_v37, %v362_v35  ;;  %v361_v45 = vld [vmem:[#allocation2 + $0x710] sm:$0xff]  ;;  %s5946_s16 = scalar_lea.vmem %s4030_s3, 128  ;;  %p5951_p9 = scmp.lt.s32.totalorder %s4030_s3, %s4030_s3 }
  0xaa   :  { %4136 = vmatpush1.bf16.msra.mxu0 %v4135_v58  ;;  %v377_v46 = vld [vmem:[#allocation2 + $0x790] sm:$0xff]  ;;  %v142_v47 = vld [vmem:[#allocation2 + $0x38] sm:$0xff]  ;;  %v4183_v48 = vpack.c.bf16 %v187_v40, %v171_v39  ;;  %v4185_v50 = vpack.c.bf16 %v220_v42, %v204_v41  ;;  %v203_v51 = vld [vmem:[#allocation2 + $0x220] sm:$0xff]  ;;  %p5947_p8 = scmp.ne.s32.totalorder %s4030_s3, %s5946_s16  ;;  %p5952_p10 = scmp.lt.s32.totalorder %s5946_s16, %s5946_s16 }
  0xab   :  { %4138 = vmatprep.subr.bf16.mxu0 %v4137_v63  ;;  %v158_v49 = vld [vmem:[#allocation2 + $0xb8] sm:$0xff]  ;;  %v219_v52 = vld [vmem:[#allocation2 + $0x2a0] sm:$0xff]  ;;  %v236_v53 = vld [vmem:[#allocation2 + $0x328] sm:$0xff]  ;;  %v4175_v55 = vpack.c.bf16 %v377_v46, %v361_v45 }
  0xac   :  { %4168 = vmatpush1.bf16.msra.mxu1 %v4167_v31  ;;  %v252_v54 = vld [vmem:[#allocation2 + $0x3a8] sm:$0xff]  ;;  %v4209_v56 = vpack.c.bf16 %v158_v49, %v142_v47  ;;  %v141_v57 = vld [vmem:[#allocation2 + $0x30] sm:$0xff]  ;;  %v174_v59 = vld [vmem:[#allocation2 + $0x138] sm:$0xff]  ;;  %v4187_v60 = vpack.c.bf16 %v219_v52, %v203_v51  ;;  %p5953_p11 = por %p5952_p10, %p5951_p9 }
  0xad   :  { %4170 = vmatprep.subr.bf16.mxu1 %v4169_v32  ;;  %v157_v58 = vld [vmem:[#allocation2 + $0xb0] sm:$0xff]  ;;  %v190_v61 = vld [vmem:[#allocation2 + $0x1b8] sm:$0xff]  ;;  %v4189_v62 = vpack.c.bf16 %v252_v54, %v236_v53  ;;  %v235_v63 = vld [vmem:[#allocation2 + $0x320] sm:$0xff] }
  0xae   :  { %4140 = vmatpush1.bf16.msra.mxu0 %v4139_v7  ;;  %v251_v1 = vld [vmem:[#allocation2 + $0x3a0] sm:$0xff]  ;;  %v268_v2 = vld [vmem:[#allocation2 + $0x428] sm:$0xff]  ;;  %v4211_v4 = vpack.c.bf16 %v157_v58, %v141_v57  ;;  %v4213_v5 = vpack.c.bf16 %v190_v61, %v174_v59  ;;  %v173_v6 = vld [vmem:[#allocation2 + $0x130] sm:$0xff]  ;;  %p5954_p12 = pnand %p5953_p11, %p5947_p8 }
  0xaf   :  { %4142 = vmatprep.subr.bf16.mxu0 %v4141_v12  ;;  %v284_v3 = vld [vmem:[#allocation2 + $0x4a8] sm:$0xff]  ;;  %v189_v7 = vld [vmem:[#allocation2 + $0x1b0] sm:$0xff]  ;;  %v206_v8 = vld [vmem:[#allocation2 + $0x238] sm:$0xff]  ;;  %v4191_v9 = vpack.c.bf16 %v251_v1, %v235_v63 }
  0xb0   :  { %4172 = vmatpush1.bf16.msra.mxu1 %v4171_v43  ;;  %v222_v10 = vld [vmem:[#allocation2 + $0x2b8] sm:$0xff]  ;;  %v4193_v11 = vpack.c.bf16 %v284_v3, %v268_v2  ;;  %v267_v12 = vld [vmem:[#allocation2 + $0x420] sm:$0xff]  ;;  %v300_v14 = vld [vmem:[#allocation2 + $0x528] sm:$0xff]  ;;  %v4215_v16 = vpack.c.bf16 %v189_v7, %v173_v6 }
  0xb1   :  { %4174 = vmatprep.subr.bf16.mxu1 %v4173_v44  ;;  %v283_v13 = vld [vmem:[#allocation2 + $0x4a0] sm:$0xff]  ;;  %v316_v15 = vld [vmem:[#allocation2 + $0x5a8] sm:$0xff]  ;;  %v4217_v17 = vpack.c.bf16 %v222_v10, %v206_v8  ;;  %v205_v18 = vld [vmem:[#allocation2 + $0x230] sm:$0xff] }
  0xb2   :  { %4144 = vmatpush1.bf16.msra.mxu0 %v4143_v19  ;;  %v221_v19 = vld [vmem:[#allocation2 + $0x2b0] sm:$0xff]  ;;  %v238_v20 = vld [vmem:[#allocation2 + $0x338] sm:$0xff]  ;;  %v4195_v21 = vpack.c.bf16 %v283_v13, %v267_v12  ;;  %v4197_v23 = vpack.c.bf16 %v316_v15, %v300_v14  ;;  %v299_v24 = vld [vmem:[#allocation2 + $0x520] sm:$0xff] }
  0xb3   :  { %4178 = vmatprep.subr.bf16.mxu0 %v4177_v25  ;;  %v254_v22 = vld [vmem:[#allocation2 + $0x3b8] sm:$0xff]  ;;  %v315_v25 = vld [vmem:[#allocation2 + $0x5a0] sm:$0xff]  ;;  %v332_v26 = vld [vmem:[#allocation2 + $0x628] sm:$0xff]  ;;  %v4219_v28 = vpack.c.bf16 %v221_v19, %v205_v18 }
  0xb4   :  { %4176 = vmatpush1.bf16.msra.mxu1 %v4175_v55  ;;  %v348_v27 = vld [vmem:[#allocation2 + $0x6a8] sm:$0xff]  ;;  %v4221_v29 = vpack.c.bf16 %v254_v22, %v238_v20  ;;  %v237_v31 = vld [vmem:[#allocation2 + $0x330] sm:$0xff]  ;;  %v270_v33 = vld [vmem:[#allocation2 + $0x438] sm:$0xff]  ;;  %v4199_v34 = vpack.c.bf16 %v315_v25, %v299_v24 }
  0xb5   :  { %540 = vmatmul.mubr.f32.vlgmr.msra.gmra.mrb[0].mxu0 %v6156_v30  ;;  %4210 = vmatprep.subr.bf16.mxu1 %v4209_v56  ;;  %v253_v32 = vld [vmem:[#allocation2 + $0x3b0] sm:$0xff]  ;;  %v286_v35 = vld [vmem:[#allocation2 + $0x4b8] sm:$0xff]  ;;  %v331_v37 = vld [vmem:[#allocation2 + $0x620] sm:$0xff] }
  0xb6   :  { %4180 = vmatpush1.bf16.msra.mxu0 %v4179_v36  ;;  %681 = vmatprep.mubr.f32.mxu0 %v5993_v0  ;;  %v4201_v36 = vpack.c.bf16 %v348_v27, %v332_v26  ;;  %v364_v39 = vld [vmem:[#allocation2 + $0x728] sm:$0xff]  ;;  %v4223_v41 = vpack.c.bf16 %v253_v32, %v237_v31  ;;  %v4225_v42 = vpack.c.bf16 %v286_v35, %v270_v33  ;;  %v269_v43 = vld [vmem:[#allocation2 + $0x430] sm:$0xff]  ;;  %v302_v45 = vld [vmem:[#allocation2 + $0x538] sm:$0xff] }
  0xb7   :  { %4182 = vmatprep.subr.bf16.mxu0 %v4181_v38  ;;  %611 = vmatmul.mubr.f32.vlgmr.msra.gmra.mrb[0].mxu1 %v6156_v30  ;;  %v347_v38 = vld [vmem:[#allocation2 + $0x6a0] sm:$0xff]  ;;  %v380_v40 = vld [vmem:[#allocation2 + $0x7a8] sm:$0xff]  ;;  %v285_v44 = vld [vmem:[#allocation2 + $0x4b0] sm:$0xff] }
  0xb8   :  { %4212 = vmatpush1.bf16.msra.mxu1 %v4211_v4  ;;  %752 = vmatprep.mubr.f32.mxu1 %v5993_v0  ;;  %v4203_v46 = vpack.c.bf16 %v347_v38, %v331_v37  ;;  %v318_v47 = vld [vmem:[#allocation2 + $0x5b8] sm:$0xff]  ;;  %v363_v49 = vld [vmem:[#allocation2 + $0x720] sm:$0xff]  ;;  %v144_v51 = vld [vmem:[#allocation2 + $0x48] sm:$0xff]  ;;  %v4227_v53 = vpack.c.bf16 %v285_v44, %v269_v43 }
  0xb9   :  { %4214 = vmatprep.subr.bf16.mxu1 %v4213_v5  ;;  %v160_v52 = vld [vmem:[#allocation2 + $0xc8] sm:$0xff]  ;;  %v4229_v54 = vpack.c.bf16 %v318_v47, %v302_v45  ;;  %v301_v55 = vld [vmem:[#allocation2 + $0x530] sm:$0xff]  ;;  %v334_v57 = vld [vmem:[#allocation2 + $0x638] sm:$0xff] }
  0xba   :  { %4184 = vmatpush1.bf16.msra.mxu0 %v4183_v48  ;;  %v4205_v48 = vpack.c.bf16 %v380_v40, %v364_v39  ;;  %v317_v56 = vld [vmem:[#allocation2 + $0x5b0] sm:$0xff]  ;;  %v350_v59 = vld [vmem:[#allocation2 + $0x6b8] sm:$0xff]  ;;  %v143_v61 = vld [vmem:[#allocation2 + $0x40] sm:$0xff] }
  0xbb   :  { %4186 = vmatprep.subr.bf16.mxu0 %v4185_v50  ;;  %v379_v50 = vld [vmem:[#allocation2 + $0x7a0] sm:$0xff]  ;;  %v176_v63 = vld [vmem:[#allocation2 + $0x148] sm:$0xff]  ;;  %v4231_v2 = vpack.c.bf16 %v317_v56, %v301_v55  ;;  %v4233_v3 = vpack.c.bf16 %v350_v59, %v334_v57  ;;  %v333_v4 = vld [vmem:[#allocation2 + $0x630] sm:$0xff] }
  0xbc   :  { %4216 = vmatpush1.bf16.msra.mxu1 %v4215_v16  ;;  %v4207_v58 = vpack.c.bf16 %v379_v50, %v363_v49  ;;  %v192_v1 = vld [vmem:[#allocation2 + $0x1c8] sm:$0xff]  ;;  %v349_v5 = vld [vmem:[#allocation2 + $0x6b0] sm:$0xff]  ;;  %v366_v6 = vld [vmem:[#allocation2 + $0x738] sm:$0xff] }
  0xbd   :  { %4218 = vmatprep.subr.bf16.mxu1 %v4217_v17  ;;  %v382_v8 = vld [vmem:[#allocation2 + $0x7b8] sm:$0xff]  ;;  %v175_v10 = vld [vmem:[#allocation2 + $0x140] sm:$0xff]  ;;  %v208_v12 = vld [vmem:[#allocation2 + $0x248] sm:$0xff]  ;;  %v4235_v14 = vpack.c.bf16 %v349_v5, %v333_v4 }
  0xbe   :  { %4188 = vmatpush1.bf16.msra.mxu0 %v4187_v60  ;;  %v4241_v60 = vpack.c.bf16 %v160_v52, %v144_v51  ;;  %v224_v13 = vld [vmem:[#allocation2 + $0x2c8] sm:$0xff]  ;;  %v4237_v15 = vpack.c.bf16 %v382_v8, %v366_v6  ;;  %v365_v16 = vld [vmem:[#allocation2 + $0x730] sm:$0xff]  ;;  %v146_v18 = vld [vmem:[#allocation2 + $0x58] sm:$0xff] }
  0xbf   :  { %4190 = vmatprep.subr.bf16.mxu0 %v4189_v62  ;;  %v159_v62 = vld [vmem:[#allocation2 + $0xc0] sm:$0xff]  ;;  %v381_v17 = vld [vmem:[#allocation2 + $0x7b0] sm:$0xff]  ;;  %v162_v20 = vld [vmem:[#allocation2 + $0xd8] sm:$0xff] }
  0xc0   :  { %4220 = vmatpush1.bf16.msra.mxu1 %v4219_v28  ;;  %v4243_v7 = vpack.c.bf16 %v159_v62, %v143_v61  ;;  %v207_v22 = vld [vmem:[#allocation2 + $0x240] sm:$0xff]  ;;  %v240_v24 = vld [vmem:[#allocation2 + $0x348] sm:$0xff]  ;;  %v4239_v26 = vpack.c.bf16 %v381_v17, %v365_v16  ;;  %v4273_v27 = vpack.c.bf16 %v162_v20, %v146_v18  ;;  %v145_v28 = vld [vmem:[#allocation2 + $0x50] sm:$0xff] }
  0xc1   :  { %4222 = vmatprep.subr.bf16.mxu1 %v4221_v29  ;;  %v256_v25 = vld [vmem:[#allocation2 + $0x3c8] sm:$0xff]  ;;  %v161_v29 = vld [vmem:[#allocation2 + $0xd0] sm:$0xff]  ;;  %v178_v31 = vld [vmem:[#allocation2 + $0x158] sm:$0xff] }
  0xc2   :  { %4192 = vmatpush1.bf16.msra.mxu0 %v4191_v9  ;;  %v4245_v9 = vpack.c.bf16 %v192_v1, %v176_v63  ;;  %v194_v33 = vld [vmem:[#allocation2 + $0x1d8] sm:$0xff]  ;;  %v239_v35 = vld [vmem:[#allocation2 + $0x340] sm:$0xff]  ;;  %v272_v37 = vld [vmem:[#allocation2 + $0x448] sm:$0xff]  ;;  %v4275_v39 = vpack.c.bf16 %v161_v29, %v145_v28 }
  0xc3   :  { %4194 = vmatprep.subr.bf16.mxu0 %v4193_v11  ;;  %v191_v11 = vld [vmem:[#allocation2 + $0x1c0] sm:$0xff]  ;;  %v288_v38 = vld [vmem:[#allocation2 + $0x4c8] sm:$0xff]  ;;  %v4277_v40 = vpack.c.bf16 %v194_v33, %v178_v31  ;;  %v210_v43 = vld [vmem:[#allocation2 + $0x258] sm:$0xff] }
  0xc4   :  { %4224 = vmatpush1.bf16.msra.mxu1 %v4223_v41  ;;  %v4247_v19 = vpack.c.bf16 %v191_v11, %v175_v10  ;;  %v177_v41 = vld [vmem:[#allocation2 + $0x150] sm:$0xff]  ;;  %v226_v45 = vld [vmem:[#allocation2 + $0x2d8] sm:$0xff]  ;;  %v271_v47 = vld [vmem:[#allocation2 + $0x440] sm:$0xff] }
  0xc5   :  { %4226 = vmatprep.subr.bf16.mxu1 %v4225_v42  ;;  %v193_v42 = vld [vmem:[#allocation2 + $0x1d0] sm:$0xff]  ;;  %v304_v49 = vld [vmem:[#allocation2 + $0x548] sm:$0xff]  ;;  %v4281_v52 = vpack.c.bf16 %v226_v45, %v210_v43  ;;  %v242_v55 = vld [vmem:[#allocation2 + $0x358] sm:$0xff] }
  0xc6   :  { %4196 = vmatpush1.bf16.msra.mxu0 %v4195_v21  ;;  %v4249_v21 = vpack.c.bf16 %v224_v13, %v208_v12  ;;  %v320_v50 = vld [vmem:[#allocation2 + $0x5c8] sm:$0xff]  ;;  %v4279_v51 = vpack.c.bf16 %v193_v42, %v177_v41  ;;  %v258_v57 = vld [vmem:[#allocation2 + $0x3d8] sm:$0xff]  ;;  %v303_v59 = vld [vmem:[#allocation2 + $0x540] sm:$0xff] }
  0xc7   :  { %4198 = vmatprep.subr.bf16.mxu0 %v4197_v23  ;;  %v223_v23 = vld [vmem:[#allocation2 + $0x2c0] sm:$0xff]  ;;  %v336_v61 = vld [vmem:[#allocation2 + $0x648] sm:$0xff]  ;;  %v4285_v1 = vpack.c.bf16 %v258_v57, %v242_v55  ;;  %v274_v4 = vld [vmem:[#allocation2 + $0x458] sm:$0xff] }
  0xc8   :  { %4228 = vmatpush1.bf16.msra.mxu1 %v4227_v53  ;;  %v4251_v32 = vpack.c.bf16 %v223_v23, %v207_v22  ;;  %v209_v53 = vld [vmem:[#allocation2 + $0x250] sm:$0xff]  ;;  %v352_v62 = vld [vmem:[#allocation2 + $0x6c8] sm:$0xff]  ;;  %v290_v6 = vld [vmem:[#allocation2 + $0x4d8] sm:$0xff] }
  0xc9   :  { %4230 = vmatprep.subr.bf16.mxu1 %v4229_v54  ;;  %v225_v54 = vld [vmem:[#allocation2 + $0x2d0] sm:$0xff]  ;;  %v335_v8 = vld [vmem:[#allocation2 + $0x640] sm:$0xff]  ;;  %v368_v10 = vld [vmem:[#allocation2 + $0x748] sm:$0xff]  ;;  %v4289_v13 = vpack.c.bf16 %v290_v6, %v274_v4 }
  0xca   :  { %4200 = vmatpush1.bf16.msra.mxu0 %v4199_v34  ;;  %v4253_v34 = vpack.c.bf16 %v256_v25, %v240_v24  ;;  %v4283_v63 = vpack.c.bf16 %v225_v54, %v209_v53  ;;  %v384_v11 = vld [vmem:[#allocation2 + $0x7c8] sm:$0xff]  ;;  %v306_v16 = vld [vmem:[#allocation2 + $0x558] sm:$0xff]  ;;  %v367_v20 = vld [vmem:[#allocation2 + $0x740] sm:$0xff] }
  0xcb   :  { %4202 = vmatprep.subr.bf16.mxu0 %v4201_v36  ;;  %v255_v36 = vld [vmem:[#allocation2 + $0x3c0] sm:$0xff]  ;;  %v322_v18 = vld [vmem:[#allocation2 + $0x5d8] sm:$0xff]  ;;  %v148_v22 = vld [vmem:[#allocation2 + $0x68] sm:$0xff] }
  0xcc   :  { %4232 = vmatpush1.bf16.msra.mxu1 %v4231_v2  ;;  %v4255_v44 = vpack.c.bf16 %v255_v36, %v239_v35  ;;  %v241_v2 = vld [vmem:[#allocation2 + $0x350] sm:$0xff]  ;;  %v164_v23 = vld [vmem:[#allocation2 + $0xe8] sm:$0xff]  ;;  %v4293_v25 = vpack.c.bf16 %v322_v18, %v306_v16  ;;  %v338_v28 = vld [vmem:[#allocation2 + $0x658] sm:$0xff] }
  0xcd   :  { %4234 = vmatprep.subr.bf16.mxu1 %v4233_v3  ;;  %v257_v3 = vld [vmem:[#allocation2 + $0x3d0] sm:$0xff]  ;;  %v354_v31 = vld [vmem:[#allocation2 + $0x6d8] sm:$0xff]  ;;  %v147_v33 = vld [vmem:[#allocation2 + $0x60] sm:$0xff] }
  0xce   :  { %4204 = vmatpush1.bf16.msra.mxu0 %v4203_v46  ;;  %v4257_v46 = vpack.c.bf16 %v288_v38, %v272_v37  ;;  %v4287_v12 = vpack.c.bf16 %v257_v3, %v241_v2  ;;  %v180_v35 = vld [vmem:[#allocation2 + $0x168] sm:$0xff]  ;;  %v4297_v38 = vpack.c.bf16 %v354_v31, %v338_v28  ;;  %v370_v41 = vld [vmem:[#allocation2 + $0x758] sm:$0xff]  ;;  %v179_v45 = vld [vmem:[#allocation2 + $0x160] sm:$0xff] }
  0xcf   :  { %4206 = vmatprep.subr.bf16.mxu0 %v4205_v48  ;;  %v287_v48 = vld [vmem:[#allocation2 + $0x4c0] sm:$0xff]  ;;  %v196_v36 = vld [vmem:[#allocation2 + $0x1e8] sm:$0xff]  ;;  %v386_v43 = vld [vmem:[#allocation2 + $0x7d8] sm:$0xff] }
  0xd0   :  { %4236 = vmatpush1.bf16.msra.mxu1 %v4235_v14  ;;  %v4259_v56 = vpack.c.bf16 %v287_v48, %v271_v47  ;;  %v273_v14 = vld [vmem:[#allocation2 + $0x450] sm:$0xff]  ;;  %v212_v47 = vld [vmem:[#allocation2 + $0x268] sm:$0xff]  ;;  %v150_v53 = vld [vmem:[#allocation2 + $0x78] sm:$0xff] }
  0xd1   :  { %4238 = vmatprep.subr.bf16.mxu1 %v4237_v15  ;;  %v289_v15 = vld [vmem:[#allocation2 + $0x4d0] sm:$0xff]  ;;  %v228_v48 = vld [vmem:[#allocation2 + $0x2e8] sm:$0xff]  ;;  %v166_v55 = vld [vmem:[#allocation2 + $0xf8] sm:$0xff] }
  0xd2   :  { %4208 = vmatpush1.bf16.msra.mxu0 %v4207_v58  ;;  %v4261_v58 = vpack.c.bf16 %v320_v50, %v304_v49  ;;  %v4291_v24 = vpack.c.bf16 %v289_v15, %v273_v14  ;;  %v4301_v50 = vpack.c.bf16 %v386_v43, %v370_v41  ;;  %v211_v57 = vld [vmem:[#allocation2 + $0x260] sm:$0xff]  ;;  %v182_v2 = vld [vmem:[#allocation2 + $0x178] sm:$0xff] }
  0xd3   :  { %4242 = vmatprep.subr.bf16.mxu0 %v4241_v60  ;;  %v319_v60 = vld [vmem:[#allocation2 + $0x5c0] sm:$0xff]  ;;  %v198_v4 = vld [vmem:[#allocation2 + $0x1f8] sm:$0xff] }
  0xd4   :  { %4240 = vmatpush1.bf16.msra.mxu1 %v4239_v26  ;;  %v4263_v5 = vpack.c.bf16 %v319_v60, %v303_v59  ;;  %v305_v26 = vld [vmem:[#allocation2 + $0x550] sm:$0xff]  ;;  %v244_v59 = vld [vmem:[#allocation2 + $0x368] sm:$0xff]  ;;  %v243_v6 = vld [vmem:[#allocation2 + $0x360] sm:$0xff] }
  0xd5   :  { %682 = vmatmul.mubr.f32.vlgmr.msra.gmra.mrb[2].mxu0 %v6156_v30  ;;  %4274 = vmatprep.subr.bf16.mxu1 %v4273_v27  ;;  %v321_v27 = vld [vmem:[#allocation2 + $0x5d0] sm:$0xff]  ;;  %v260_v60 = vld [vmem:[#allocation2 + $0x3e8] sm:$0xff]  ;;  %v214_v14 = vld [vmem:[#allocation2 + $0x278] sm:$0xff] }
  0xd6   :  { %4244 = vmatpush1.bf16.msra.mxu0 %v4243_v7  ;;  %823 = vmatprep.mubr.f32.mxu0 %v5993_v0  ;;  %v4265_v7 = vpack.c.bf16 %v352_v62, %v336_v61  ;;  %v4295_v37 = vpack.c.bf16 %v321_v27, %v305_v26  ;;  %v4337_v62 = vpack.c.bf16 %v166_v55, %v150_v53  ;;  %v230_v16 = vld [vmem:[#allocation2 + $0x2f8] sm:$0xff]  ;;  %v275_v18 = vld [vmem:[#allocation2 + $0x460] sm:$0xff] }
  0xd7   :  { %4246 = vmatprep.subr.bf16.mxu0 %v4245_v9  ;;  %753 = vmatmul.mubr.f32.vlgmr.msra.gmra.mrb[2].mxu1 %v6156_v30  ;;  %v351_v9 = vld [vmem:[#allocation2 + $0x6c0] sm:$0xff]  ;;  %v246_v26 = vld [vmem:[#allocation2 + $0x378] sm:$0xff] }
  0xd8   :  { %4276 = vmatpush1.bf16.msra.mxu1 %v4275_v39  ;;  %894 = vmatprep.mubr.f32.mxu1 %v5993_v0  ;;  %v4267_v17 = vpack.c.bf16 %v351_v9, %v335_v8  ;;  %v337_v39 = vld [vmem:[#allocation2 + $0x650] sm:$0xff]  ;;  %v276_v8 = vld [vmem:[#allocation2 + $0x468] sm:$0xff]  ;;  %v262_v28 = vld [vmem:[#allocation2 + $0x3f8] sm:$0xff] }
  0xd9   :  { %4278 = vmatprep.subr.bf16.mxu1 %v4277_v40  ;;  %v353_v40 = vld [vmem:[#allocation2 + $0x6d0] sm:$0xff]  ;;  %v292_v9 = vld [vmem:[#allocation2 + $0x4e8] sm:$0xff]  ;;  %v307_v31 = vld [vmem:[#allocation2 + $0x560] sm:$0xff] }
  0xda   :  { %4248 = vmatpush1.bf16.msra.mxu0 %v4247_v19  ;;  %v4269_v19 = vpack.c.bf16 %v384_v11, %v368_v10  ;;  %v4299_v49 = vpack.c.bf16 %v353_v40, %v337_v39  ;;  %v4341_v11 = vpack.c.bf16 %v198_v4, %v182_v2  ;;  %v294_v40 = vld [vmem:[#allocation2 + $0x4f8] sm:$0xff]  ;;  %v355_v43 = vld [vmem:[#allocation2 + $0x6e0] sm:$0xff]  ;;  %v1063_v4 = vld [vmem:[#allocation7 + $0x20] sm:$0xff] }
  0xdb   :  { %4250 = vmatprep.subr.bf16.mxu0 %v4249_v21  ;;  %v383_v21 = vld [vmem:[#allocation2 + $0x7c0] sm:$0xff] }
  0xdc   :  { %4280 = vmatpush1.bf16.msra.mxu1 %v4279_v51  ;;  %v4271_v29 = vpack.c.bf16 %v383_v21, %v367_v20  ;;  %v369_v51 = vld [vmem:[#allocation2 + $0x750] sm:$0xff]  ;;  %v308_v20 = vld [vmem:[#allocation2 + $0x568] sm:$0xff]  ;;  %v387_v55 = vld [vmem:[#allocation2 + $0x7e0] sm:$0xff] }
  0xdd   :  { %4282 = vmatprep.subr.bf16.mxu1 %v4281_v52  ;;  %v385_v52 = vld [vmem:[#allocation2 + $0x7d0] sm:$0xff]  ;;  %v324_v21 = vld [vmem:[#allocation2 + $0x5e8] sm:$0xff] }
  0xde   :  { %4252 = vmatpush1.bf16.msra.mxu0 %v4251_v32  ;;  %v4305_v32 = vpack.c.bf16 %v164_v23, %v148_v22  ;;  %v4303_v61 = vpack.c.bf16 %v385_v52, %v369_v51  ;;  %v4345_v23 = vpack.c.bf16 %v230_v16, %v214_v14  ;;  %v326_v52 = vld [vmem:[#allocation2 + $0x5f8] sm:$0xff]  ;;  %v1071_v16 = vld [vmem:[#allocation7 + $0x60] sm:$0xff] }
  0xdf   :  { %4254 = vmatprep.subr.bf16.mxu0 %v4253_v34  ;;  %v163_v34 = vld [vmem:[#allocation2 + $0xe0] sm:$0xff] }
  0xe0   :  { %4284 = vmatpush1.bf16.msra.mxu1 %v4283_v63  ;;  %v4307_v42 = vpack.c.bf16 %v163_v34, %v147_v33  ;;  %v149_v63 = vld [vmem:[#allocation2 + $0x70] sm:$0xff]  ;;  %v340_v33 = vld [vmem:[#allocation2 + $0x668] sm:$0xff] }
  0xe1   :  { %4286 = vmatprep.subr.bf16.mxu1 %v4285_v1  ;;  %v165_v1 = vld [vmem:[#allocation2 + $0xf0] sm:$0xff]  ;;  %v356_v34 = vld [vmem:[#allocation2 + $0x6e8] sm:$0xff] }
  0xe2   :  { %4256 = vmatpush1.bf16.msra.mxu0 %v4255_v44  ;;  %v4309_v44 = vpack.c.bf16 %v196_v36, %v180_v35  ;;  %v4339_v10 = vpack.c.bf16 %v165_v1, %v149_v63  ;;  %v4349_v36 = vpack.c.bf16 %v262_v28, %v246_v26  ;;  %v4329_v41 = vpack.c.bf16 %v356_v34, %v340_v33  ;;  %v358_v1 = vld [vmem:[#allocation2 + $0x6f8] sm:$0xff]  ;;  %v1079_v28 = vld [vmem:[#allocation7 + $0xa0] sm:$0xff]  ;;  %v1061_v34 = vld [vmem:[#allocation7 + $0x10] sm:$0xff] }
  0xe3   :  { %4258 = vmatprep.subr.bf16.mxu0 %v4257_v46  ;;  %v195_v46 = vld [vmem:[#allocation2 + $0x1e0] sm:$0xff] }
  0xe4   :  { %4288 = vmatpush1.bf16.msra.mxu1 %v4287_v12  ;;  %v4311_v54 = vpack.c.bf16 %v195_v46, %v179_v45  ;;  %v181_v12 = vld [vmem:[#allocation2 + $0x170] sm:$0xff]  ;;  %v388_v45 = vld [vmem:[#allocation2 + $0x7e8] sm:$0xff] }
  0xe5   :  { %4290 = vmatprep.subr.bf16.mxu1 %v4289_v13  ;;  %v197_v13 = vld [vmem:[#allocation2 + $0x1f0] sm:$0xff] }
  0xe6   :  { %4260 = vmatpush1.bf16.msra.mxu0 %v4259_v56  ;;  %v4313_v56 = vpack.c.bf16 %v228_v48, %v212_v47  ;;  %v4343_v22 = vpack.c.bf16 %v197_v13, %v181_v12  ;;  %v277_v48 = vld [vmem:[#allocation2 + $0x470] sm:$0xff]  ;;  %v390_v13 = vld [vmem:[#allocation2 + $0x7f8] sm:$0xff] }
  0xe7   :  { %4262 = vmatprep.subr.bf16.mxu0 %v4261_v58  ;;  %v227_v58 = vld [vmem:[#allocation2 + $0x2e0] sm:$0xff] }
  0xe8   :  { %4292 = vmatpush1.bf16.msra.mxu1 %v4291_v24  ;;  %v4315_v3 = vpack.c.bf16 %v227_v58, %v211_v57  ;;  %v213_v24 = vld [vmem:[#allocation2 + $0x270] sm:$0xff]  ;;  %v1064_v57 = vld [vmem:[#allocation7 + $0x28] sm:$0xff] }
  0xe9   :  { %4294 = vmatprep.subr.bf16.mxu1 %v4293_v25  ;;  %v229_v25 = vld [vmem:[#allocation2 + $0x2f0] sm:$0xff] }
  0xea   :  { %4264 = vmatpush1.bf16.msra.mxu0 %v4263_v5  ;;  %v4317_v5 = vpack.c.bf16 %v260_v60, %v244_v59  ;;  %v4347_v35 = vpack.c.bf16 %v229_v25, %v213_v24  ;;  %v309_v60 = vld [vmem:[#allocation2 + $0x570] sm:$0xff]  ;;  %v1066_v25 = vld [vmem:[#allocation7 + $0x38] sm:$0xff] }
  0xeb   :  { %4266 = vmatprep.subr.bf16.mxu0 %v4265_v7  ;;  %v259_v7 = vld [vmem:[#allocation2 + $0x3e0] sm:$0xff] }
  0xec   :  { %4296 = vmatpush1.bf16.msra.mxu1 %v4295_v37  ;;  %v4319_v15 = vpack.c.bf16 %v259_v7, %v243_v6  ;;  %v245_v37 = vld [vmem:[#allocation2 + $0x370] sm:$0xff]  ;;  %v1072_v6 = vld [vmem:[#allocation7 + $0x68] sm:$0xff] }
  0xed   :  { %4298 = vmatprep.subr.bf16.mxu1 %v4297_v38  ;;  %v278_v38 = vld [vmem:[#allocation2 + $0x478] sm:$0xff] }
  0xee   :  { %4268 = vmatpush1.bf16.msra.mxu0 %v4267_v17  ;;  %v4321_v17 = vpack.c.bf16 %v292_v9, %v276_v8  ;;  %v4353_v47 = vpack.c.bf16 %v294_v40, %v278_v38  ;;  %v341_v9 = vld [vmem:[#allocation2 + $0x670] sm:$0xff] }
  0xef   :  { %4270 = vmatprep.subr.bf16.mxu0 %v4269_v19  ;;  %v291_v19 = vld [vmem:[#allocation2 + $0x4e0] sm:$0xff]  ;;  %v1087_v40 = vld [vmem:[#allocation7 + $0xe0] sm:$0xff] }
  0xf0   :  { %4300 = vmatpush1.bf16.msra.mxu1 %v4299_v49  ;;  %v4323_v27 = vpack.c.bf16 %v291_v19, %v275_v18  ;;  %v293_v49 = vld [vmem:[#allocation2 + $0x4f0] sm:$0xff]  ;;  %v1080_v18 = vld [vmem:[#allocation7 + $0xa8] sm:$0xff] }
  0xf1   :  { %4302 = vmatprep.subr.bf16.mxu1 %v4301_v50  ;;  %v310_v50 = vld [vmem:[#allocation2 + $0x578] sm:$0xff]  ;;  %v4355_v58 = vpack.c.bf16 %v293_v49, %v277_v48  ;;  %v1082_v49 = vld [vmem:[#allocation7 + $0xb8] sm:$0xff] }
  0xf2   :  { %4272 = vmatpush1.bf16.msra.mxu0 %v4271_v29  ;;  %v4325_v29 = vpack.c.bf16 %v324_v21, %v308_v20  ;;  %v4357_v59 = vpack.c.bf16 %v326_v52, %v310_v50  ;;  %v373_v21 = vld [vmem:[#allocation2 + $0x770] sm:$0xff] }
  0xf3   :  { %4306 = vmatprep.subr.bf16.mxu0 %v4305_v32  ;;  %v323_v32 = vld [vmem:[#allocation2 + $0x5e0] sm:$0xff]  ;;  %v1095_v52 = vld [vmem:[#allocation7 + $0x120] sm:$0xff] }
  0xf4   :  { %4304 = vmatpush1.bf16.msra.mxu1 %v4303_v61  ;;  %v4327_v39 = vpack.c.bf16 %v323_v32, %v307_v31  ;;  %v325_v61 = vld [vmem:[#allocation2 + $0x5f0] sm:$0xff]  ;;  %v1088_v31 = vld [vmem:[#allocation7 + $0xe8] sm:$0xff] }
  0xf5   :  { %824 = vmatmul.mubr.f32.vlgmr.msra.gmra.mrb[4].mxu0 %v6156_v30  ;;  %4338 = vmatprep.subr.bf16.mxu1 %v4337_v62  ;;  %v342_v62 = vld [vmem:[#allocation2 + $0x678] sm:$0xff]  ;;  %v4359_v7 = vpack.c.bf16 %v325_v61, %v309_v60  ;;  %v1090_v61 = vld [vmem:[#allocation7 + $0xf8] sm:$0xff] }
  0xf6   :  { %4308 = vmatpush1.bf16.msra.mxu0 %v4307_v42  ;;  %965 = vmatprep.mubr.f32.mxu0 %v5993_v0  ;;  %v339_v42 = vld [vmem:[#allocation2 + $0x660] sm:$0xff]  ;;  %v4361_v8 = vpack.c.bf16 %v358_v1, %v342_v62  ;;  %v1103_v1 = vld [vmem:[#allocation7 + $0x160] sm:$0xff] }
  0xf7   :  { %4310 = vmatprep.subr.bf16.mxu0 %v4309_v44  ;;  %895 = vmatmul.mubr.f32.vlgmr.msra.gmra.mrb[4].mxu1 %v6156_v30  ;;  %v372_v44 = vld [vmem:[#allocation2 + $0x768] sm:$0xff]  ;;  %v4331_v51 = vpack.c.bf16 %v355_v43, %v339_v42  ;;  %v1096_v42 = vld [vmem:[#allocation7 + $0x128] sm:$0xff] }
  0xf8   :  { %4340 = vmatpush1.bf16.msra.mxu1 %v4339_v10  ;;  %1036 = vmatprep.mubr.f32.mxu1 %v5993_v0  ;;  %v261_v0 = vld [vmem:[#allocation2 + $0x3f0] sm:$0xff]  ;;  %v4333_v53 = vpack.c.bf16 %v388_v45, %v372_v44  ;;  %v1069_v45 = vld [vmem:[#allocation7 + $0x50] sm:$0xff] }
  0xf9   :  { %4342 = vmatprep.subr.bf16.mxu1 %v4341_v11  ;;  %v4351_v46 = vpack.c.bf16 %v261_v0, %v245_v37  ;;  %v357_v10 = vld [vmem:[#allocation2 + $0x6f0] sm:$0xff]  ;;  %v374_v11 = vld [vmem:[#allocation2 + $0x778] sm:$0xff]  ;;  %v1074_v0 = vld [vmem:[#allocation7 + $0x78] sm:$0xff] }
  0xfa   :  { %4312 = vmatpush1.bf16.msra.mxu0 %v4311_v54  ;;  %v371_v54 = vld [vmem:[#allocation2 + $0x760] sm:$0xff]  ;;  %v4363_v19 = vpack.c.bf16 %v357_v10, %v341_v9  ;;  %v4365_v20 = vpack.c.bf16 %v390_v13, %v374_v11  ;;  %v1098_v9 = vld [vmem:[#allocation7 + $0x138] sm:$0xff]  ;;  %v1107_v11 = vld [vmem:[#allocation7 + $0x180] sm:$0xff] }
  0xfb   :  { %4314 = vmatprep.subr.bf16.mxu0 %v4313_v56  ;;  %v1060_v56 = vld [vmem:[#allocation7 + $0x8] sm:$0xff]  ;;  %v4335_v63 = vpack.c.bf16 %v387_v55, %v371_v54 }
  0xfc   :  { %4344 = vmatpush1.bf16.msra.mxu1 %v4343_v22  ;;  %v4369_v2 = vpack.c.bf16 %v1064_v57, %v1060_v56  ;;  %v389_v22 = vld [vmem:[#allocation2 + $0x7f0] sm:$0xff]  ;;  %v1104_v54 = vld [vmem:[#allocation7 + $0x168] sm:$0xff]  ;;  %v1077_v57 = vld [vmem:[#allocation7 + $0x90] sm:$0xff] }
  0xfd   :  { %4346 = vmatprep.subr.bf16.mxu1 %v4345_v23  ;;  %v1062_v23 = vld [vmem:[#allocation7 + $0x18] sm:$0xff]  ;;  %v4367_v32 = vpack.c.bf16 %v389_v22, %v373_v21  ;;  %v1116_v13 = vld [vmem:[#allocation7 + $0x1c8] sm:$0xff] }
  0xfe   :  { %4316 = vmatpush1.bf16.msra.mxu0 %v4315_v3  ;;  %v1059_v3 = vld [vmem:[#allocation7] sm:$0xff]  ;;  %v4881_v33 = vpack.c.bf16 %v1066_v25, %v1062_v23  ;;  %v1106_v21 = vld [vmem:[#allocation7 + $0x178] sm:$0xff]  ;;  %v1124_v25 = vld [vmem:[#allocation7 + $0x208] sm:$0xff] }
  0xff   :  { %4318 = vmatprep.subr.bf16.mxu0 %v4317_v5  ;;  %v1068_v5 = vld [vmem:[#allocation7 + $0x48] sm:$0xff]  ;;  %v4371_v12 = vpack.c.bf16 %v1063_v4, %v1059_v3  ;;  %v1115_v23 = vld [vmem:[#allocation7 + $0x1c0] sm:$0xff] }
 0x100   :  { %4348 = vmatpush1.bf16.msra.mxu1 %v4347_v35  ;;  %v4373_v14 = vpack.c.bf16 %v1072_v6, %v1068_v5  ;;  %v1065_v35 = vld [vmem:[#allocation7 + $0x30] sm:$0xff]  ;;  %v1112_v3 = vld [vmem:[#allocation7 + $0x1a8] sm:$0xff] }
 0x101   :  { %4350 = vmatprep.subr.bf16.mxu1 %v4349_v36  ;;  %v1070_v36 = vld [vmem:[#allocation7 + $0x58] sm:$0xff]  ;;  %v4883_v43 = vpack.c.bf16 %v1065_v35, %v1061_v34  ;;  %v1085_v5 = vld [vmem:[#allocation7 + $0xd0] sm:$0xff] }
 0x102   :  { %4320 = vmatpush1.bf16.msra.mxu0 %v4319_v15  ;;  %v1067_v15 = vld [vmem:[#allocation7 + $0x40] sm:$0xff]  ;;  %v4885_v44 = vpack.c.bf16 %v1074_v0, %v1070_v36  ;;  %v1089_v6 = vld [vmem:[#allocation7 + $0xf0] sm:$0xff]  ;;  %v1114_v34 = vld [vmem:[#allocation7 + $0x1b8] sm:$0xff] }
 0x103   :  { %4322 = vmatprep.subr.bf16.mxu0 %v4321_v17  ;;  %v1076_v17 = vld [vmem:[#allocation7 + $0x88] sm:$0xff]  ;;  %v4375_v24 = vpack.c.bf16 %v1071_v16, %v1067_v15  ;;  %v4895_v15 = vpack.c.bf16 %v1089_v6, %v1085_v5  ;;  %v1123_v36 = vld [vmem:[#allocation7 + $0x200] sm:$0xff]  ;;  %v1138_v5 = vld [vmem:[#allocation7 + $0x278] sm:$0xff] }
 0x104   :  { %4352 = vmatpush1.bf16.msra.mxu1 %v4351_v46  ;;  %v4377_v26 = vpack.c.bf16 %v1080_v18, %v1076_v17  ;;  %v1073_v46 = vld [vmem:[#allocation7 + $0x70] sm:$0xff]  ;;  %v1132_v0 = vld [vmem:[#allocation7 + $0x248] sm:$0xff] }
 0x105   :  { %4354 = vmatprep.subr.bf16.mxu1 %v4353_v47  ;;  %v1078_v47 = vld [vmem:[#allocation7 + $0x98] sm:$0xff]  ;;  %v4887_v55 = vpack.c.bf16 %v1073_v46, %v1069_v45  ;;  %v1093_v17 = vld [vmem:[#allocation7 + $0x110] sm:$0xff] }
 0x106   :  { %4324 = vmatpush1.bf16.msra.mxu0 %v4323_v27  ;;  %v1075_v27 = vld [vmem:[#allocation7 + $0x80] sm:$0xff]  ;;  %v4889_v56 = vpack.c.bf16 %v1082_v49, %v1078_v47  ;;  %v1097_v18 = vld [vmem:[#allocation7 + $0x130] sm:$0xff]  ;;  %v1122_v45 = vld [vmem:[#allocation7 + $0x1f8] sm:$0xff] }
 0x107   :  { %4326 = vmatprep.subr.bf16.mxu0 %v4325_v29  ;;  %v1084_v29 = vld [vmem:[#allocation7 + $0xc8] sm:$0xff]  ;;  %v4379_v37 = vpack.c.bf16 %v1079_v28, %v1075_v27  ;;  %v4899_v27 = vpack.c.bf16 %v1097_v18, %v1093_v17  ;;  %v1131_v47 = vld [vmem:[#allocation7 + $0x240] sm:$0xff]  ;;  %v1146_v17 = vld [vmem:[#allocation7 + $0x2b8] sm:$0xff] }
 0x108   :  { %4356 = vmatpush1.bf16.msra.mxu1 %v4355_v58  ;;  %v4381_v38 = vpack.c.bf16 %v1088_v31, %v1084_v29  ;;  %v1081_v58 = vld [vmem:[#allocation7 + $0xb0] sm:$0xff]  ;;  %v1140_v49 = vld [vmem:[#allocation7 + $0x288] sm:$0xff] }
 0x109   :  { %4358 = vmatprep.subr.bf16.mxu1 %v4357_v59  ;;  %v1086_v59 = vld [vmem:[#allocation7 + $0xd8] sm:$0xff]  ;;  %v1101_v29 = vld [vmem:[#allocation7 + $0x150] sm:$0xff] }
 0x10a   :  { %4328 = vmatpush1.bf16.msra.mxu0 %v4327_v39  ;;  %v1083_v39 = vld [vmem:[#allocation7 + $0xc0] sm:$0xff]  ;;  %v4893_v4 = vpack.c.bf16 %v1090_v61, %v1086_v59  ;;  %v1105_v31 = vld [vmem:[#allocation7 + $0x170] sm:$0xff]  ;;  %v1148_v61 = vld [vmem:[#allocation7 + $0x2c8] sm:$0xff] }
 0x10b   :  { %4330 = vmatprep.subr.bf16.mxu0 %v4329_v41  ;;  %v1092_v41 = vld [vmem:[#allocation7 + $0x108] sm:$0xff]  ;;  %v4383_v48 = vpack.c.bf16 %v1087_v40, %v1083_v39  ;;  %v4903_v39 = vpack.c.bf16 %v1105_v31, %v1101_v29  ;;  %v1139_v59 = vld [vmem:[#allocation7 + $0x280] sm:$0xff]  ;;  %v1154_v29 = vld [vmem:[#allocation7 + $0x2f8] sm:$0xff] }
 0x10c   :  { %4360 = vmatpush1.bf16.msra.mxu1 %v4359_v7  ;;  %v4385_v50 = vpack.c.bf16 %v1096_v42, %v1092_v41  ;;  %v1094_v7 = vld [vmem:[#allocation7 + $0x118] sm:$0xff]  ;;  %v1109_v41 = vld [vmem:[#allocation7 + $0x190] sm:$0xff] }
 0x10d   :  { %4362 = vmatprep.subr.bf16.mxu1 %v4361_v8  ;;  %v4897_v16 = vpack.c.bf16 %v1098_v9, %v1094_v7  ;;  %v1113_v42 = vld [vmem:[#allocation7 + $0x1b0] sm:$0xff]  ;;  %v1147_v7 = vld [vmem:[#allocation7 + $0x2c0] sm:$0xff]  ;;  %v1156_v9 = vld [vmem:[#allocation7 + $0x308] sm:$0xff] }
 0x10e   :  { %4332 = vmatpush1.bf16.msra.mxu0 %v4331_v51  ;;  %v1091_v51 = vld [vmem:[#allocation7 + $0x100] sm:$0xff] }
 0x10f   :  { %4334 = vmatprep.subr.bf16.mxu0 %v4333_v53  ;;  %v1100_v53 = vld [vmem:[#allocation7 + $0x148] sm:$0xff]  ;;  %v4387_v60 = vpack.c.bf16 %v1095_v52, %v1091_v51  ;;  %v4907_v51 = vpack.c.bf16 %v1113_v42, %v1109_v41  ;;  %v1162_v41 = vld [vmem:[#allocation7 + $0x338] sm:$0xff] }
 0x110   :  { %4364 = vmatpush1.bf16.msra.mxu1 %v4363_v19  ;;  %v4389_v62 = vpack.c.bf16 %v1104_v54, %v1100_v53  ;;  %v1102_v19 = vld [vmem:[#allocation7 + $0x158] sm:$0xff]  ;;  %v1117_v53 = vld [vmem:[#allocation7 + $0x1d0] sm:$0xff] }
 0x111   :  { %4366 = vmatprep.subr.bf16.mxu1 %v4365_v20  ;;  %v4901_v28 = vpack.c.bf16 %v1106_v21, %v1102_v19  ;;  %v1121_v54 = vld [vmem:[#allocation7 + $0x1f0] sm:$0xff]  ;;  %v1155_v19 = vld [vmem:[#allocation7 + $0x300] sm:$0xff]  ;;  %v1164_v21 = vld [vmem:[#allocation7 + $0x348] sm:$0xff] }
 0x112   :  { %4336 = vmatpush1.bf16.msra.mxu0 %v4335_v63  ;;  %v1099_v63 = vld [vmem:[#allocation7 + $0x140] sm:$0xff] }
 0x113   :  { %4370 = vmatprep.subr.bf16.mxu0 %v4369_v2  ;;  %v1108_v2 = vld [vmem:[#allocation7 + $0x188] sm:$0xff]  ;;  %v4391_v8 = vpack.c.bf16 %v1103_v1, %v1099_v63  ;;  %v4911_v63 = vpack.c.bf16 %v1121_v54, %v1117_v53  ;;  %v1170_v53 = vld [vmem:[#allocation7 + $0x378] sm:$0xff] }
 0x114   :  { %4368 = vmatpush1.bf16.msra.mxu1 %v4367_v32  ;;  %v4393_v10 = vpack.c.bf16 %v1112_v3, %v1108_v2  ;;  %v1110_v32 = vld [vmem:[#allocation7 + $0x198] sm:$0xff]  ;;  %v1125_v2 = vld [vmem:[#allocation7 + $0x210] sm:$0xff] }
 0x115   :  { %966 = vmatmul.mubr.f32.vlgmr.msra.gmra.mrb[6].mxu0 %v6156_v30  ;;  %4882 = vmatprep.subr.bf16.mxu1 %v4881_v33  ;;  %v4905_v40 = vpack.c.bf16 %v1114_v34, %v1110_v32  ;;  %v1129_v3 = vld [vmem:[#allocation7 + $0x230] sm:$0xff]  ;;  %v1163_v32 = vld [vmem:[#allocation7 + $0x340] sm:$0xff]  ;;  %v1172_v34 = vld [vmem:[#allocation7 + $0x388] sm:$0xff] }
 0x116   :  { %4372 = vmatpush1.bf16.msra.mxu0 %v4371_v12  ;;  %v1111_v12 = vld [vmem:[#allocation7 + $0x1a0] sm:$0xff] }
 0x117   :  { %4374 = vmatprep.subr.bf16.mxu0 %v4373_v14  ;;  %1037 = vmatmul.mubr.f32.vlgmr.msra.gmra.mrb[6].mxu1 %v6156_v30  ;;  %v4891_v30 = vpack.c.bf16 %v1081_v58, %v1077_v57  ;;  %v1120_v14 = vld [vmem:[#allocation7 + $0x1e8] sm:$0xff]  ;;  %v4395_v20 = vpack.c.bf16 %v1111_v12, %v1107_v11  ;;  %v1130_v57 = vld [vmem:[#allocation7 + $0x238] sm:$0xff]  ;;  %v4915_v11 = vpack.c.bf16 %v1129_v3, %v1125_v2 }
 0x118   :  { %4884 = vmatpush1.bf16.msra.mxu1 %v4883_v43  ;;  %v4397_v22 = vpack.c.bf16 %v1120_v14, %v1116_v13  ;;  %v1118_v43 = vld [vmem:[#allocation7 + $0x1d8] sm:$0xff]  ;;  %v1133_v13 = vld [vmem:[#allocation7 + $0x250] sm:$0xff] }
 0x119   :  { %4886 = vmatprep.subr.bf16.mxu1 %v4885_v44  ;;  %v4909_v52 = vpack.c.bf16 %v1122_v45, %v1118_v43  ;;  %v1137_v14 = vld [vmem:[#allocation7 + $0x270] sm:$0xff]  ;;  %v1171_v43 = vld [vmem:[#allocation7 + $0x380] sm:$0xff]  ;;  %v1180_v45 = vld [vmem:[#allocation7 + $0x3c8] sm:$0xff] }
 0x11a   :  { %4376 = vmatpush1.bf16.msra.mxu0 %v4375_v24  ;;  %v1119_v24 = vld [vmem:[#allocation7 + $0x1e0] sm:$0xff]  ;;  %v1178_v2 = vld [vmem:[#allocation7 + $0x3b8] sm:$0xff] }
 0x11b   :  { %4378 = vmatprep.subr.bf16.mxu0 %v4377_v26  ;;  %v1128_v26 = vld [vmem:[#allocation7 + $0x228] sm:$0xff]  ;;  %v4399_v33 = vpack.c.bf16 %v1119_v24, %v1115_v23  ;;  %v4919_v23 = vpack.c.bf16 %v1137_v14, %v1133_v13  ;;  %v1190_v13 = vld [vmem:[#allocation7 + $0x418] sm:$0xff] }
 0x11c   :  { %4888 = vmatpush1.bf16.msra.mxu1 %v4887_v55  ;;  %v4401_v35 = vpack.c.bf16 %v1128_v26, %v1124_v25  ;;  %v1126_v55 = vld [vmem:[#allocation7 + $0x218] sm:$0xff]  ;;  %v1141_v25 = vld [vmem:[#allocation7 + $0x290] sm:$0xff] }
 0x11d   :  { %4890 = vmatprep.subr.bf16.mxu1 %v4889_v56  ;;  %v4913_v1 = vpack.c.bf16 %v1130_v57, %v1126_v55  ;;  %v1145_v26 = vld [vmem:[#allocation7 + $0x2b0] sm:$0xff]  ;;  %v1179_v55 = vld [vmem:[#allocation7 + $0x3c0] sm:$0xff]  ;;  %v1188_v57 = vld [vmem:[#allocation7 + $0x408] sm:$0xff] }
 0x11e   :  { %4380 = vmatpush1.bf16.msra.mxu0 %v4379_v37  ;;  %v1127_v37 = vld [vmem:[#allocation7 + $0x220] sm:$0xff]  ;;  %v1194_v14 = vld [vmem:[#allocation7 + $0x438] sm:$0xff] }
 0x11f   :  { %4382 = vmatprep.subr.bf16.mxu0 %v4381_v38  ;;  %v1136_v38 = vld [vmem:[#allocation7 + $0x268] sm:$0xff]  ;;  %v4403_v44 = vpack.c.bf16 %v1127_v37, %v1123_v36  ;;  %v4923_v36 = vpack.c.bf16 %v1145_v26, %v1141_v25  ;;  %v1187_v25 = vld [vmem:[#allocation7 + $0x400] sm:$0xff] }
 0x120   :  { %4892 = vmatpush1.bf16.msra.mxu1 %v4891_v30  ;;  %v4405_v46 = vpack.c.bf16 %v1136_v38, %v1132_v0  ;;  %v1134_v30 = vld [vmem:[#allocation7 + $0x258] sm:$0xff]  ;;  %v1149_v0 = vld [vmem:[#allocation7 + $0x2d0] sm:$0xff]  ;;  %v1191_v26 = vld [vmem:[#allocation7 + $0x420] sm:$0xff] }
 0x121   :  { %4894 = vmatprep.subr.bf16.mxu1 %v4893_v4  ;;  %v4917_v12 = vpack.c.bf16 %v1138_v5, %v1134_v30  ;;  %v1153_v38 = vld [vmem:[#allocation7 + $0x2f0] sm:$0xff] }
 0x122   :  { %4384 = vmatpush1.bf16.msra.mxu0 %v4383_v48  ;;  %v1135_v48 = vld [vmem:[#allocation7 + $0x260] sm:$0xff]  ;;  %v1173_v5 = vld [vmem:[#allocation7 + $0x390] sm:$0xff] }
 0x123   :  { %4386 = vmatprep.subr.bf16.mxu0 %v4385_v50  ;;  %v1144_v50 = vld [vmem:[#allocation7 + $0x2a8] sm:$0xff]  ;;  %v4407_v56 = vpack.c.bf16 %v1135_v48, %v1131_v47  ;;  %v4927_v47 = vpack.c.bf16 %v1153_v38, %v1149_v0  ;;  %v4435_v0 = vpack.c.bf16 %v1191_v26, %v1187_v25  ;;  %v1221_v26 = vld [vmem:[#allocation7 + $0x510] sm:$0xff] }
 0x124   :  { %4896 = vmatpush1.bf16.msra.mxu1 %v4895_v15  ;;  %v4409_v58 = vpack.c.bf16 %v1144_v50, %v1140_v49  ;;  %v1142_v15 = vld [vmem:[#allocation7 + $0x298] sm:$0xff]  ;;  %v1157_v49 = vld [vmem:[#allocation7 + $0x310] sm:$0xff] }
 0x125   :  { %4898 = vmatprep.subr.bf16.mxu1 %v4897_v16  ;;  %v4921_v24 = vpack.c.bf16 %v1146_v17, %v1142_v15  ;;  %v1161_v50 = vld [vmem:[#allocation7 + $0x330] sm:$0xff]  ;;  %v395_v17 = vlaneseq }
 0x126   :  { %4388 = vmatpush1.bf16.msra.mxu0 %v4387_v60  ;;  %v1143_v60 = vld [vmem:[#allocation7 + $0x2a0] sm:$0xff] }
 0x127   :  { %4390 = vmatprep.subr.bf16.mxu0 %v4389_v62  ;;  %v1152_v62 = vld [vmem:[#allocation7 + $0x2e8] sm:$0xff]  ;;  %v4411_v4 = vpack.c.bf16 %v1143_v60, %v1139_v59  ;;  %v4931_v59 = vpack.c.bf16 %v1161_v50, %v1157_v49  ;;  %v1206_v49 = vld [vmem:[#allocation7 + $0x498] sm:$0xff] }
 0x128   :  { %4900 = vmatpush1.bf16.msra.mxu1 %v4899_v27  ;;  %v4413_v6 = vpack.c.bf16 %v1152_v62, %v1148_v61  ;;  %v1150_v27 = vld [vmem:[#allocation7 + $0x2d8] sm:$0xff]  ;;  %v1165_v61 = vld [vmem:[#allocation7 + $0x350] sm:$0xff] }
 0x129   :  { %4902 = vmatprep.subr.bf16.mxu1 %v4901_v28  ;;  %v4925_v37 = vpack.c.bf16 %v1154_v29, %v1150_v27  ;;  %v1169_v62 = vld [vmem:[#allocation7 + $0x370] sm:$0xff]  ;;  %v1210_v50 = vld [vmem:[#allocation7 + $0x4b8] sm:$0xff] }
 0x12a   :  { %4392 = vmatpush1.bf16.msra.mxu0 %v4391_v8  ;;  %v1151_v8 = vld [vmem:[#allocation7 + $0x2e0] sm:$0xff]  ;;  %v4935_v30 = vpack.c.bf16 %v1169_v62, %v1165_v61  ;;  %v1189_v29 = vld [vmem:[#allocation7 + $0x410] sm:$0xff]  ;;  %v1216_v61 = vld [vmem:[#allocation7 + $0x4e8] sm:$0xff] }
 0x12b   :  { %4394 = vmatprep.subr.bf16.mxu0 %v4393_v10  ;;  %v1160_v10 = vld [vmem:[#allocation7 + $0x328] sm:$0xff]  ;;  %v4415_v16 = vpack.c.bf16 %v1151_v8, %v1147_v7  ;;  %v1182_v7 = vld [vmem:[#allocation7 + $0x3d8] sm:$0xff] }
 0x12c   :  { %4904 = vmatpush1.bf16.msra.mxu1 %v4903_v39  ;;  %v4417_v18 = vpack.c.bf16 %v1160_v10, %v1156_v9  ;;  %v1158_v39 = vld [vmem:[#allocation7 + $0x318] sm:$0xff] }
 0x12d   :  { %4906 = vmatprep.subr.bf16.mxu1 %v4905_v40  ;;  %v4929_v48 = vpack.c.bf16 %v1162_v41, %v1158_v39  ;;  %v1186_v8 = vld [vmem:[#allocation7 + $0x3f8] sm:$0xff]  ;;  %v1195_v39 = vld [vmem:[#allocation7 + $0x440] sm:$0xff] }
 0x12e   :  { %4396 = vmatpush1.bf16.msra.mxu0 %v4395_v20  ;;  %v1159_v20 = vld [vmem:[#allocation7 + $0x320] sm:$0xff]  ;;  %v4941_v10 = vpack.c.bf16 %v1186_v8, %v1182_v7  ;;  %v1214_v62 = vld [vmem:[#allocation7 + $0x4d8] sm:$0xff]  ;;  %v1213_v8 = vld [vmem:[#allocation7 + $0x4d0] sm:$0xff] }
 0x12f   :  { %4398 = vmatprep.subr.bf16.mxu0 %v4397_v22  ;;  %v1168_v22 = vld [vmem:[#allocation7 + $0x368] sm:$0xff]  ;;  %v4419_v28 = vpack.c.bf16 %v1159_v20, %v1155_v19  ;;  %v6177_v20 = vld [vmem:[#allocation5] sm:$0xff] }
 0x130   :  { %4908 = vmatpush1.bf16.msra.mxu1 %v4907_v51  ;;  %v4421_v31 = vpack.c.bf16 %v1168_v22, %v1164_v21  ;;  %v1166_v51 = vld [vmem:[#allocation7 + $0x358] sm:$0xff] }
 0x131   :  { %4910 = vmatprep.subr.bf16.mxu1 %v4909_v52  ;;  %v4933_v60 = vpack.c.bf16 %v1170_v53, %v1166_v51  ;;  %v1203_v53 = vld [vmem:[#allocation7 + $0x480] sm:$0xff] }
 0x132   :  { %4400 = vmatpush1.bf16.msra.mxu0 %v4399_v33  ;;  %v1167_v33 = vld [vmem:[#allocation7 + $0x360] sm:$0xff] }
 0x133   :  { %4402 = vmatprep.subr.bf16.mxu0 %v4401_v35  ;;  %v1176_v35 = vld [vmem:[#allocation7 + $0x3a8] sm:$0xff]  ;;  %v4423_v40 = vpack.c.bf16 %v1167_v33, %v1163_v32 }
 0x134   :  { %4912 = vmatpush1.bf16.msra.mxu1 %v4911_v63  ;;  %v4425_v42 = vpack.c.bf16 %v1176_v35, %v1172_v34  ;;  %v1196_v32 = vld [vmem:[#allocation7 + $0x448] sm:$0xff]  ;;  %v1198_v35 = vld [vmem:[#allocation7 + $0x458] sm:$0xff] }
 0x135   :  { %4914 = vmatprep.subr.bf16.mxu1 %v4913_v1  ;;  %v1174_v1 = vld [vmem:[#allocation7 + $0x398] sm:$0xff]  ;;  %v1200_v34 = vld [vmem:[#allocation7 + $0x468] sm:$0xff] }
 0x136   :  { %4404 = vmatpush1.bf16.msra.mxu0 %v4403_v44  ;;  %v1175_v44 = vld [vmem:[#allocation7 + $0x3a0] sm:$0xff] }
 0x137   :  { %4406 = vmatprep.subr.bf16.mxu0 %v4405_v46  ;;  %v1184_v46 = vld [vmem:[#allocation7 + $0x3e8] sm:$0xff]  ;;  %v4427_v52 = vpack.c.bf16 %v1175_v44, %v1171_v43  ;;  %v1197_v44 = vld [vmem:[#allocation7 + $0x450] sm:$0xff] }
 0x138   :  { %4916 = vmatpush1.bf16.msra.mxu1 %v4915_v11  ;;  %v4429_v54 = vpack.c.bf16 %v1184_v46, %v1180_v45  ;;  %v1181_v11 = vld [vmem:[#allocation7 + $0x3d0] sm:$0xff]  ;;  %v1204_v46 = vld [vmem:[#allocation7 + $0x488] sm:$0xff] }
 0x139   :  { %4918 = vmatprep.subr.bf16.mxu1 %v4917_v12  ;;  %v1185_v12 = vld [vmem:[#allocation7 + $0x3f0] sm:$0xff] }
 0x13a   :  { %4408 = vmatpush1.bf16.msra.mxu0 %v4407_v56  ;;  %v1183_v56 = vld [vmem:[#allocation7 + $0x3e0] sm:$0xff]  ;;  %v4943_v15 = vpack.c.bf16 %v1185_v12, %v1181_v11  ;;  %v1201_v45 = vld [vmem:[#allocation7 + $0x470] sm:$0xff]  ;;  %v1224_v12 = vld [vmem:[#allocation7 + $0x528] sm:$0xff] }
 0x13b   :  { %4410 = vmatprep.subr.bf16.mxu0 %v4409_v58  ;;  %v1192_v58 = vld [vmem:[#allocation7 + $0x428] sm:$0xff]  ;;  %v4431_v63 = vpack.c.bf16 %v1183_v56, %v1179_v55  ;;  %v4953_v56 = vpack.c.bf16 %v1210_v50, %v1206_v49 }
 0x13c   :  { %4920 = vmatpush1.bf16.msra.mxu1 %v4919_v23  ;;  %v4433_v3 = vpack.c.bf16 %v1192_v58, %v1188_v57  ;;  %v1205_v57 = vld [vmem:[#allocation7 + $0x490] sm:$0xff] }
 0x13d   :  { %4922 = vmatprep.subr.bf16.mxu1 %v4921_v24  ;;  %v1209_v58 = vld [vmem:[#allocation7 + $0x4b0] sm:$0xff] }
 0x13e   :  { %4412 = vmatpush1.bf16.msra.mxu0 %v4411_v4  ;;  %v4937_v4 = vpack.c.bf16 %v1178_v2, %v1174_v1 }
 0x13f   :  { %4414 = vmatprep.subr.bf16.mxu0 %v4413_v6  ;;  %v1177_v6 = vld [vmem:[#allocation7 + $0x3b0] sm:$0xff] }
 0x140   :  { %4924 = vmatpush1.bf16.msra.mxu1 %v4923_v36  ;;  %v4939_v9 = vpack.c.bf16 %v1177_v6, %v1173_v5  ;;  %v1202_v36 = vld [vmem:[#allocation7 + $0x478] sm:$0xff] }
 0x141   :  { %4926 = vmatprep.subr.bf16.mxu1 %v4925_v37  ;;  %v4949_v43 = vpack.c.bf16 %v1202_v36, %v1198_v35  ;;  %v1227_v35 = vld [vmem:[#allocation7 + $0x540] sm:$0xff] }
 0x142   :  { %4416 = vmatpush1.bf16.msra.mxu0 %v4415_v16  ;;  %v4945_v16 = vpack.c.bf16 %v1194_v14, %v1190_v13  ;;  %v1222_v13 = vld [vmem:[#allocation7 + $0x518] sm:$0xff]  ;;  %v1231_v36 = vld [vmem:[#allocation7 + $0x560] sm:$0xff] }
 0x143   :  { %4418 = vmatprep.subr.bf16.mxu0 %v4417_v18  ;;  %v6172_v18 = vshrl.u32 %v395_v17, 7  ;;  %v1226_v14 = vld [vmem:[#allocation7 + $0x538] sm:$0xff] }
 0x144   :  { %4928 = vmatpush1.bf16.msra.mxu1 %v4927_v47  ;;  %v4961_v25 = vpack.c.bf16 %v1226_v14, %v1222_v13  ;;  %v1253_v13 = vld [vmem:[#allocation7 + $0x610] sm:$0xff] }
 0x145   :  { %4930 = vmatprep.subr.bf16.mxu1 %v4929_v48  ;;  %v6175_v19 = vsub.s32 0, %v6172_v18  ;;  %v6180_v21 = vsub.s32 1, %v6172_v18  ;;  %v6187_v47 = vsub.s32 3, %v6172_v18  ;;  %v1208_v48 = vld [vmem:[#allocation7 + $0x4a8] sm:$0xff]  ;;  %v1257_v14 = vld [vmem:[#allocation7 + $0x630] sm:$0xff] }
 0x146   :  { %4420 = vmatpush1.bf16.msra.mxu0 %v4419_v28  ;;  %v4441_v55 = vpack.c.bf16 %v1208_v48, %v1204_v46  ;;  %v1235_v46 = vld [vmem:[#allocation7 + $0x580] sm:$0xff] }
 0x147   :  { %4422 = vmatprep.subr.bf16.mxu0 %v4421_v31  ;;  %v398_v22 = vrot.slane %v6177_v20, %v6175_v19  ;;  %v402_v23 = vrot.slane %v6177_v20, %v6180_v21  ;;  %v1193_v31 = vld [vmem:[#allocation7 + $0x430] sm:$0xff]  ;;  %v1239_v48 = vld [vmem:[#allocation7 + $0x5a0] sm:$0xff] }
 0x148   :  { %4932 = vmatpush1.bf16.msra.mxu1 %v4931_v59  ;;  %v4947_v38 = vpack.c.bf16 %v1193_v31, %v1189_v29  ;;  %v1212_v59 = vld [vmem:[#allocation7 + $0x4c8] sm:$0xff]  ;;  %v1230_v31 = vld [vmem:[#allocation7 + $0x558] sm:$0xff] }
 0x149   :  { %4934 = vmatprep.subr.bf16.mxu1 %v4933_v60  ;;  %v410_v60 = vrot.slane %v6177_v20, %v6187_v47  ;;  %v4445_v6 = vpack.c.bf16 %v1216_v61, %v1212_v59  ;;  %v1232_v29 = vld [vmem:[#allocation7 + $0x568] sm:$0xff]  ;;  %v1243_v59 = vld [vmem:[#allocation7 + $0x5c0] sm:$0xff] }
 0x14a   :  { %4424 = vmatpush1.bf16.msra.mxu0 %v4423_v40  ;;  %v1199_v40 = vld [vmem:[#allocation7 + $0x460] sm:$0xff] }
 0x14b   :  { %4426 = vmatprep.subr.bf16.mxu0 %v4425_v42  ;;  %v4437_v42 = vpack.c.bf16 %v1200_v34, %v1196_v32  ;;  %v4439_v51 = vpack.c.bf16 %v1199_v40, %v1195_v39  ;;  %v1234_v32 = vld [vmem:[#allocation7 + $0x578] sm:$0xff]  ;;  %v1233_v39 = vld [vmem:[#allocation7 + $0x570] sm:$0xff]  ;;  %v1236_v40 = vld [vmem:[#allocation7 + $0x588] sm:$0xff] }
 0x14c   :  { %4936 = vmatpush1.bf16.msra.mxu1 %v4935_v30  ;;  %v1211_v30 = vld [vmem:[#allocation7 + $0x4c0] sm:$0xff] }
 0x14d   :  { %4938 = vmatprep.subr.bf16.mxu1 %v4937_v4  ;;  %v1215_v4 = vld [vmem:[#allocation7 + $0x4e0] sm:$0xff] }
 0x14e   :  { %4428 = vmatpush1.bf16.msra.mxu0 %v4427_v52  ;;  %v4951_v52 = vpack.c.bf16 %v1201_v45, %v1197_v44  ;;  %v4455_v44 = vpack.c.bf16 %v1231_v36, %v1227_v35  ;;  %v1270_v35 = vld [vmem:[#allocation7 + $0x698] sm:$0xff] }
 0x14f   :  { %4430 = vmatprep.subr.bf16.mxu0 %v4429_v54  ;;  %v1207_v54 = vld [vmem:[#allocation7 + $0x4a0] sm:$0xff]  ;;  %v1274_v36 = vld [vmem:[#allocation7 + $0x6b8] sm:$0xff] }
 0x150   :  { %4940 = vmatpush1.bf16.msra.mxu1 %v4939_v9  ;;  %v4443_v2 = vpack.c.bf16 %v1207_v54, %v1203_v53  ;;  %v1217_v9 = vld [vmem:[#allocation7 + $0x4f0] sm:$0xff]  ;;  %v1244_v53 = vld [vmem:[#allocation7 + $0x5c8] sm:$0xff] }
 0x151   :  { %4942 = vmatprep.subr.bf16.mxu1 %v4941_v10  ;;  %v1220_v10 = vld [vmem:[#allocation7 + $0x508] sm:$0xff]  ;;  %v4959_v17 = vpack.c.bf16 %v1217_v9, %v1213_v8  ;;  %v1251_v8 = vld [vmem:[#allocation7 + $0x600] sm:$0xff] }
 0x152   :  { %4432 = vmatpush1.bf16.msra.mxu0 %v4431_v63  ;;  %v1218_v63 = vld [vmem:[#allocation7 + $0x4f8] sm:$0xff]  ;;  %v1248_v54 = vld [vmem:[#allocation7 + $0x5e8] sm:$0xff]  ;;  %v1255_v9 = vld [vmem:[#allocation7 + $0x620] sm:$0xff] }
 0x153   :  { %4434 = vmatprep.subr.bf16.mxu0 %v4433_v3  ;;  %v4955_v3 = vpack.c.bf16 %v1209_v58, %v1205_v57  ;;  %v4957_v7 = vpack.c.bf16 %v1218_v63, %v1214_v62  ;;  %v4459_v57 = vpack.c.bf16 %v1239_v48, %v1235_v46  ;;  %v4461_v61 = vpack.c.bf16 %v1248_v54, %v1244_v53  ;;  %v1245_v63 = vld [vmem:[#allocation7 + $0x5d0] sm:$0xff]  ;;  %v1278_v46 = vld [vmem:[#allocation7 + $0x6d8] sm:$0xff]  ;;  %v1279_v53 = vld [vmem:[#allocation7 + $0x6e0] sm:$0xff] }
 0x154   :  { %4944 = vmatpush1.bf16.msra.mxu1 %v4943_v15  ;;  %v1282_v48 = vld [vmem:[#allocation7 + $0x6f8] sm:$0xff] }
 0x155   :  { %4946 = vmatprep.subr.bf16.mxu1 %v4945_v16  ;;  %v4447_v16 = vpack.c.bf16 %v1215_v4, %v1211_v30  ;;  %v1256_v30 = vld [vmem:[#allocation7 + $0x628] sm:$0xff]  ;;  %v1254_v4 = vld [vmem:[#allocation7 + $0x618] sm:$0xff] }
 0x188   :  { %v541_v24 = vpop.f32.mrb[0].mxu0 }
 0x189   :  { %v542_v27 = vadd.f32 %v541_v24, %v398_v22  ;;  %v543_v28 = vpop.f32.mrb[1].mxu0  ;;  %v1219_v22 = vld [vmem:[#allocation7 + $0x500] sm:$0xff]  ;;  %v4449_v24 = vpack.c.bf16 %v1224_v12, %v1220_v10 }
 0x18a   :  { %v544_v33 = vadd.f32 %v543_v28, %v402_v23  ;;  %v6191_v1 = vpop.f32.mrb[0].mxu1  ;;  %v1223_v23 = vld [vmem:[#allocation7 + $0x520] sm:$0xff]  ;;  %v1228_v28 = vld [vmem:[#allocation7 + $0x548] sm:$0xff] }
 0x18b   :  { %v1043_v41 = vmax.f32 %v542_v27, 0.0  ;;  %v614_v5 = vpop.f32.mrb[1].mxu1  ;;  %v1225_v27 = vld [vmem:[#allocation7 + $0x530] sm:$0xff] }
 0x18c   :  { %v1044_v37 = vmax.f32 %v544_v33, 0.0  ;;  %v615_v11 = vadd.f32 %v614_v5, %v410_v60  ;;  %v4451_v33 = vpack.c.bf16 %v1223_v23, %v1219_v22  ;;  %v4963_v34 = vpack.c.bf16 %v1225_v27, %v1221_v26  ;;  %v1247_v60 = vld [vmem:[#allocation7 + $0x5e0] sm:$0xff]  ;;  %v1258_v5 = vld [vmem:[#allocation7 + $0x638] sm:$0xff] }
 0x18d   :  { %v4977_v12 = vpack.c.bf16 %v1258_v5, %v1254_v4  ;;  %v1262_v22 = vld [vmem:[#allocation7 + $0x658] sm:$0xff]  ;;  %v1259_v26 = vld [vmem:[#allocation7 + $0x640] sm:$0xff] }
 0x18e   :  { %2169 = vmatprep.mubr.f32.mxu0 %v1044_v37  ;;  %2737 = vmatprep.mubr.f32.mxu1 %v1044_v37  ;;  %v1046_v15 = vmax.f32 %v615_v11, 0.0  ;;  %v4453_v37 = vpack.c.bf16 %v1232_v29, %v1228_v28  ;;  %v1266_v23 = vld [vmem:[#allocation7 + $0x678] sm:$0xff]  ;;  %v1263_v27 = vld [vmem:[#allocation7 + $0x660] sm:$0xff] }
 0x18f   :  { %2170 = vmatmul.mubr.f32.vlgmr.msra.gmra.mrb[8].mxu0 %v1043_v41  ;;  %2738 = vmatmul.mubr.f32.vlgmr.msra.gmra.mrb[8].mxu1 %v1043_v41  ;;  %v1240_v41 = vld [vmem:[#allocation7 + $0x5a8] sm:$0xff]  ;;  %v4981_v29 = vpack.c.bf16 %v1266_v23, %v1262_v22 }
 0x190   :  { %4436 = vmatpush1.bf16.msra.mxu0 %v4435_v0  ;;  %4948 = vmatpush1.bf16.msra.mxu1 %v4947_v38  ;;  %v4965_v0 = vpack.c.bf16 %v1234_v32, %v1230_v31  ;;  %v1229_v38 = vld [vmem:[#allocation7 + $0x550] sm:$0xff]  ;;  %v4457_v49 = vpack.c.bf16 %v1240_v41, %v1236_v40  ;;  %v4985_v41 = vpack.c.bf16 %v1274_v36, %v1270_v35  ;;  %v1303_v35 = vld [vmem:[#allocation7 + $0x7a0] sm:$0xff] }
 0x191   :  { %4438 = vmatprep.subr.bf16.mxu0 %v4437_v42  ;;  %4950 = vmatprep.subr.bf16.mxu1 %v4949_v43  ;;  %v1238_v42 = vld [vmem:[#allocation7 + $0x598] sm:$0xff]  ;;  %v4967_v45 = vpack.c.bf16 %v1233_v39, %v1229_v38  ;;  %v1261_v31 = vld [vmem:[#allocation7 + $0x650] sm:$0xff]  ;;  %v1267_v38 = vld [vmem:[#allocation7 + $0x680] sm:$0xff] }
 0x192   :  { %2240 = vmatprep.mubr.f32.mxu0 %v1046_v15  ;;  %2808 = vmatprep.mubr.f32.mxu1 %v1046_v15  ;;  %v1242_v43 = vld [vmem:[#allocation7 + $0x5b8] sm:$0xff]  ;;  %v1260_v15 = vld [vmem:[#allocation7 + $0x648] sm:$0xff]  ;;  %v1265_v32 = vld [vmem:[#allocation7 + $0x670] sm:$0xff] }
 0x193   :  { %v4969_v50 = vpack.c.bf16 %v1242_v43, %v1238_v42  ;;  %v1271_v39 = vld [vmem:[#allocation7 + $0x6a0] sm:$0xff]  ;;  %v1269_v42 = vld [vmem:[#allocation7 + $0x690] sm:$0xff] }
 0x194   :  { %4440 = vmatpush1.bf16.msra.mxu0 %v4439_v51  ;;  %4952 = vmatpush1.bf16.msra.mxu1 %v4951_v52  ;;  %v1237_v51 = vld [vmem:[#allocation7 + $0x590] sm:$0xff] }
 0x195   :  { %4442 = vmatprep.subr.bf16.mxu0 %v4441_v55  ;;  %4954 = vmatprep.subr.bf16.mxu1 %v4953_v56  ;;  %v1241_v52 = vld [vmem:[#allocation7 + $0x5b0] sm:$0xff]  ;;  %v1246_v55 = vld [vmem:[#allocation7 + $0x5d8] sm:$0xff] }
 0x196   :  { %v1250_v56 = vld [vmem:[#allocation7 + $0x5f8] sm:$0xff]  ;;  %v4971_v58 = vpack.c.bf16 %v1241_v52, %v1237_v51  ;;  %v1273_v43 = vld [vmem:[#allocation7 + $0x6b0] sm:$0xff]  ;;  %v1275_v52 = vld [vmem:[#allocation7 + $0x6c0] sm:$0xff] }
 0x197   :  { %v4973_v62 = vpack.c.bf16 %v1250_v56, %v1246_v55  ;;  %v4987_v51 = vpack.c.bf16 %v1273_v43, %v1269_v42  ;;  %v4989_v56 = vpack.c.bf16 %v1282_v48, %v1278_v46  ;;  %v1314_v42 = vld [vmem:[#allocation7 + $0x7f8] sm:$0xff]  ;;  %v417_v43 = vsub.s32 5, %v6172_v18  ;;  %v1307_v48 = vld [vmem:[#allocation7 + $0x7c0] sm:$0xff] }
 0x198   :  { %4444 = vmatpush1.bf16.msra.mxu0 %v4443_v2  ;;  %4956 = vmatpush1.bf16.msra.mxu1 %v4955_v3  ;;  %v1249_v2 = vld [vmem:[#allocation7 + $0x5f0] sm:$0xff]  ;;  %v1252_v3 = vld [vmem:[#allocation7 + $0x608] sm:$0xff] }
 0x199   :  { %4446 = vmatprep.subr.bf16.mxu0 %v4445_v6  ;;  %4958 = vmatprep.subr.bf16.mxu1 %v4957_v7  ;;  %v4463_v6 = vpack.c.bf16 %v1247_v60, %v1243_v59  ;;  %v4975_v7 = vpack.c.bf16 %v1249_v2, %v1245_v63  ;;  %v4465_v11 = vpack.c.bf16 %v1256_v30, %v1252_v3  ;;  %v1284_v59 = vld [vmem:[#allocation7 + $0x708] sm:$0xff]  ;;  %v1283_v3 = vld [vmem:[#allocation7 + $0x700] sm:$0xff] }
 0x19a   :  { %v1288_v60 = vld [vmem:[#allocation7 + $0x728] sm:$0xff]  ;;  %v4479_v63 = vpack.c.bf16 %v1279_v53, %v1275_v52  ;;  %v1287_v30 = vld [vmem:[#allocation7 + $0x720] sm:$0xff]  ;;  %v1309_v53 = vld [vmem:[#allocation7 + $0x7d0] sm:$0xff] }
 0x19b   :  { %v4481_v4 = vpack.c.bf16 %v1288_v60, %v1284_v59  ;;  %v1322_v59 = vld [vmem:[#allocation7 + $0x838] sm:$0xff]  ;;  %v418_v60 = vrot.slane %v6177_v20, %v417_v43 }
 0x19c   :  { %4448 = vmatpush1.bf16.msra.mxu0 %v4447_v16  ;;  %4960 = vmatpush1.bf16.msra.mxu1 %v4959_v17  ;;  %v1264_v17 = vld [vmem:[#allocation7 + $0x668] sm:$0xff] }
 0x19d   :  { %4450 = vmatprep.subr.bf16.mxu0 %v4449_v24  ;;  %4962 = vmatprep.subr.bf16.mxu1 %v4961_v25  ;;  %v4467_v24 = vpack.c.bf16 %v1255_v9, %v1251_v8  ;;  %v4979_v25 = vpack.c.bf16 %v1257_v14, %v1253_v13  ;;  %v4469_v28 = vpack.c.bf16 %v1264_v17, %v1260_v15  ;;  %v1292_v8 = vld [vmem:[#allocation7 + $0x748] sm:$0xff]  ;;  %v1291_v15 = vld [vmem:[#allocation7 + $0x740] sm:$0xff] }
 0x19e   :  { %v1296_v9 = vld [vmem:[#allocation7 + $0x768] sm:$0xff]  ;;  %v4483_v13 = vpack.c.bf16 %v1287_v30, %v1283_v3  ;;  %v1295_v17 = vld [vmem:[#allocation7 + $0x760] sm:$0xff] }
 0x19f   :  { %v4485_v22 = vpack.c.bf16 %v1296_v9, %v1292_v8  ;;  %v1319_v3 = vld [vmem:[#allocation7 + $0x820] sm:$0xff]  ;;  %v1324_v8 = vld [vmem:[#allocation7 + $0x848] sm:$0xff] }
 0x1a0   :  { %4452 = vmatpush1.bf16.msra.mxu0 %v4451_v33  ;;  %4964 = vmatpush1.bf16.msra.mxu1 %v4963_v34  ;;  %v1268_v33 = vld [vmem:[#allocation7 + $0x688] sm:$0xff] }
 0x1a1   :  { %4454 = vmatprep.subr.bf16.mxu0 %v4453_v37  ;;  %4966 = vmatprep.subr.bf16.mxu1 %v4965_v0  ;;  %v1272_v34 = vld [vmem:[#allocation7 + $0x6a8] sm:$0xff]  ;;  %v4471_v37 = vpack.c.bf16 %v1263_v27, %v1259_v26  ;;  %v4983_v0 = vpack.c.bf16 %v1265_v32, %v1261_v31  ;;  %v6202_v31 = vsub.s32 2, %v6172_v18  ;;  %v4487_v32 = vpack.c.bf16 %v1295_v17, %v1291_v15  ;;  %v1323_v17 = vld [vmem:[#allocation7 + $0x840] sm:$0xff] }
 0x1a2   :  { %v4473_v40 = vpack.c.bf16 %v1272_v34, %v1268_v33  ;;  %v1300_v26 = vld [vmem:[#allocation7 + $0x788] sm:$0xff]  ;;  %v1299_v34 = vld [vmem:[#allocation7 + $0x780] sm:$0xff] }
 0x1a3   :  { %v1304_v27 = vld [vmem:[#allocation7 + $0x7a8] sm:$0xff] }
 0x1a4   :  { %4456 = vmatpush1.bf16.msra.mxu0 %v4455_v44  ;;  %4968 = vmatpush1.bf16.msra.mxu1 %v4967_v45  ;;  %v1276_v44 = vld [vmem:[#allocation7 + $0x6c8] sm:$0xff]  ;;  %v4489_v36 = vpack.c.bf16 %v1304_v27, %v1300_v26  ;;  %v1329_v26 = vld [vmem:[#allocation7 + $0x870] sm:$0xff] }
 0x1a5   :  { %4458 = vmatprep.subr.bf16.mxu0 %v4457_v49  ;;  %4970 = vmatprep.subr.bf16.mxu1 %v4969_v50  ;;  %v1280_v45 = vld [vmem:[#allocation7 + $0x6e8] sm:$0xff]  ;;  %v4475_v50 = vpack.c.bf16 %v1271_v39, %v1267_v38  ;;  %v1305_v38 = vld [vmem:[#allocation7 + $0x7b0] sm:$0xff] }
 0x1a6   :  { %v4477_v55 = vpack.c.bf16 %v1280_v45, %v1276_v44  ;;  %v1308_v39 = vld [vmem:[#allocation7 + $0x7c8] sm:$0xff]  ;;  %v406_v44 = vrot.slane %v6177_v20, %v6202_v31  ;;  %v4491_v45 = vpack.c.bf16 %v1303_v35, %v1299_v34  ;;  %v1331_v35 = vld [vmem:[#allocation7 + $0x880] sm:$0xff] }
 0x1a7   :  { %v1328_v20 = vld [vmem:[#allocation7 + $0x868] sm:$0xff] }
 0x1a8   :  { %4460 = vmatpush1.bf16.msra.mxu0 %v4459_v57  ;;  %4972 = vmatpush1.bf16.msra.mxu1 %v4971_v58  ;;  %v6193_v10 = vpop.f32.mrb[2].mxu0  ;;  %v1277_v57 = vld [vmem:[#allocation7 + $0x6d0] sm:$0xff]  ;;  %v1332_v27 = vld [vmem:[#allocation7 + $0x888] sm:$0xff] }
 0x1a9   :  { %4462 = vmatprep.subr.bf16.mxu0 %v4461_v61  ;;  %4974 = vmatprep.subr.bf16.mxu1 %v4973_v62  ;;  %v6195_v16 = vpop.f32.mrb[3].mxu0  ;;  %v1281_v58 = vld [vmem:[#allocation7 + $0x6f0] sm:$0xff]  ;;  %v1286_v61 = vld [vmem:[#allocation7 + $0x718] sm:$0xff] }
 0x1aa   :  { %v6197_v49 = vpop.f32.mrb[2].mxu1  ;;  %v1290_v62 = vld [vmem:[#allocation7 + $0x738] sm:$0xff]  ;;  %v4991_v2 = vpack.c.bf16 %v1281_v58, %v1277_v57  ;;  %v1320_v57 = vld [vmem:[#allocation7 + $0x828] sm:$0xff] }
 0x1ab   :  { %v6199_v54 = vpop.f32.mrb[3].mxu1  ;;  %v4993_v5 = vpack.c.bf16 %v1290_v62, %v1286_v61  ;;  %v1318_v58 = vld [vmem:[#allocation7 + $0x818] sm:$0xff]  ;;  %v613_v61 = vadd.f32 %v6191_v1, %v406_v44 }
 0x1ac   :  { %4464 = vmatpush1.bf16.msra.mxu0 %v4463_v6  ;;  %4976 = vmatpush1.bf16.msra.mxu1 %v4975_v7  ;;  %v1285_v6 = vld [vmem:[#allocation7 + $0x710] sm:$0xff]  ;;  %v1330_v1 = vld [vmem:[#allocation7 + $0x878] sm:$0xff] }
 0x1ad   :  { %4466 = vmatprep.subr.bf16.mxu0 %v4465_v11  ;;  %4978 = vmatprep.subr.bf16.mxu1 %v4977_v12  ;;  %v1289_v7 = vld [vmem:[#allocation7 + $0x730] sm:$0xff]  ;;  %v1294_v11 = vld [vmem:[#allocation7 + $0x758] sm:$0xff] }
 0x1ae   :  { %v1298_v12 = vld [vmem:[#allocation7 + $0x778] sm:$0xff]  ;;  %v4995_v14 = vpack.c.bf16 %v1289_v7, %v1285_v6  ;;  %v1317_v6 = vld [vmem:[#allocation7 + $0x810] sm:$0xff] }
 0x1af   :  { %v4997_v23 = vpack.c.bf16 %v1298_v12, %v1294_v11  ;;  %v1321_v7 = vld [vmem:[#allocation7 + $0x830] sm:$0xff]  ;;  %v1326_v11 = vld [vmem:[#allocation7 + $0x858] sm:$0xff]  ;;  %v686_v12 = vadd.f32 %v6195_v16, %v418_v60 }
 0x1b0   :  { %4468 = vmatpush1.bf16.msra.mxu0 %v4467_v24  ;;  %4980 = vmatpush1.bf16.msra.mxu1 %v4979_v25  ;;  %v1293_v24 = vld [vmem:[#allocation7 + $0x750] sm:$0xff]  ;;  %v5011_v15 = vpack.c.bf16 %v1321_v7, %v1317_v6  ;;  %v1346_v44 = vld [vmem:[#allocation7 + $0x8f8] sm:$0xff] }
 0x1b1   :  { %4470 = vmatprep.subr.bf16.mxu0 %v4469_v28  ;;  %4982 = vmatprep.subr.bf16.mxu1 %v4981_v29  ;;  %v1297_v25 = vld [vmem:[#allocation7 + $0x770] sm:$0xff]  ;;  %v1302_v28 = vld [vmem:[#allocation7 + $0x798] sm:$0xff] }
 0x1b2   :  { %v1306_v29 = vld [vmem:[#allocation7 + $0x7b8] sm:$0xff]  ;;  %v4999_v33 = vpack.c.bf16 %v1297_v25, %v1293_v24  ;;  %v5013_v24 = vpack.c.bf16 %v1330_v1, %v1326_v11  ;;  %v1325_v25 = vld [vmem:[#allocation7 + $0x850] sm:$0xff] }
 0x1b3   :  { %v5015_v34 = vpack.c.bf16 %v1329_v26, %v1325_v25  ;;  %v1350_v60 = vld [vmem:[#allocation7 + $0x918] sm:$0xff]  ;;  %v1349_v6 = vld [vmem:[#allocation7 + $0x910] sm:$0xff]  ;;  %v1364_v25 = vld [vmem:[#allocation7 + $0x988] sm:$0xff] }
 0x1b4   :  { %4472 = vmatpush1.bf16.msra.mxu0 %v4471_v37  ;;  %4984 = vmatpush1.bf16.msra.mxu1 %v4983_v0  ;;  %v5001_v37 = vpack.c.bf16 %v1306_v29, %v1302_v28  ;;  %v1301_v0 = vld [vmem:[#allocation7 + $0x790] sm:$0xff]  ;;  %v1336_v28 = vld [vmem:[#allocation7 + $0x8a8] sm:$0xff]  ;;  %v1334_v29 = vld [vmem:[#allocation7 + $0x898] sm:$0xff] }
 0x1b5   :  { %4474 = vmatprep.subr.bf16.mxu0 %v4473_v40  ;;  %4986 = vmatprep.subr.bf16.mxu1 %v4985_v41  ;;  %v1312_v40 = vld [vmem:[#allocation7 + $0x7e8] sm:$0xff]  ;;  %v1310_v41 = vld [vmem:[#allocation7 + $0x7d8] sm:$0xff]  ;;  %v5003_v46 = vpack.c.bf16 %v1305_v38, %v1301_v0  ;;  %v1333_v38 = vld [vmem:[#allocation7 + $0x890] sm:$0xff] }
 0x1b6   :  { %v5005_v52 = vpack.c.bf16 %v1314_v42, %v1310_v41  ;;  %v1344_v41 = vld [vmem:[#allocation7 + $0x8e8] sm:$0xff]  ;;  %v1342_v42 = vld [vmem:[#allocation7 + $0x8d8] sm:$0xff]  ;;  %v1353_v7 = vld [vmem:[#allocation7 + $0x930] sm:$0xff] }
 0x1b7   :  { %v1358_v11 = vld [vmem:[#allocation7 + $0x958] sm:$0xff]  ;;  %v1368_v26 = vld [vmem:[#allocation7 + $0x9a8] sm:$0xff] }
 0x1b8   :  { %4476 = vmatpush1.bf16.msra.mxu0 %v4475_v50  ;;  %4988 = vmatpush1.bf16.msra.mxu1 %v4987_v51  ;;  %v1311_v50 = vld [vmem:[#allocation7 + $0x7e0] sm:$0xff]  ;;  %v4493_v51 = vpack.c.bf16 %v1312_v40, %v1308_v39  ;;  %v1337_v39 = vld [vmem:[#allocation7 + $0x8b0] sm:$0xff]  ;;  %v1340_v40 = vld [vmem:[#allocation7 + $0x8c8] sm:$0xff] }
 0x1b9   :  { %4478 = vmatprep.subr.bf16.mxu0 %v4477_v55  ;;  %4990 = vmatprep.subr.bf16.mxu1 %v4989_v56  ;;  %v1313_v55 = vld [vmem:[#allocation7 + $0x7f0] sm:$0xff]  ;;  %v1316_v56 = vld [vmem:[#allocation7 + $0x808] sm:$0xff]  ;;  %v4495_v62 = vpack.c.bf16 %v1311_v50, %v1307_v48  ;;  %v5019_v48 = vpack.c.bf16 %v1337_v39, %v1333_v38  ;;  %v1339_v50 = vld [vmem:[#allocation7 + $0x8c0] sm:$0xff] }
 0x1ba   :  { %v1362_v1 = vld [vmem:[#allocation7 + $0x978] sm:$0xff]  ;;  %v1376_v38 = vld [vmem:[#allocation7 + $0x9e8] sm:$0xff] }
 0x1bb   :  { %v1374_v39 = vld [vmem:[#allocation7 + $0x9d8] sm:$0xff] }
 0x1bc   :  { %4480 = vmatpush1.bf16.msra.mxu0 %v4479_v63  ;;  %4992 = vmatpush1.bf16.msra.mxu1 %v4991_v2  ;;  %v5007_v63 = vpack.c.bf16 %v1313_v55, %v1309_v53  ;;  %v1315_v2 = vld [vmem:[#allocation7 + $0x800] sm:$0xff]  ;;  %v4509_v53 = vpack.c.bf16 %v1344_v41, %v1340_v40  ;;  %v5021_v55 = vpack.c.bf16 %v1346_v44, %v1342_v42  ;;  %v1378_v40 = vld [vmem:[#allocation7 + $0x9f8] sm:$0xff]  ;;  %v413_v41 = vsub.s32 4, %v6172_v18 }
 0x1bd   :  { %4482 = vmatprep.subr.bf16.mxu0 %v4481_v4  ;;  %4994 = vmatprep.subr.bf16.mxu1 %v4993_v5  ;;  %v4497_v4 = vpack.c.bf16 %v1320_v57, %v1316_v56  ;;  %v5009_v5 = vpack.c.bf16 %v1322_v59, %v1318_v58  ;;  %v1341_v56 = vld [vmem:[#allocation7 + $0x8d0] sm:$0xff]  ;;  %v1348_v58 = vld [vmem:[#allocation7 + $0x908] sm:$0xff] }
 0x1be   :  { %v1345_v57 = vld [vmem:[#allocation7 + $0x8f0] sm:$0xff]  ;;  %v1352_v59 = vld [vmem:[#allocation7 + $0x928] sm:$0xff] }
 0x1c0   :  { %4484 = vmatpush1.bf16.msra.mxu0 %v4483_v13  ;;  %4996 = vmatpush1.bf16.msra.mxu1 %v4995_v14  ;;  %v1045_v13 = vmax.f32 %v613_v61, 0.0  ;;  %v4499_v14 = vpack.c.bf16 %v1319_v3, %v1315_v2  ;;  %v1354_v61 = vld [vmem:[#allocation7 + $0x938] sm:$0xff]  ;;  %v1347_v2 = vld [vmem:[#allocation7 + $0x900] sm:$0xff] }
 0x1c1   :  { %4486 = vmatprep.subr.bf16.mxu0 %v4485_v22  ;;  %4998 = vmatprep.subr.bf16.mxu1 %v4997_v23  ;;  %v1327_v22 = vld [vmem:[#allocation7 + $0x860] sm:$0xff]  ;;  %v4501_v23 = vpack.c.bf16 %v1328_v20, %v1324_v8  ;;  %v1356_v8 = vld [vmem:[#allocation7 + $0x948] sm:$0xff] }
 0x1c2   :  { %v4503_v16 = vpack.c.bf16 %v1327_v22, %v1323_v17  ;;  %v1351_v3 = vld [vmem:[#allocation7 + $0x920] sm:$0xff]  ;;  %v1360_v20 = vld [vmem:[#allocation7 + $0x968] sm:$0xff]  ;;  %v5029_v22 = vpack.c.bf16 %v1362_v1, %v1358_v11 }
 0x1c3   :  { %v4517_v17 = vpack.c.bf16 %v1360_v20, %v1356_v8  ;;  %v1381_v8 = vld [vmem:[#allocation7 + $0xa10] sm:$0xff]  ;;  %v1388_v11 = vld [vmem:[#allocation7 + $0xa48] sm:$0xff] }
 0x1c4   :  { %4488 = vmatpush1.bf16.msra.mxu0 %v4487_v32  ;;  %5000 = vmatpush1.bf16.msra.mxu1 %v4999_v33  ;;  %v1338_v32 = vld [vmem:[#allocation7 + $0x8b8] sm:$0xff]  ;;  %v1048_v33 = vmax.f32 %v686_v12, 0.0  ;;  %v4515_v12 = vpack.c.bf16 %v1351_v3, %v1347_v2  ;;  %v1379_v3 = vld [vmem:[#allocation7 + $0xa00] sm:$0xff]  ;;  %v1385_v20 = vld [vmem:[#allocation7 + $0xa30] sm:$0xff] }
 0x1c5   :  { %4490 = vmatprep.subr.bf16.mxu0 %v4489_v36  ;;  %5002 = vmatprep.subr.bf16.mxu1 %v5001_v37  ;;  %v1335_v36 = vld [vmem:[#allocation7 + $0x8a0] sm:$0xff]  ;;  %v4505_v37 = vpack.c.bf16 %v1336_v28, %v1332_v27  ;;  %v5017_v0 = vpack.c.bf16 %v1338_v32, %v1334_v29  ;;  %v1366_v27 = vld [vmem:[#allocation7 + $0x998] sm:$0xff] }
 0x1c6   :  { %v1370_v28 = vld [vmem:[#allocation7 + $0x9b8] sm:$0xff] }
 0x1c8   :  { %4492 = vmatpush1.bf16.msra.mxu0 %v4491_v45  ;;  %5004 = vmatpush1.bf16.msra.mxu1 %v5003_v46  ;;  %v6211_v30 = vpop.f32.mrb[4].mxu0  ;;  %v4507_v46 = vpack.c.bf16 %v1335_v36, %v1331_v35  ;;  %v5033_v35 = vpack.c.bf16 %v1370_v28, %v1366_v27  ;;  %v1365_v36 = vld [vmem:[#allocation7 + $0x990] sm:$0xff] }
 0x1c9   :  { %4494 = vmatprep.subr.bf16.mxu0 %v4493_v51  ;;  %5006 = vmatprep.subr.bf16.mxu1 %v5005_v52  ;;  %v6213_v9 = vpop.f32.mrb[5].mxu0  ;;  %v1343_v51 = vld [vmem:[#allocation7 + $0x8e0] sm:$0xff]  ;;  %v1389_v27 = vld [vmem:[#allocation7 + $0xa50] sm:$0xff] }
 0x1ca   :  { %v6216_v45 = vpop.f32.mrb[4].mxu1  ;;  %v1393_v28 = vld [vmem:[#allocation7 + $0xa70] sm:$0xff] }
 0x1cb   :  { %v6218_v52 = vpop.f32.mrb[5].mxu1 }
 0x1cc   :  { %4496 = vmatpush1.bf16.msra.mxu0 %v4495_v62  ;;  %5008 = vmatpush1.bf16.msra.mxu1 %v5007_v63  ;;  %v4511_v62 = vpack.c.bf16 %v1343_v51, %v1339_v50  ;;  %v5023_v63 = vpack.c.bf16 %v1345_v57, %v1341_v56  ;;  %v6221_v50 = vld [vmem:[#allocation5 + $0x8] sm:$0xff]  ;;  %v1377_v56 = vld [vmem:[#allocation7 + $0x9f0] sm:$0xff]  ;;  %v1380_v57 = vld [vmem:[#allocation7 + $0xa08] sm:$0xff] }
 0x1cd   :  { %4498 = vmatprep.subr.bf16.mxu0 %v4497_v4  ;;  %5010 = vmatprep.subr.bf16.mxu1 %v5009_v5  ;;  %v4513_v4 = vpack.c.bf16 %v1352_v59, %v1348_v58  ;;  %v5025_v5 = vpack.c.bf16 %v1354_v61, %v1350_v60  ;;  %v446_v58 = vrot.slane %v6221_v50, %v413_v41  ;;  %v1384_v59 = vld [vmem:[#allocation7 + $0xa28] sm:$0xff]  ;;  %v1382_v60 = vld [vmem:[#allocation7 + $0xa18] sm:$0xff] }
 0x1ce   :  { %v1386_v61 = vld [vmem:[#allocation7 + $0xa38] sm:$0xff] }
 0x1cf   :  { %2241 = vmatmul.mubr.f32.vlgmr.msra.gmra.mrb[8].mxu0 %v1045_v13  ;;  %2809 = vmatmul.mubr.f32.vlgmr.msra.gmra.mrb[8].mxu1 %v1045_v13  ;;  %v5027_v13 = vpack.c.bf16 %v1353_v7, %v1349_v6  ;;  %v4529_v6 = vpack.c.bf16 %v1384_v59, %v1380_v57  ;;  %v5041_v7 = vpack.c.bf16 %v1386_v61, %v1382_v60  ;;  %v1403_v60 = vld [vmem:[#allocation7 + $0xac0] sm:$0xff] }
 0x1d0   :  { %4500 = vmatpush1.bf16.msra.mxu0 %v4499_v14  ;;  %5012 = vmatpush1.bf16.msra.mxu1 %v5011_v15  ;;  %v1355_v14 = vld [vmem:[#allocation7 + $0x940] sm:$0xff] }
 0x1d1   :  { %4502 = vmatprep.subr.bf16.mxu0 %v4501_v23  ;;  %5014 = vmatprep.subr.bf16.mxu1 %v5013_v24  ;;  %v1359_v15 = vld [vmem:[#allocation7 + $0x960] sm:$0xff]  ;;  %v1357_v23 = vld [vmem:[#allocation7 + $0x950] sm:$0xff] }
 0x1d2   :  { %2311 = vmatprep.mubr.f32.mxu0 %v1048_v33  ;;  %2879 = vmatprep.mubr.f32.mxu1 %v1048_v33  ;;  %v1361_v24 = vld [vmem:[#allocation7 + $0x970] sm:$0xff]  ;;  %v4519_v29 = vpack.c.bf16 %v1359_v15, %v1355_v14  ;;  %v1363_v33 = vld [vmem:[#allocation7 + $0x980] sm:$0xff]  ;;  %v1390_v14 = vld [vmem:[#allocation7 + $0xa58] sm:$0xff] }
 0x1d3   :  { %v5031_v32 = vpack.c.bf16 %v1361_v24, %v1357_v23  ;;  %v1387_v23 = vld [vmem:[#allocation7 + $0xa40] sm:$0xff] }
 0x1d4   :  { %4504 = vmatpush1.bf16.msra.mxu0 %v4503_v16  ;;  %5016 = vmatpush1.bf16.msra.mxu1 %v5015_v34  ;;  %v1367_v16 = vld [vmem:[#allocation7 + $0x9a0] sm:$0xff]  ;;  %v4521_v34 = vpack.c.bf16 %v1368_v26, %v1364_v25 }
 0x1d5   :  { %4506 = vmatprep.subr.bf16.mxu0 %v4505_v37  ;;  %5018 = vmatprep.subr.bf16.mxu1 %v5017_v0  ;;  %v1369_v37 = vld [vmem:[#allocation7 + $0x9b0] sm:$0xff]  ;;  %v1372_v0 = vld [vmem:[#allocation7 + $0x9c8] sm:$0xff]  ;;  %v4523_v42 = vpack.c.bf16 %v1367_v16, %v1363_v33  ;;  %v1391_v24 = vld [vmem:[#allocation7 + $0xa60] sm:$0xff] }
 0x1d6   :  { %v5035_v44 = vpack.c.bf16 %v1369_v37, %v1365_v36  ;;  %v4525_v51 = vpack.c.bf16 %v1376_v38, %v1372_v0  ;;  %v1398_v33 = vld [vmem:[#allocation7 + $0xa98] sm:$0xff]  ;;  %v4535_v36 = vpack.c.bf16 %v1391_v24, %v1387_v23  ;;  %v5047_v37 = vpack.c.bf16 %v1393_v28, %v1389_v27  ;;  %v1395_v0 = vld [vmem:[#allocation7 + $0xa80] sm:$0xff]  ;;  %v1413_v23 = vld [vmem:[#allocation7 + $0xb10] sm:$0xff] }
 0x1d7   :  { %v1402_v16 = vld [vmem:[#allocation7 + $0xab8] sm:$0xff]  ;;  %v1399_v38 = vld [vmem:[#allocation7 + $0xaa0] sm:$0xff]  ;;  %v1417_v24 = vld [vmem:[#allocation7 + $0xb30] sm:$0xff] }
 0x1d8   :  { %4508 = vmatpush1.bf16.msra.mxu0 %v4507_v46  ;;  %5020 = vmatpush1.bf16.msra.mxu1 %v5019_v48  ;;  %v1371_v46 = vld [vmem:[#allocation7 + $0x9c0] sm:$0xff]  ;;  %v1422_v27 = vld [vmem:[#allocation7 + $0xb58] sm:$0xff] }
 0x1d9   :  { %4510 = vmatprep.subr.bf16.mxu0 %v4509_v53  ;;  %5022 = vmatprep.subr.bf16.mxu1 %v5021_v55  ;;  %v1375_v48 = vld [vmem:[#allocation7 + $0x9e0] sm:$0xff]  ;;  %v5037_v53 = vpack.c.bf16 %v1378_v40, %v1374_v39  ;;  %v1373_v55 = vld [vmem:[#allocation7 + $0x9d0] sm:$0xff]  ;;  %v1426_v28 = vld [vmem:[#allocation7 + $0xb78] sm:$0xff] }
 0x1da   :  { %v5039_v2 = vpack.c.bf16 %v1377_v56, %v1373_v55  ;;  %v1406_v55 = vld [vmem:[#allocation7 + $0xad8] sm:$0xff]  ;;  %v1407_v61 = vld [vmem:[#allocation7 + $0xae0] sm:$0xff] }
 0x1db   :  { %v1410_v56 = vld [vmem:[#allocation7 + $0xaf8] sm:$0xff] }
 0x1dc   :  { %4512 = vmatpush1.bf16.msra.mxu0 %v4511_v62  ;;  %5024 = vmatpush1.bf16.msra.mxu1 %v5023_v63  ;;  %v450_v62 = vrot.slane %v6221_v50, %v417_v43  ;;  %v4527_v63 = vpack.c.bf16 %v1375_v48, %v1371_v46  ;;  %v1394_v43 = vld [vmem:[#allocation7 + $0xa78] sm:$0xff]  ;;  %v1401_v46 = vld [vmem:[#allocation7 + $0xab0] sm:$0xff]  ;;  %v1404_v48 = vld [vmem:[#allocation7 + $0xac8] sm:$0xff] }
 0x1dd   :  { %4514 = vmatprep.subr.bf16.mxu0 %v4513_v4  ;;  %5026 = vmatprep.subr.bf16.mxu1 %v5025_v5  ;;  %v1383_v4 = vld [vmem:[#allocation7 + $0xa20] sm:$0xff]  ;;  %v5045_v26 = vpack.c.bf16 %v1394_v43, %v1390_v14 }
 0x1de   :  { %v1411_v14 = vld [vmem:[#allocation7 + $0xb00] sm:$0xff] }
 0x1df   :  { %v1415_v43 = vld [vmem:[#allocation7 + $0xb20] sm:$0xff] }
 0x1e0   :  { %4516 = vmatpush1.bf16.msra.mxu0 %v4515_v12  ;;  %5028 = vmatpush1.bf16.msra.mxu1 %v5027_v13  ;;  %v1392_v13 = vld [vmem:[#allocation7 + $0xa68] sm:$0xff] }
 0x1e1   :  { %4518 = vmatprep.subr.bf16.mxu0 %v4517_v17  ;;  %5030 = vmatprep.subr.bf16.mxu1 %v5029_v22  ;;  %v4531_v17 = vpack.c.bf16 %v1383_v4, %v1379_v3  ;;  %v5043_v22 = vpack.c.bf16 %v1385_v20, %v1381_v8  ;;  %v4533_v25 = vpack.c.bf16 %v1392_v13, %v1388_v11  ;;  %v1405_v4 = vld [vmem:[#allocation7 + $0xad0] sm:$0xff]  ;;  %v1416_v8 = vld [vmem:[#allocation7 + $0xb28] sm:$0xff]  ;;  %v1414_v20 = vld [vmem:[#allocation7 + $0xb18] sm:$0xff] }
 0x1e2   :  { %v5053_v3 = vpack.c.bf16 %v1410_v56, %v1406_v55  ;;  %v1418_v11 = vld [vmem:[#allocation7 + $0xb38] sm:$0xff] }
 0x1e4   :  { %4520 = vmatpush1.bf16.msra.mxu0 %v4519_v29  ;;  %5032 = vmatpush1.bf16.msra.mxu1 %v5031_v32  ;;  %v1396_v29 = vld [vmem:[#allocation7 + $0xa88] sm:$0xff] }
 0x1e5   :  { %4522 = vmatprep.subr.bf16.mxu0 %v4521_v34  ;;  %5034 = vmatprep.subr.bf16.mxu1 %v5033_v35  ;;  %v1400_v32 = vld [vmem:[#allocation7 + $0xaa8] sm:$0xff]  ;;  %v421_v34 = vsub.s32 6, %v6172_v18  ;;  %v425_v35 = vsub.s32 7, %v6172_v18 }
 0x1e6   :  { %v4537_v40 = vpack.c.bf16 %v1400_v32, %v1396_v29  ;;  %v4547_v29 = vpack.c.bf16 %v1415_v43, %v1411_v14  ;;  %v5059_v32 = vpack.c.bf16 %v1417_v24, %v1413_v23  ;;  %v1444_v14 = vld [vmem:[#allocation7 + $0xc08] sm:$0xff] }
 0x1e7   :  { %v454_v39 = vrot.slane %v6221_v50, %v421_v34  ;;  %v1448_v43 = vld [vmem:[#allocation7 + $0xc28] sm:$0xff] }
 0x1e8   :  { %4524 = vmatpush1.bf16.msra.mxu0 %v4523_v42  ;;  %5036 = vmatpush1.bf16.msra.mxu1 %v5035_v44  ;;  %v967_v5 = vpop.f32.mrb[6].mxu0  ;;  %v5049_v42 = vpack.c.bf16 %v1402_v16, %v1398_v33  ;;  %v1397_v44 = vld [vmem:[#allocation7 + $0xa90] sm:$0xff]  ;;  %v1419_v33 = vld [vmem:[#allocation7 + $0xb40] sm:$0xff] }
 0x1e9   :  { %4526 = vmatprep.subr.bf16.mxu0 %v4525_v51  ;;  %5038 = vmatprep.subr.bf16.mxu1 %v5037_v53  ;;  %v6229_v1 = vadd.f32 %v967_v5, %v446_v58  ;;  %v969_v12 = vpop.f32.mrb[7].mxu0  ;;  %v458_v51 = vrot.slane %v6221_v50, %v425_v35  ;;  %v1408_v53 = vld [vmem:[#allocation7 + $0xae8] sm:$0xff]  ;;  %v4539_v58 = vpack.c.bf16 %v1399_v38, %v1395_v0  ;;  %v1409_v5 = vld [vmem:[#allocation7 + $0xaf0] sm:$0xff]  ;;  %v1423_v16 = vld [vmem:[#allocation7 + $0xb60] sm:$0xff] }
 0x1ea   :  { %v6231_v15 = vadd.f32 %v969_v12, %v450_v62  ;;  %v1038_v57 = vpop.f32.mrb[6].mxu1  ;;  %v5051_v59 = vpack.c.bf16 %v1401_v46, %v1397_v44  ;;  %v4543_v12 = vpack.c.bf16 %v1407_v61, %v1403_v60  ;;  %v5055_v13 = vpack.c.bf16 %v1409_v5, %v1405_v4  ;;  %v1421_v0 = vld [vmem:[#allocation7 + $0xb50] sm:$0xff]  ;;  %v1434_v44 = vld [vmem:[#allocation7 + $0xbb8] sm:$0xff]  ;;  %v1440_v60 = vld [vmem:[#allocation7 + $0xbe8] sm:$0xff] }
 0x1eb   :  { %v6241_v62 = vadd.f32 %v1038_v57, %v454_v39  ;;  %v1425_v38 = vld [vmem:[#allocation7 + $0xb70] sm:$0xff]  ;;  %v1428_v39 = vld [vmem:[#allocation7 + $0xb88] sm:$0xff]  ;;  %v4551_v46 = vpack.c.bf16 %v1423_v16, %v1419_v33  ;;  %v1438_v61 = vld [vmem:[#allocation7 + $0xbd8] sm:$0xff] }
 0x1ec   :  { %4528 = vmatpush1.bf16.msra.mxu0 %v4527_v63  ;;  %5040 = vmatpush1.bf16.msra.mxu1 %v5039_v2  ;;  %v1040_v63 = vpop.f32.mrb[7].mxu1  ;;  %v4541_v2 = vpack.c.bf16 %v1408_v53, %v1404_v48  ;;  %v5063_v48 = vpack.c.bf16 %v1425_v38, %v1421_v0  ;;  %v1431_v53 = vld [vmem:[#allocation7 + $0xba0] sm:$0xff]  ;;  %v1429_v57 = vld [vmem:[#allocation7 + $0xb90] sm:$0xff]  ;;  %v1452_v16 = vld [vmem:[#allocation7 + $0xc48] sm:$0xff] }
 0x1ed   :  { %4530 = vmatprep.subr.bf16.mxu0 %v4529_v6  ;;  %5042 = vmatprep.subr.bf16.mxu1 %v5041_v7  ;;  %v1412_v6 = vld [vmem:[#allocation7 + $0xb08] sm:$0xff]  ;;  %v6243_v7 = vadd.f32 %v1040_v63, %v458_v51  ;;  %v1427_v51 = vld [vmem:[#allocation7 + $0xb80] sm:$0xff]  ;;  %v1442_v63 = vld [vmem:[#allocation7 + $0xbf8] sm:$0xff] }
 0x1ee   :  { %v1435_v4 = vld [vmem:[#allocation7 + $0xbc0] sm:$0xff]  ;;  %v1449_v33 = vld [vmem:[#allocation7 + $0xc30] sm:$0xff]  ;;  %v1458_v0 = vld [vmem:[#allocation7 + $0xc78] sm:$0xff] }
 0x1ef   :  { %v1439_v5 = vld [vmem:[#allocation7 + $0xbe0] sm:$0xff] }
 0x1f0   :  { %4532 = vmatpush1.bf16.msra.mxu0 %v4531_v17  ;;  %5044 = vmatpush1.bf16.msra.mxu1 %v5043_v22  ;;  %v4545_v17 = vpack.c.bf16 %v1416_v8, %v1412_v6  ;;  %v5057_v22 = vpack.c.bf16 %v1418_v11, %v1414_v20  ;;  %v6245_v6 = vld [vmem:[#allocation5] sm:$0xff]  ;;  %v5069_v11 = vpack.c.bf16 %v1442_v63, %v1438_v61  ;;  %v1463_v61 = vld [vmem:[#allocation7 + $0xca0] sm:$0xff] }
 0x1f1   :  { %4534 = vmatprep.subr.bf16.mxu0 %v4533_v25  ;;  %5046 = vmatprep.subr.bf16.mxu1 %v5045_v26  ;;  %v1420_v25 = vld [vmem:[#allocation7 + $0xb48] sm:$0xff]  ;;  %v414_v8 = vrot.slane %v6245_v6, %v413_v41  ;;  %v426_v23 = vrot.slane %v6245_v6, %v425_v35  ;;  %v4559_v24 = vpack.c.bf16 %v1439_v5, %v1435_v4  ;;  %v1447_v41 = vld [vmem:[#allocation7 + $0xc20] sm:$0xff]  ;;  %v1465_v4 = vld [vmem:[#allocation7 + $0xcb0] sm:$0xff] }
 0x1f2   :  { %v1424_v26 = vld [vmem:[#allocation7 + $0xb68] sm:$0xff] }
 0x1f3   :  { %v757_v35 = vadd.f32 %v6199_v54, %v426_v23  ;;  %v1468_v5 = vld [vmem:[#allocation7 + $0xcc8] sm:$0xff]  ;;  %v1469_v23 = vld [vmem:[#allocation7 + $0xcd0] sm:$0xff] }
 0x1f4   :  { %4536 = vmatpush1.bf16.msra.mxu0 %v4535_v36  ;;  %5048 = vmatpush1.bf16.msra.mxu1 %v5047_v37  ;;  %v4549_v36 = vpack.c.bf16 %v1424_v26, %v1420_v25  ;;  %v5061_v37 = vpack.c.bf16 %v1426_v28, %v1422_v27  ;;  %v1443_v26 = vld [vmem:[#allocation7 + $0xc00] sm:$0xff]  ;;  %v684_v27 = vadd.f32 %v6193_v10, %v414_v8  ;;  %v1472_v8 = vld [vmem:[#allocation7 + $0xce8] sm:$0xff] }
 0x1f5   :  { %4538 = vmatprep.subr.bf16.mxu0 %v4537_v40  ;;  %5050 = vmatprep.subr.bf16.mxu1 %v5049_v42  ;;  %v1432_v40 = vld [vmem:[#allocation7 + $0xba8] sm:$0xff]  ;;  %v1430_v42 = vld [vmem:[#allocation7 + $0xb98] sm:$0xff]  ;;  %v4561_v28 = vpack.c.bf16 %v1448_v43, %v1444_v14  ;;  %v4563_v38 = vpack.c.bf16 %v1447_v41, %v1443_v26  ;;  %v1467_v14 = vld [vmem:[#allocation7 + $0xcc0] sm:$0xff] }
 0x1f6   :  { %v4553_v55 = vpack.c.bf16 %v1432_v40, %v1428_v39  ;;  %v5065_v56 = vpack.c.bf16 %v1434_v44, %v1430_v42  ;;  %v1451_v40 = vld [vmem:[#allocation7 + $0xc40] sm:$0xff]  ;;  %v1047_v44 = vmax.f32 %v684_v27, 0.0  ;;  %v1480_v26 = vld [vmem:[#allocation7 + $0xd28] sm:$0xff]  ;;  %v1478_v41 = vld [vmem:[#allocation7 + $0xd18] sm:$0xff] }
 0x1f7   :  { %v1455_v42 = vld [vmem:[#allocation7 + $0xc60] sm:$0xff]  ;;  %v1482_v27 = vld [vmem:[#allocation7 + $0xd38] sm:$0xff] }
 0x1f8   :  { %4540 = vmatpush1.bf16.msra.mxu0 %v4539_v58  ;;  %5052 = vmatpush1.bf16.msra.mxu1 %v5051_v59  ;;  %v1433_v58 = vld [vmem:[#allocation7 + $0xbb0] sm:$0xff]  ;;  %v1436_v59 = vld [vmem:[#allocation7 + $0xbc8] sm:$0xff]  ;;  %v4567_v54 = vpack.c.bf16 %v1455_v42, %v1451_v40  ;;  %v1471_v43 = vld [vmem:[#allocation7 + $0xce0] sm:$0xff] }
 0x1f9   :  { %4542 = vmatprep.subr.bf16.mxu0 %v4541_v2  ;;  %5054 = vmatprep.subr.bf16.mxu1 %v5053_v3  ;;  %v4555_v2 = vpack.c.bf16 %v1431_v53, %v1427_v51  ;;  %v5067_v3 = vpack.c.bf16 %v1433_v58, %v1429_v57  ;;  %v4557_v20 = vpack.c.bf16 %v1440_v60, %v1436_v59  ;;  %v1457_v51 = vld [vmem:[#allocation7 + $0xc70] sm:$0xff]  ;;  %v1460_v53 = vld [vmem:[#allocation7 + $0xc88] sm:$0xff]  ;;  %v1466_v57 = vld [vmem:[#allocation7 + $0xcb8] sm:$0xff]  ;;  %v1050_v58 = vmax.f32 %v757_v35, 0.0 }
 0x1fa   :  { %v1459_v60 = vld [vmem:[#allocation7 + $0xc80] sm:$0xff]  ;;  %v1484_v35 = vld [vmem:[#allocation7 + $0xd48] sm:$0xff]  ;;  %v1490_v40 = vld [vmem:[#allocation7 + $0xd78] sm:$0xff] }
 0x1fc   :  { %4544 = vmatpush1.bf16.msra.mxu0 %v4543_v12  ;;  %5056 = vmatpush1.bf16.msra.mxu1 %v5055_v13  ;;  %v1437_v12 = vld [vmem:[#allocation7 + $0xbd0] sm:$0xff] }
 0x1fd   :  { %4546 = vmatprep.subr.bf16.mxu0 %v4545_v17  ;;  %5058 = vmatprep.subr.bf16.mxu1 %v5057_v22  ;;  %v1441_v13 = vld [vmem:[#allocation7 + $0xbf0] sm:$0xff]  ;;  %v1446_v17 = vld [vmem:[#allocation7 + $0xc18] sm:$0xff] }
 0x1fe   :  { %v1450_v22 = vld [vmem:[#allocation7 + $0xc38] sm:$0xff]  ;;  %v5071_v25 = vpack.c.bf16 %v1441_v13, %v1437_v12  ;;  %v4571_v12 = vpack.c.bf16 %v1463_v61, %v1459_v60  ;;  %v1491_v61 = vld [vmem:[#allocation7 + $0xd80] sm:$0xff] }
 0x200   :  { %4548 = vmatpush1.bf16.msra.mxu0 %v4547_v29  ;;  %5060 = vmatpush1.bf16.msra.mxu1 %v5059_v32  ;;  %v5073_v29 = vpack.c.bf16 %v1450_v22, %v1446_v17  ;;  %v1445_v32 = vld [vmem:[#allocation7 + $0xc10] sm:$0xff]  ;;  %v4573_v17 = vpack.c.bf16 %v1472_v8, %v1468_v5  ;;  %v1500_v8 = vld [vmem:[#allocation7 + $0xdc8] sm:$0xff] }
 0x201   :  { %4550 = vmatprep.subr.bf16.mxu0 %v4549_v36  ;;  %5062 = vmatprep.subr.bf16.mxu1 %v5061_v37  ;;  %v1456_v36 = vld [vmem:[#allocation7 + $0xc68] sm:$0xff]  ;;  %v1454_v37 = vld [vmem:[#allocation7 + $0xc58] sm:$0xff]  ;;  %v5075_v39 = vpack.c.bf16 %v1449_v33, %v1445_v32  ;;  %v1475_v32 = vld [vmem:[#allocation7 + $0xd00] sm:$0xff] }
 0x202   :  { %v4565_v10 = vpack.c.bf16 %v1456_v36, %v1452_v16  ;;  %v1479_v33 = vld [vmem:[#allocation7 + $0xd20] sm:$0xff]  ;;  %v5089_v36 = vpack.c.bf16 %v1482_v27, %v1478_v41  ;;  %v1497_v5 = vld [vmem:[#allocation7 + $0xdb0] sm:$0xff]  ;;  %v1512_v41 = vld [vmem:[#allocation7 + $0xe28] sm:$0xff] }
 0x203   :  { %v4579_v42 = vpack.c.bf16 %v1479_v33, %v1475_v32  ;;  %v1510_v27 = vld [vmem:[#allocation7 + $0xe18] sm:$0xff]  ;;  %v1507_v33 = vld [vmem:[#allocation7 + $0xe00] sm:$0xff] }
 0x204   :  { %4552 = vmatpush1.bf16.msra.mxu0 %v4551_v46  ;;  %5064 = vmatpush1.bf16.msra.mxu1 %v5063_v48  ;;  %v5077_v46 = vpack.c.bf16 %v1458_v0, %v1454_v37  ;;  %v1453_v48 = vld [vmem:[#allocation7 + $0xc50] sm:$0xff] }
 0x205   :  { %4554 = vmatprep.subr.bf16.mxu0 %v4553_v55  ;;  %5066 = vmatprep.subr.bf16.mxu1 %v5065_v56  ;;  %v1464_v55 = vld [vmem:[#allocation7 + $0xca8] sm:$0xff]  ;;  %v1462_v56 = vld [vmem:[#allocation7 + $0xc98] sm:$0xff]  ;;  %v5079_v59 = vpack.c.bf16 %v1457_v51, %v1453_v48  ;;  %v1477_v37 = vld [vmem:[#allocation7 + $0xd10] sm:$0xff] }
 0x206   :  { %v4569_v63 = vpack.c.bf16 %v1464_v55, %v1460_v53  ;;  %v1481_v0 = vld [vmem:[#allocation7 + $0xd30] sm:$0xff] }
 0x207   :  { %v1485_v53 = vld [vmem:[#allocation7 + $0xd50] sm:$0xff] }
 0x208   :  { %4556 = vmatpush1.bf16.msra.mxu0 %v4555_v2  ;;  %5068 = vmatpush1.bf16.msra.mxu1 %v5067_v3  ;;  %v5081_v2 = vpack.c.bf16 %v1466_v57, %v1462_v56  ;;  %v1461_v3 = vld [vmem:[#allocation7 + $0xc90] sm:$0xff]  ;;  %v1492_v56 = vld [vmem:[#allocation7 + $0xd88] sm:$0xff] }
 0x209   :  { %4558 = vmatprep.subr.bf16.mxu0 %v4557_v20  ;;  %5070 = vmatprep.subr.bf16.mxu1 %v5069_v11  ;;  %v1470_v20 = vld [vmem:[#allocation7 + $0xcd8] sm:$0xff]  ;;  %v5083_v13 = vpack.c.bf16 %v1465_v4, %v1461_v3  ;;  %v1489_v55 = vld [vmem:[#allocation7 + $0xd70] sm:$0xff]  ;;  %v1496_v57 = vld [vmem:[#allocation7 + $0xda8] sm:$0xff] }
 0x20a   :  { %v1474_v11 = vld [vmem:[#allocation7 + $0xcf8] sm:$0xff]  ;;  %v5095_v60 = vpack.c.bf16 %v1489_v55, %v1485_v53  ;;  %v1493_v4 = vld [vmem:[#allocation7 + $0xd90] sm:$0xff] }
 0x20b   :  { %v5085_v22 = vpack.c.bf16 %v1474_v11, %v1470_v20  ;;  %v1504_v20 = vld [vmem:[#allocation7 + $0xde8] sm:$0xff]  ;;  %v1502_v11 = vld [vmem:[#allocation7 + $0xdd8] sm:$0xff]  ;;  %v1517_v55 = vld [vmem:[#allocation7 + $0xe50] sm:$0xff] }
 0x20c   :  { %4560 = vmatpush1.bf16.msra.mxu0 %v4559_v24  ;;  %5072 = vmatpush1.bf16.msra.mxu1 %v5071_v25  ;;  %v1473_v24 = vld [vmem:[#allocation7 + $0xcf0] sm:$0xff]  ;;  %v1476_v25 = vld [vmem:[#allocation7 + $0xd08] sm:$0xff] }
 0x20d   :  { %4562 = vmatprep.subr.bf16.mxu0 %v4561_v28  ;;  %5074 = vmatprep.subr.bf16.mxu1 %v5073_v29  ;;  %v4575_v28 = vpack.c.bf16 %v1471_v43, %v1467_v14  ;;  %v5087_v29 = vpack.c.bf16 %v1473_v24, %v1469_v23  ;;  %v4577_v16 = vpack.c.bf16 %v1480_v26, %v1476_v25  ;;  %v1499_v43 = vld [vmem:[#allocation7 + $0xdc0] sm:$0xff]  ;;  %v1501_v24 = vld [vmem:[#allocation7 + $0xdd0] sm:$0xff]  ;;  %v1508_v26 = vld [vmem:[#allocation7 + $0xe08] sm:$0xff] }
 0x20e   :  { %v5099_v14 = vpack.c.bf16 %v1497_v5, %v1493_v4  ;;  %v1505_v25 = vld [vmem:[#allocation7 + $0xdf0] sm:$0xff] }
 0x20f   :  { %2312 = vmatmul.mubr.f32.vlgmr.msra.gmra.mrb[8].mxu0 %v1047_v44  ;;  %2880 = vmatmul.mubr.f32.vlgmr.msra.gmra.mrb[8].mxu1 %v1047_v44  ;;  %v5091_v44 = vpack.c.bf16 %v1481_v0, %v1477_v37  ;;  %v5103_v32 = vpack.c.bf16 %v1505_v25, %v1501_v24  ;;  %v1509_v0 = vld [vmem:[#allocation7 + $0xe10] sm:$0xff] }
 0x210   :  { %4564 = vmatpush1.bf16.msra.mxu0 %v4563_v38  ;;  %5076 = vmatpush1.bf16.msra.mxu1 %v5075_v39  ;;  %v1488_v38 = vld [vmem:[#allocation7 + $0xd68] sm:$0xff]  ;;  %v1486_v39 = vld [vmem:[#allocation7 + $0xd58] sm:$0xff]  ;;  %v1525_v5 = vld [vmem:[#allocation7 + $0xe90] sm:$0xff] }
 0x211   :  { %4566 = vmatprep.subr.bf16.mxu0 %v4565_v10  ;;  %5078 = vmatprep.subr.bf16.mxu1 %v5077_v46  ;;  %v1483_v10 = vld [vmem:[#allocation7 + $0xd40] sm:$0xff]  ;;  %v4581_v48 = vpack.c.bf16 %v1488_v38, %v1484_v35  ;;  %v5093_v51 = vpack.c.bf16 %v1490_v40, %v1486_v39  ;;  %v1513_v35 = vld [vmem:[#allocation7 + $0xe30] sm:$0xff]  ;;  %v1516_v38 = vld [vmem:[#allocation7 + $0xe48] sm:$0xff] }
 0x212   :  { %2382 = vmatprep.mubr.f32.mxu0 %v1050_v58  ;;  %2950 = vmatprep.mubr.f32.mxu1 %v1050_v58  ;;  %v1487_v46 = vld [vmem:[#allocation7 + $0xd60] sm:$0xff]  ;;  %v1494_v58 = vld [vmem:[#allocation7 + $0xd98] sm:$0xff]  ;;  %v1520_v39 = vld [vmem:[#allocation7 + $0xe68] sm:$0xff] }
 0x213   :  { %v1518_v40 = vld [vmem:[#allocation7 + $0xe58] sm:$0xff]  ;;  %v1533_v25 = vld [vmem:[#allocation7 + $0xed0] sm:$0xff] }
 0x214   :  { %4568 = vmatpush1.bf16.msra.mxu0 %v4567_v54  ;;  %5080 = vmatpush1.bf16.msra.mxu1 %v5079_v59  ;;  %v1498_v54 = vld [vmem:[#allocation7 + $0xdb8] sm:$0xff]  ;;  %v4583_v59 = vpack.c.bf16 %v1487_v46, %v1483_v10  ;;  %v5107_v10 = vpack.c.bf16 %v1513_v35, %v1509_v0  ;;  %v1515_v46 = vld [vmem:[#allocation7 + $0xe40] sm:$0xff]  ;;  %v1541_v35 = vld [vmem:[#allocation7 + $0xf10] sm:$0xff] }
 0x215   :  { %4570 = vmatprep.subr.bf16.mxu0 %v4569_v63  ;;  %5082 = vmatprep.subr.bf16.mxu1 %v5081_v2  ;;  %v1495_v63 = vld [vmem:[#allocation7 + $0xda0] sm:$0xff]  ;;  %v4585_v2 = vpack.c.bf16 %v1496_v57, %v1492_v56  ;;  %v5097_v3 = vpack.c.bf16 %v1498_v54, %v1494_v58  ;;  %v1521_v56 = vld [vmem:[#allocation7 + $0xe70] sm:$0xff]  ;;  %v1524_v57 = vld [vmem:[#allocation7 + $0xe88] sm:$0xff] }
 0x216   :  { %v1528_v58 = vld [vmem:[#allocation7 + $0xea8] sm:$0xff]  ;;  %v1526_v54 = vld [vmem:[#allocation7 + $0xe98] sm:$0xff] }
 0x218   :  { %4572 = vmatpush1.bf16.msra.mxu0 %v4571_v12  ;;  %5084 = vmatpush1.bf16.msra.mxu1 %v5083_v13  ;;  %v1506_v12 = vld [vmem:[#allocation7 + $0xdf8] sm:$0xff]  ;;  %v4587_v13 = vpack.c.bf16 %v1495_v63, %v1491_v61  ;;  %v5111_v61 = vpack.c.bf16 %v1521_v56, %v1517_v55  ;;  %v1523_v63 = vld [vmem:[#allocation7 + $0xe80] sm:$0xff]  ;;  %v1549_v56 = vld [vmem:[#allocation7 + $0xf50] sm:$0xff] }
 0x219   :  { %4574 = vmatprep.subr.bf16.mxu0 %v4573_v17  ;;  %5086 = vmatprep.subr.bf16.mxu1 %v5085_v22  ;;  %v1503_v17 = vld [vmem:[#allocation7 + $0xde0] sm:$0xff]  ;;  %v4589_v22 = vpack.c.bf16 %v1504_v20, %v1500_v8  ;;  %v5101_v23 = vpack.c.bf16 %v1506_v12, %v1502_v11  ;;  %v1529_v8 = vld [vmem:[#allocation7 + $0xeb0] sm:$0xff]  ;;  %v1532_v20 = vld [vmem:[#allocation7 + $0xec8] sm:$0xff] }
 0x21a   :  { %v1536_v11 = vld [vmem:[#allocation7 + $0xee8] sm:$0xff]  ;;  %v1534_v12 = vld [vmem:[#allocation7 + $0xed8] sm:$0xff] }
 0x21c   :  { %4576 = vmatpush1.bf16.msra.mxu0 %v4575_v28  ;;  %5088 = vmatpush1.bf16.msra.mxu1 %v5087_v29  ;;  %v1514_v28 = vld [vmem:[#allocation7 + $0xe38] sm:$0xff]  ;;  %v4591_v29 = vpack.c.bf16 %v1503_v17, %v1499_v43  ;;  %v5115_v43 = vpack.c.bf16 %v1529_v8, %v1525_v5  ;;  %v1531_v17 = vld [vmem:[#allocation7 + $0xec0] sm:$0xff]  ;;  %v1557_v8 = vld [vmem:[#allocation7 + $0xf90] sm:$0xff] }
 0x21d   :  { %4578 = vmatprep.subr.bf16.mxu0 %v4577_v16  ;;  %5090 = vmatprep.subr.bf16.mxu1 %v5089_v36  ;;  %v1511_v16 = vld [vmem:[#allocation7 + $0xe20] sm:$0xff]  ;;  %v4593_v36 = vpack.c.bf16 %v1512_v41, %v1508_v26  ;;  %v5105_v37 = vpack.c.bf16 %v1514_v28, %v1510_v27  ;;  %v1537_v26 = vld [vmem:[#allocation7 + $0xef0] sm:$0xff]  ;;  %v1540_v41 = vld [vmem:[#allocation7 + $0xf08] sm:$0xff] }
 0x21e   :  { %v1544_v27 = vld [vmem:[#allocation7 + $0xf28] sm:$0xff]  ;;  %v1542_v28 = vld [vmem:[#allocation7 + $0xf18] sm:$0xff] }
 0x220   :  { %4580 = vmatpush1.bf16.msra.mxu0 %v4579_v42  ;;  %5092 = vmatpush1.bf16.msra.mxu1 %v5091_v44  ;;  %v1522_v42 = vld [vmem:[#allocation7 + $0xe78] sm:$0xff]  ;;  %v4595_v44 = vpack.c.bf16 %v1511_v16, %v1507_v33  ;;  %v5119_v33 = vpack.c.bf16 %v1537_v26, %v1533_v25  ;;  %v1539_v16 = vld [vmem:[#allocation7 + $0xf00] sm:$0xff] }
 0x221   :  { %4582 = vmatprep.subr.bf16.mxu0 %v4581_v48  ;;  %5094 = vmatprep.subr.bf16.mxu1 %v5093_v51  ;;  %v1519_v48 = vld [vmem:[#allocation7 + $0xe60] sm:$0xff]  ;;  %v4597_v51 = vpack.c.bf16 %v1520_v39, %v1516_v38  ;;  %v5109_v53 = vpack.c.bf16 %v1522_v42, %v1518_v40  ;;  %v1545_v38 = vld [vmem:[#allocation7 + $0xf30] sm:$0xff]  ;;  %v1548_v39 = vld [vmem:[#allocation7 + $0xf48] sm:$0xff] }
 0x222   :  { %v1552_v40 = vld [vmem:[#allocation7 + $0xf68] sm:$0xff]  ;;  %v1550_v42 = vld [vmem:[#allocation7 + $0xf58] sm:$0xff] }
 0x224   :  { %4584 = vmatpush1.bf16.msra.mxu0 %v4583_v59  ;;  %5096 = vmatpush1.bf16.msra.mxu1 %v5095_v60  ;;  %v1530_v59 = vld [vmem:[#allocation7 + $0xeb8] sm:$0xff]  ;;  %v4599_v60 = vpack.c.bf16 %v1519_v48, %v1515_v46  ;;  %v5123_v46 = vpack.c.bf16 %v1545_v38, %v1541_v35  ;;  %v1547_v48 = vld [vmem:[#allocation7 + $0xf40] sm:$0xff] }
 0x225   :  { %4586 = vmatprep.subr.bf16.mxu0 %v4585_v2  ;;  %5098 = vmatprep.subr.bf16.mxu1 %v5097_v3  ;;  %v1527_v2 = vld [vmem:[#allocation7 + $0xea0] sm:$0xff]  ;;  %v4601_v3 = vpack.c.bf16 %v1528_v58, %v1524_v57  ;;  %v5113_v4 = vpack.c.bf16 %v1530_v59, %v1526_v54  ;;  %v1553_v57 = vld [vmem:[#allocation7 + $0xf70] sm:$0xff]  ;;  %v1556_v58 = vld [vmem:[#allocation7 + $0xf88] sm:$0xff] }
 0x226   :  { %v1560_v54 = vld [vmem:[#allocation7 + $0xfa8] sm:$0xff]  ;;  %v1558_v59 = vld [vmem:[#allocation7 + $0xf98] sm:$0xff]  ;;  %v1575_v35 = vld [vmem:[#allocation7 + $0x1020] sm:$0xff] }
 0x228   :  { %4588 = vmatpush1.bf16.msra.mxu0 %v4587_v13  ;;  %5100 = vmatpush1.bf16.msra.mxu1 %v5099_v14  ;;  %v1538_v13 = vld [vmem:[#allocation7 + $0xef8] sm:$0xff]  ;;  %v4603_v14 = vpack.c.bf16 %v1527_v2, %v1523_v63  ;;  %v5127_v63 = vpack.c.bf16 %v1553_v57, %v1549_v56  ;;  %v1555_v2 = vld [vmem:[#allocation7 + $0xf80] sm:$0xff] }
 0x229   :  { %4590 = vmatprep.subr.bf16.mxu0 %v4589_v22  ;;  %5102 = vmatprep.subr.bf16.mxu1 %v5101_v23  ;;  %v1535_v22 = vld [vmem:[#allocation7 + $0xee0] sm:$0xff]  ;;  %v4605_v23 = vpack.c.bf16 %v1536_v11, %v1532_v20  ;;  %v5117_v24 = vpack.c.bf16 %v1538_v13, %v1534_v12  ;;  %v1561_v20 = vld [vmem:[#allocation7 + $0xfb0] sm:$0xff]  ;;  %v1564_v11 = vld [vmem:[#allocation7 + $0xfc8] sm:$0xff] }
 0x22a   :  { %v1568_v12 = vld [vmem:[#allocation7 + $0xfe8] sm:$0xff]  ;;  %v1566_v13 = vld [vmem:[#allocation7 + $0xfd8] sm:$0xff] }
 0x22b   :  { %v4621_v25 = vpack.c.bf16 %v1568_v12, %v1564_v11  ;;  %v1593_v11 = vld [vmem:[#allocation7 + $0x10b0] sm:$0xff]  ;;  %v1596_v12 = vld [vmem:[#allocation7 + $0x10c8] sm:$0xff] }
 0x22c   :  { %4592 = vmatpush1.bf16.msra.mxu0 %v4591_v29  ;;  %5104 = vmatpush1.bf16.msra.mxu1 %v5103_v32  ;;  %v1546_v29 = vld [vmem:[#allocation7 + $0xf38] sm:$0xff]  ;;  %v4607_v32 = vpack.c.bf16 %v1535_v22, %v1531_v17  ;;  %v5131_v17 = vpack.c.bf16 %v1561_v20, %v1557_v8  ;;  %v1563_v22 = vld [vmem:[#allocation7 + $0xfc0] sm:$0xff]  ;;  %v1589_v8 = vld [vmem:[#allocation7 + $0x1090] sm:$0xff] }
 0x22d   :  { %4594 = vmatprep.subr.bf16.mxu0 %v4593_v36  ;;  %5106 = vmatprep.subr.bf16.mxu1 %v5105_v37  ;;  %v1543_v36 = vld [vmem:[#allocation7 + $0xf20] sm:$0xff]  ;;  %v4609_v37 = vpack.c.bf16 %v1544_v27, %v1540_v41  ;;  %v5121_v0 = vpack.c.bf16 %v1546_v29, %v1542_v28  ;;  %v1565_v41 = vld [vmem:[#allocation7 + $0xfd0] sm:$0xff]  ;;  %v1572_v28 = vld [vmem:[#allocation7 + $0x1008] sm:$0xff]  ;;  %v434_v29 = vrot.slane %v6221_v50, %v6180_v21 }
 0x22e   :  { %v1569_v27 = vld [vmem:[#allocation7 + $0xff0] sm:$0xff]  ;;  %v1580_v50 = vld [vmem:[#allocation7 + $0x1048] sm:$0xff] }
 0x22f   :  { %v828_v38 = vadd.f32 %v6213_v9, %v434_v29  ;;  %v1585_v9 = vld [vmem:[#allocation7 + $0x1070] sm:$0xff]  ;;  %v1608_v29 = vld [vmem:[#allocation7 + $0x1128] sm:$0xff] }
 0x230   :  { %4596 = vmatpush1.bf16.msra.mxu0 %v4595_v44  ;;  %5108 = vmatpush1.bf16.msra.mxu1 %v5107_v10  ;;  %v1554_v44 = vld [vmem:[#allocation7 + $0xf78] sm:$0xff]  ;;  %v4611_v10 = vpack.c.bf16 %v1543_v36, %v1539_v16 }
 0x231   :  { %4598 = vmatprep.subr.bf16.mxu0 %v4597_v51  ;;  %5110 = vmatprep.subr.bf16.mxu1 %v5109_v53  ;;  %v1551_v51 = vld [vmem:[#allocation7 + $0xf60] sm:$0xff]  ;;  %v4613_v53 = vpack.c.bf16 %v1552_v40, %v1548_v39  ;;  %v5125_v55 = vpack.c.bf16 %v1554_v44, %v1550_v42  ;;  %v1578_v16 = vld [vmem:[#allocation7 + $0x1038] sm:$0xff]  ;;  %v1573_v39 = vld [vmem:[#allocation7 + $0x1010] sm:$0xff]  ;;  %v1052_v56 = vmax.f32 %v828_v38, 0.0 }
 0x232   :  { %v1577_v40 = vld [vmem:[#allocation7 + $0x1030] sm:$0xff]  ;;  %v1584_v42 = vld [vmem:[#allocation7 + $0x1068] sm:$0xff]  ;;  %v1582_v44 = vld [vmem:[#allocation7 + $0x1058] sm:$0xff] }
 0x233   :  { %v4629_v57 = vpack.c.bf16 %v1584_v42, %v1580_v50  ;;  %v1612_v38 = vld [vmem:[#allocation7 + $0x1148] sm:$0xff]  ;;  %v1618_v50 = vld [vmem:[#allocation7 + $0x1178] sm:$0xff] }
 0x234   :  { %4600 = vmatpush1.bf16.msra.mxu0 %v4599_v60  ;;  %5112 = vmatpush1.bf16.msra.mxu1 %v5111_v61  ;;  %v1562_v60 = vld [vmem:[#allocation7 + $0xfb8] sm:$0xff]  ;;  %v4615_v61 = vpack.c.bf16 %v1551_v51, %v1547_v48  ;;  %v1579_v51 = vld [vmem:[#allocation7 + $0x1040] sm:$0xff] }
 0x235   :  { %4602 = vmatprep.subr.bf16.mxu0 %v4601_v3  ;;  %5114 = vmatprep.subr.bf16.mxu1 %v5113_v4  ;;  %v1559_v3 = vld [vmem:[#allocation7 + $0xfa0] sm:$0xff]  ;;  %v4617_v4 = vpack.c.bf16 %v1560_v54, %v1556_v58  ;;  %v5129_v5 = vpack.c.bf16 %v1562_v60, %v1558_v59  ;;  %v1588_v54 = vld [vmem:[#allocation7 + $0x1088] sm:$0xff]  ;;  %v1590_v60 = vld [vmem:[#allocation7 + $0x1098] sm:$0xff] }
 0x236   :  { %v1592_v59 = vld [vmem:[#allocation7 + $0x10a8] sm:$0xff] }
 0x238   :  { %4604 = vmatpush1.bf16.msra.mxu0 %v4603_v14  ;;  %5116 = vmatpush1.bf16.msra.mxu1 %v5115_v43  ;;  %v1570_v14 = vld [vmem:[#allocation7 + $0xff8] sm:$0xff]  ;;  %v4619_v43 = vpack.c.bf16 %v1559_v3, %v1555_v2  ;;  %v4633_v3 = vpack.c.bf16 %v1592_v59, %v1588_v54 }
 0x239   :  { %4606 = vmatprep.subr.bf16.mxu0 %v4605_v23  ;;  %5118 = vmatprep.subr.bf16.mxu1 %v5117_v24  ;;  %v1567_v23 = vld [vmem:[#allocation7 + $0xfe0] sm:$0xff]  ;;  %v422_v24 = vrot.slane %v6245_v6, %v421_v34  ;;  %v5133_v26 = vpack.c.bf16 %v1570_v14, %v1566_v13  ;;  %v1600_v13 = vld [vmem:[#allocation7 + $0x10e8] sm:$0xff]  ;;  %v1598_v14 = vld [vmem:[#allocation7 + $0x10d8] sm:$0xff] }
 0x23a   :  { %v4623_v36 = vpack.c.bf16 %v1567_v23, %v1563_v22  ;;  %v5147_v22 = vpack.c.bf16 %v1593_v11, %v1589_v8  ;;  %v4637_v23 = vpack.c.bf16 %v1600_v13, %v1596_v12  ;;  %v1630_v8 = vld [vmem:[#allocation7 + $0x11d8] sm:$0xff] }
 0x23b   :  { %v755_v18 = vadd.f32 %v6197_v49, %v422_v24  ;;  %v5139_v49 = vpack.c.bf16 %v1577_v40, %v1573_v39  ;;  %v1595_v24 = vld [vmem:[#allocation7 + $0x10c0] sm:$0xff]  ;;  %v1616_v39 = vld [vmem:[#allocation7 + $0x1168] sm:$0xff]  ;;  %v1614_v40 = vld [vmem:[#allocation7 + $0x1158] sm:$0xff] }
 0x23c   :  { %4608 = vmatpush1.bf16.msra.mxu0 %v4607_v32  ;;  %5120 = vmatpush1.bf16.msra.mxu1 %v5119_v33  ;;  %v1576_v32 = vld [vmem:[#allocation7 + $0x1028] sm:$0xff]  ;;  %v1574_v33 = vld [vmem:[#allocation7 + $0x1018] sm:$0xff] }
 0x23d   :  { %4610 = vmatprep.subr.bf16.mxu0 %v4609_v37  ;;  %5122 = vmatprep.subr.bf16.mxu1 %v5121_v0  ;;  %v5135_v37 = vpack.c.bf16 %v1569_v27, %v1565_v41  ;;  %v4625_v34 = vpack.c.bf16 %v1576_v32, %v1572_v28  ;;  %v5137_v6 = vpack.c.bf16 %v1578_v16, %v1574_v33  ;;  %v1571_v0 = vld [vmem:[#allocation7 + $0x1000] sm:$0xff]  ;;  %v1049_v48 = vmax.f32 %v755_v18, 0.0  ;;  %v1601_v27 = vld [vmem:[#allocation7 + $0x10f0] sm:$0xff]  ;;  %v1604_v28 = vld [vmem:[#allocation7 + $0x1108] sm:$0xff] }
 0x23e   :  { %v1606_v32 = vld [vmem:[#allocation7 + $0x1118] sm:$0xff]  ;;  %v1603_v18 = vld [vmem:[#allocation7 + $0x1100] sm:$0xff] }
 0x23f   :  { %v1610_v33 = vld [vmem:[#allocation7 + $0x1138] sm:$0xff] }
 0x240   :  { %4612 = vmatpush1.bf16.msra.mxu0 %v4611_v10  ;;  %5124 = vmatpush1.bf16.msra.mxu1 %v5123_v46  ;;  %v1586_v10 = vld [vmem:[#allocation7 + $0x1078] sm:$0xff]  ;;  %v4627_v46 = vpack.c.bf16 %v1575_v35, %v1571_v0  ;;  %v5153_v0 = vpack.c.bf16 %v1610_v33, %v1606_v32  ;;  %v1609_v35 = vld [vmem:[#allocation7 + $0x1130] sm:$0xff]  ;;  %v1635_v32 = vld [vmem:[#allocation7 + $0x1200] sm:$0xff] }
 0x241   :  { %4614 = vmatprep.subr.bf16.mxu0 %v4613_v53  ;;  %5126 = vmatprep.subr.bf16.mxu1 %v5125_v55  ;;  %v1583_v53 = vld [vmem:[#allocation7 + $0x1060] sm:$0xff]  ;;  %v1581_v55 = vld [vmem:[#allocation7 + $0x1050] sm:$0xff]  ;;  %v5141_v58 = vpack.c.bf16 %v1586_v10, %v1582_v44  ;;  %v4645_v10 = vpack.c.bf16 %v1616_v39, %v1612_v38 }
 0x242   :  { %v5143_v2 = vpack.c.bf16 %v1585_v9, %v1581_v55  ;;  %v1620_v55 = vld [vmem:[#allocation7 + $0x1188] sm:$0xff]  ;;  %v1639_v33 = vld [vmem:[#allocation7 + $0x1220] sm:$0xff] }
 0x244   :  { %4616 = vmatpush1.bf16.msra.mxu0 %v4615_v61  ;;  %5128 = vmatpush1.bf16.msra.mxu1 %v5127_v63  ;;  %v1594_v61 = vld [vmem:[#allocation7 + $0x10b8] sm:$0xff]  ;;  %v4631_v63 = vpack.c.bf16 %v1583_v53, %v1579_v51  ;;  %v5157_v51 = vpack.c.bf16 %v1618_v50, %v1614_v40  ;;  %v1617_v53 = vld [vmem:[#allocation7 + $0x1170] sm:$0xff]  ;;  %v1643_v40 = vld [vmem:[#allocation7 + $0x1240] sm:$0xff] }
 0x245   :  { %4618 = vmatprep.subr.bf16.mxu0 %v4617_v4  ;;  %5130 = vmatprep.subr.bf16.mxu1 %v5129_v5  ;;  %v1587_v4 = vld [vmem:[#allocation7 + $0x1080] sm:$0xff]  ;;  %v5145_v20 = vpack.c.bf16 %v1594_v61, %v1590_v60 }
 0x246   :  { %v1591_v5 = vld [vmem:[#allocation7 + $0x10a0] sm:$0xff] }
 0x247   :  { %v1619_v60 = vld [vmem:[#allocation7 + $0x1180] sm:$0xff] }
 0x248   :  { %4620 = vmatpush1.bf16.msra.mxu0 %v4619_v43  ;;  %5132 = vmatpush1.bf16.msra.mxu1 %v5131_v17  ;;  %v1602_v43 = vld [vmem:[#allocation7 + $0x10f8] sm:$0xff]  ;;  %v4635_v17 = vpack.c.bf16 %v1591_v5, %v1587_v4  ;;  %v1623_v61 = vld [vmem:[#allocation7 + $0x11a0] sm:$0xff]  ;;  %v1628_v4 = vld [vmem:[#allocation7 + $0x11c8] sm:$0xff] }
 0x249   :  { %4622 = vmatprep.subr.bf16.mxu0 %v4621_v25  ;;  %5134 = vmatprep.subr.bf16.mxu1 %v5133_v26  ;;  %v1599_v25 = vld [vmem:[#allocation7 + $0x10e0] sm:$0xff]  ;;  %v1597_v26 = vld [vmem:[#allocation7 + $0x10d0] sm:$0xff]  ;;  %v5149_v41 = vpack.c.bf16 %v1602_v43, %v1598_v14  ;;  %v1632_v5 = vld [vmem:[#allocation7 + $0x11e8] sm:$0xff]  ;;  %v4651_v11 = vpack.c.bf16 %v1623_v61, %v1619_v60 }
 0x24a   :  { %v4639_v16 = vpack.c.bf16 %v1599_v25, %v1595_v24  ;;  %v4653_v13 = vpack.c.bf16 %v1632_v5, %v1628_v4  ;;  %v1627_v14 = vld [vmem:[#allocation7 + $0x11c0] sm:$0xff]  ;;  %v1636_v24 = vld [vmem:[#allocation7 + $0x1208] sm:$0xff] }
 0x24b   :  { %v1631_v43 = vld [vmem:[#allocation7 + $0x11e0] sm:$0xff]  ;;  %v1640_v25 = vld [vmem:[#allocation7 + $0x1228] sm:$0xff] }
 0x24c   :  { %4624 = vmatpush1.bf16.msra.mxu0 %v4623_v36  ;;  %5136 = vmatpush1.bf16.msra.mxu1 %v5135_v37  ;;  %v5151_v36 = vpack.c.bf16 %v1601_v27, %v1597_v26  ;;  %v4641_v37 = vpack.c.bf16 %v1608_v29, %v1604_v28  ;;  %v1638_v26 = vld [vmem:[#allocation7 + $0x1218] sm:$0xff]  ;;  %v4655_v27 = vpack.c.bf16 %v1631_v43, %v1627_v14  ;;  %v1647_v50 = vld [vmem:[#allocation7 + $0x1260] sm:$0xff]  ;;  %v1660_v60 = vld [vmem:[#allocation7 + $0x12c8] sm:$0xff] }
 0x24d   :  { %4626 = vmatprep.subr.bf16.mxu0 %v4625_v34  ;;  %5138 = vmatprep.subr.bf16.mxu1 %v5137_v6  ;;  %v1607_v34 = vld [vmem:[#allocation7 + $0x1120] sm:$0xff]  ;;  %v1605_v6 = vld [vmem:[#allocation7 + $0x1110] sm:$0xff]  ;;  %v4657_v29 = vpack.c.bf16 %v1640_v25, %v1636_v24  ;;  %v1664_v61 = vld [vmem:[#allocation7 + $0x12e8] sm:$0xff] }
 0x24e   :  { %v4643_v42 = vpack.c.bf16 %v1607_v34, %v1603_v18  ;;  %v5155_v44 = vpack.c.bf16 %v1609_v35, %v1605_v6  ;;  %v1644_v18 = vld [vmem:[#allocation7 + $0x1248] sm:$0xff]  ;;  %v1646_v6 = vld [vmem:[#allocation7 + $0x1258] sm:$0xff]  ;;  %v4659_v35 = vpack.c.bf16 %v1639_v33, %v1635_v32  ;;  %v4669_v5 = vpack.c.bf16 %v1664_v61, %v1660_v60 }
 0x24f   :  { %2383 = vmatmul.mubr.f32.vlgmr.msra.gmra.mrb[8].mxu0 %v1049_v48  ;;  %2951 = vmatmul.mubr.f32.vlgmr.msra.gmra.mrb[8].mxu1 %v1049_v48  ;;  %v1615_v48 = vld [vmem:[#allocation7 + $0x1160] sm:$0xff]  ;;  %v1648_v34 = vld [vmem:[#allocation7 + $0x1268] sm:$0xff]  ;;  %v6262_v60 = vld [vmem:[#allocation5 + $0x8] sm:$0xff] }
 0x250   :  { %4628 = vmatpush1.bf16.msra.mxu0 %v4627_v46  ;;  %2453 = vmatprep.mubr.f32.mxu0 %v1052_v56  ;;  %v1611_v46 = vld [vmem:[#allocation7 + $0x1140] sm:$0xff]  ;;  %v4661_v39 = vpack.c.bf16 %v1648_v34, %v1644_v18  ;;  %v1668_v14 = vld [vmem:[#allocation7 + $0x1308] sm:$0xff]  ;;  %v430_v61 = vrot.slane %v6262_v60, %v6175_v19 }
 0x251   :  { %5140 = vmatpush1.bf16.msra.mxu1 %v5139_v49  ;;  %3021 = vmatprep.mubr.f32.mxu1 %v1052_v56  ;;  %v1613_v49 = vld [vmem:[#allocation7 + $0x1150] sm:$0xff]  ;;  %v1624_v56 = vld [vmem:[#allocation7 + $0x11a8] sm:$0xff]  ;;  %v4647_v9 = vpack.c.bf16 %v1615_v48, %v1611_v46 }
 0x252   :  { %4630 = vmatprep.subr.bf16.mxu0 %v4629_v57  ;;  %5142 = vmatprep.subr.bf16.mxu1 %v5141_v58  ;;  %v1622_v57 = vld [vmem:[#allocation7 + $0x1198] sm:$0xff]  ;;  %v5159_v54 = vpack.c.bf16 %v1617_v53, %v1613_v49  ;;  %v4649_v59 = vpack.c.bf16 %v1624_v56, %v1620_v55  ;;  %v1652_v46 = vld [vmem:[#allocation7 + $0x1288] sm:$0xff]  ;;  %v4663_v53 = vpack.c.bf16 %v1647_v50, %v1643_v40 }
 0x253   :  { %v1626_v58 = vld [vmem:[#allocation7 + $0x11b8] sm:$0xff]  ;;  %v1656_v48 = vld [vmem:[#allocation7 + $0x12a8] sm:$0xff] }
 0x254   :  { %4632 = vmatpush1.bf16.msra.mxu0 %v4631_v63  ;;  %v1621_v63 = vld [vmem:[#allocation7 + $0x1190] sm:$0xff]  ;;  %v1654_v49 = vld [vmem:[#allocation7 + $0x1298] sm:$0xff]  ;;  %v4665_v56 = vpack.c.bf16 %v1656_v48, %v1652_v46  ;;  %v1672_v43 = vld [vmem:[#allocation7 + $0x1328] sm:$0xff] }
 0x255   :  { %5144 = vmatpush1.bf16.msra.mxu1 %v5143_v2  ;;  %4634 = vmatprep.subr.bf16.mxu0 %v4633_v3  ;;  %v5161_v2 = vpack.c.bf16 %v1626_v58, %v1622_v57  ;;  %v1625_v3 = vld [vmem:[#allocation7 + $0x11b0] sm:$0xff]  ;;  %v1651_v57 = vld [vmem:[#allocation7 + $0x1280] sm:$0xff]  ;;  %v4673_v25 = vpack.c.bf16 %v1672_v43, %v1668_v14  ;;  %v1676_v32 = vld [vmem:[#allocation7 + $0x1348] sm:$0xff] }
 0x256   :  { %5146 = vmatprep.subr.bf16.mxu1 %v5145_v20  ;;  %v1634_v20 = vld [vmem:[#allocation7 + $0x11f8] sm:$0xff]  ;;  %v5163_v12 = vpack.c.bf16 %v1625_v3, %v1621_v63  ;;  %v1655_v58 = vld [vmem:[#allocation7 + $0x12a0] sm:$0xff]  ;;  %v1680_v33 = vld [vmem:[#allocation7 + $0x1368] sm:$0xff] }
 0x257   :  { %v1662_v63 = vld [vmem:[#allocation7 + $0x12d8] sm:$0xff]  ;;  %v4667_v3 = vpack.c.bf16 %v1655_v58, %v1651_v57  ;;  %v4677_v34 = vpack.c.bf16 %v1680_v33, %v1676_v32  ;;  %v1684_v40 = vld [vmem:[#allocation7 + $0x1388] sm:$0xff] }
 0x258   :  { %4636 = vmatpush1.bf16.msra.mxu0 %v4635_v17  ;;  %v1629_v17 = vld [vmem:[#allocation7 + $0x11d0] sm:$0xff]  ;;  %v1688_v50 = vld [vmem:[#allocation7 + $0x13a8] sm:$0xff]  ;;  %v1702_v14 = vld [vmem:[#allocation7 + $0x1418] sm:$0xff] }
 0x259   :  { %5148 = vmatpush1.bf16.msra.mxu1 %v5147_v22  ;;  %4638 = vmatprep.subr.bf16.mxu0 %v4637_v23  ;;  %v5165_v22 = vpack.c.bf16 %v1634_v20, %v1630_v8  ;;  %v1633_v23 = vld [vmem:[#allocation7 + $0x11f0] sm:$0xff]  ;;  %v1659_v8 = vld [vmem:[#allocation7 + $0x12c0] sm:$0xff]  ;;  %v4681_v48 = vpack.c.bf16 %v1688_v50, %v1684_v40  ;;  %v1692_v57 = vld [vmem:[#allocation7 + $0x13c8] sm:$0xff] }
 0x25a   :  { %5150 = vmatprep.subr.bf16.mxu1 %v5149_v41  ;;  %v1642_v41 = vld [vmem:[#allocation7 + $0x1238] sm:$0xff]  ;;  %v5167_v28 = vpack.c.bf16 %v1633_v23, %v1629_v17  ;;  %v1663_v20 = vld [vmem:[#allocation7 + $0x12e0] sm:$0xff]  ;;  %v1696_v58 = vld [vmem:[#allocation7 + $0x13e8] sm:$0xff] }
 0x25b   :  { %v1670_v17 = vld [vmem:[#allocation7 + $0x1318] sm:$0xff]  ;;  %v4671_v23 = vpack.c.bf16 %v1663_v20, %v1659_v8  ;;  %v1697_v20 = vld [vmem:[#allocation7 + $0x13f0] sm:$0xff]  ;;  %v1708_v32 = vld [vmem:[#allocation7 + $0x1448] sm:$0xff] }
 0x25c   :  { %4640 = vmatpush1.bf16.msra.mxu0 %v4639_v16  ;;  %v1637_v16 = vld [vmem:[#allocation7 + $0x1210] sm:$0xff]  ;;  %v1706_v43 = vld [vmem:[#allocation7 + $0x1438] sm:$0xff]  ;;  %v1712_v33 = vld [vmem:[#allocation7 + $0x1468] sm:$0xff] }
 0x25d   :  { %5152 = vmatpush1.bf16.msra.mxu1 %v5151_v36  ;;  %4642 = vmatprep.subr.bf16.mxu0 %v4641_v37  ;;  %v5169_v36 = vpack.c.bf16 %v1642_v41, %v1638_v26  ;;  %v1641_v37 = vld [vmem:[#allocation7 + $0x1230] sm:$0xff]  ;;  %v1667_v26 = vld [vmem:[#allocation7 + $0x1300] sm:$0xff]  ;;  %v1720_v40 = vld [vmem:[#allocation7 + $0x14a8] sm:$0xff] }
 0x25e   :  { %5154 = vmatprep.subr.bf16.mxu1 %v5153_v0  ;;  %v1650_v0 = vld [vmem:[#allocation7 + $0x1278] sm:$0xff]  ;;  %v5171_v38 = vpack.c.bf16 %v1641_v37, %v1637_v16  ;;  %v1671_v41 = vld [vmem:[#allocation7 + $0x1320] sm:$0xff] }
 0x25f   :  { %v1678_v16 = vld [vmem:[#allocation7 + $0x1358] sm:$0xff]  ;;  %v4675_v37 = vpack.c.bf16 %v1671_v41, %v1667_v26  ;;  %v1703_v26 = vld [vmem:[#allocation7 + $0x1420] sm:$0xff]  ;;  %v5201_v41 = vpack.c.bf16 %v1706_v43, %v1702_v14 }
 0x260   :  { %4644 = vmatpush1.bf16.msra.mxu0 %v4643_v42  ;;  %v1645_v42 = vld [vmem:[#allocation7 + $0x1250] sm:$0xff] }
 0x261   :  { %5156 = vmatpush1.bf16.msra.mxu1 %v5155_v44  ;;  %4646 = vmatprep.subr.bf16.mxu0 %v4645_v10  ;;  %v5173_v44 = vpack.c.bf16 %v1650_v0, %v1646_v6  ;;  %v1649_v10 = vld [vmem:[#allocation7 + $0x1270] sm:$0xff]  ;;  %v1675_v6 = vld [vmem:[#allocation7 + $0x1340] sm:$0xff] }
 0x262   :  { %5158 = vmatprep.subr.bf16.mxu1 %v5157_v51  ;;  %v1658_v51 = vld [vmem:[#allocation7 + $0x12b8] sm:$0xff]  ;;  %v5175_v55 = vpack.c.bf16 %v1649_v10, %v1645_v42  ;;  %v1679_v0 = vld [vmem:[#allocation7 + $0x1360] sm:$0xff] }
 0x263   :  { %v1686_v42 = vld [vmem:[#allocation7 + $0x1398] sm:$0xff]  ;;  %v4679_v10 = vpack.c.bf16 %v1679_v0, %v1675_v6  ;;  %v1711_v6 = vld [vmem:[#allocation7 + $0x1460] sm:$0xff]  ;;  %v1709_v0 = vld [vmem:[#allocation7 + $0x1450] sm:$0xff] }
 0x264   :  { %4648 = vmatpush1.bf16.msra.mxu0 %v4647_v9  ;;  %v1653_v9 = vld [vmem:[#allocation7 + $0x1290] sm:$0xff] }
 0x265   :  { %5160 = vmatpush1.bf16.msra.mxu1 %v5159_v54  ;;  %4650 = vmatprep.subr.bf16.mxu0 %v4649_v59  ;;  %v5177_v54 = vpack.c.bf16 %v1658_v51, %v1654_v49  ;;  %v1657_v59 = vld [vmem:[#allocation7 + $0x12b0] sm:$0xff]  ;;  %v1683_v49 = vld [vmem:[#allocation7 + $0x1380] sm:$0xff] }
 0x266   :  { %5162 = vmatprep.subr.bf16.mxu1 %v5161_v2  ;;  %v1666_v2 = vld [vmem:[#allocation7 + $0x12f8] sm:$0xff]  ;;  %v5179_v4 = vpack.c.bf16 %v1657_v59, %v1653_v9  ;;  %v1687_v51 = vld [vmem:[#allocation7 + $0x13a0] sm:$0xff] }
 0x267   :  { %v1694_v9 = vld [vmem:[#allocation7 + $0x13d8] sm:$0xff]  ;;  %v4683_v59 = vpack.c.bf16 %v1687_v51, %v1683_v49  ;;  %v1715_v49 = vld [vmem:[#allocation7 + $0x1480] sm:$0xff] }
 0x268   :  { %4652 = vmatpush1.bf16.msra.mxu0 %v4651_v11  ;;  %v1661_v11 = vld [vmem:[#allocation7 + $0x12d0] sm:$0xff]  ;;  %v1719_v51 = vld [vmem:[#allocation7 + $0x14a0] sm:$0xff] }
 0x269   :  { %5164 = vmatpush1.bf16.msra.mxu1 %v5163_v12  ;;  %4654 = vmatprep.subr.bf16.mxu0 %v4653_v13  ;;  %v5181_v12 = vpack.c.bf16 %v1666_v2, %v1662_v63  ;;  %v1665_v13 = vld [vmem:[#allocation7 + $0x12f0] sm:$0xff]  ;;  %v4685_v2 = vpack.c.bf16 %v1696_v58, %v1692_v57  ;;  %v1724_v57 = vld [vmem:[#allocation7 + $0x14c8] sm:$0xff] }
 0x26a   :  { %5166 = vmatprep.subr.bf16.mxu1 %v5165_v22  ;;  %v1674_v22 = vld [vmem:[#allocation7 + $0x1338] sm:$0xff]  ;;  %v5183_v24 = vpack.c.bf16 %v1665_v13, %v1661_v11  ;;  %v1700_v11 = vld [vmem:[#allocation7 + $0x1408] sm:$0xff]  ;;  %v442_v13 = vrot.slane %v6262_v60, %v6187_v47 }
 0x26b   :  { %v1728_v58 = vld [vmem:[#allocation7 + $0x14e8] sm:$0xff] }
 0x26c   :  { %4656 = vmatpush1.bf16.msra.mxu0 %v4655_v27  ;;  %v1669_v27 = vld [vmem:[#allocation7 + $0x1310] sm:$0xff] }
 0x26d   :  { %5168 = vmatpush1.bf16.msra.mxu1 %v5167_v28  ;;  %4658 = vmatprep.subr.bf16.mxu0 %v4657_v29  ;;  %v5185_v28 = vpack.c.bf16 %v1674_v22, %v1670_v17  ;;  %v1673_v29 = vld [vmem:[#allocation7 + $0x1330] sm:$0xff]  ;;  %v826_v22 = vadd.f32 %v6211_v30, %v430_v61 }
 0x26e   :  { %5170 = vmatprep.subr.bf16.mxu1 %v5169_v36  ;;  %v1682_v36 = vld [vmem:[#allocation7 + $0x1378] sm:$0xff]  ;;  %v5187_v18 = vpack.c.bf16 %v1673_v29, %v1669_v27  ;;  %v1701_v27 = vld [vmem:[#allocation7 + $0x1410] sm:$0xff]  ;;  %v899_v29 = vadd.f32 %v6218_v52, %v442_v13 }
 0x26f   :  { %v1738_v13 = vld [vmem:[#allocation7 + $0x1538] sm:$0xff] }
 0x270   :  { %4660 = vmatpush1.bf16.msra.mxu0 %v4659_v35  ;;  %v1677_v35 = vld [vmem:[#allocation7 + $0x1350] sm:$0xff]  ;;  %v1054_v50 = vmax.f32 %v899_v29, 0.0  ;;  %v1746_v29 = vld [vmem:[#allocation7 + $0x1578] sm:$0xff] }
 0x271   :  { %5172 = vmatpush1.bf16.msra.mxu1 %v5171_v38  ;;  %4662 = vmatprep.subr.bf16.mxu0 %v4661_v39  ;;  %v5189_v38 = vpack.c.bf16 %v1682_v36, %v1678_v16  ;;  %v1681_v39 = vld [vmem:[#allocation7 + $0x1370] sm:$0xff]  ;;  %v1710_v36 = vld [vmem:[#allocation7 + $0x1458] sm:$0xff] }
 0x272   :  { %5174 = vmatprep.subr.bf16.mxu1 %v5173_v44  ;;  %v1690_v44 = vld [vmem:[#allocation7 + $0x13b8] sm:$0xff]  ;;  %v5191_v46 = vpack.c.bf16 %v1681_v39, %v1677_v35  ;;  %v4693_v35 = vpack.c.bf16 %v1712_v33, %v1708_v32  ;;  %v1716_v39 = vld [vmem:[#allocation7 + $0x1488] sm:$0xff] }
 0x274   :  { %4664 = vmatpush1.bf16.msra.mxu0 %v4663_v53  ;;  %v1685_v53 = vld [vmem:[#allocation7 + $0x1390] sm:$0xff] }
 0x275   :  { %5176 = vmatpush1.bf16.msra.mxu1 %v5175_v55  ;;  %4666 = vmatprep.subr.bf16.mxu0 %v4665_v56  ;;  %v5193_v55 = vpack.c.bf16 %v1690_v44, %v1686_v42  ;;  %v1689_v56 = vld [vmem:[#allocation7 + $0x13b0] sm:$0xff]  ;;  %v1718_v42 = vld [vmem:[#allocation7 + $0x1498] sm:$0xff] }
 0x276   :  { %5178 = vmatprep.subr.bf16.mxu1 %v5177_v54  ;;  %v1698_v54 = vld [vmem:[#allocation7 + $0x13f8] sm:$0xff]  ;;  %v5195_v63 = vpack.c.bf16 %v1689_v56, %v1685_v53  ;;  %v1717_v53 = vld [vmem:[#allocation7 + $0x1490] sm:$0xff] }
 0x277   :  { %v5197_v8 = vpack.c.bf16 %v1698_v54, %v1694_v9  ;;  %v1722_v44 = vld [vmem:[#allocation7 + $0x14b8] sm:$0xff]  ;;  %v1721_v56 = vld [vmem:[#allocation7 + $0x14b0] sm:$0xff] }
 0x278   :  { %4668 = vmatpush1.bf16.msra.mxu0 %v4667_v3  ;;  %v1691_v3 = vld [vmem:[#allocation7 + $0x13c0] sm:$0xff]  ;;  %v1726_v9 = vld [vmem:[#allocation7 + $0x14d8] sm:$0xff]  ;;  %v5211_v61 = vpack.c.bf16 %v1721_v56, %v1717_v53 }
 0x279   :  { %5180 = vmatpush1.bf16.msra.mxu1 %v5179_v4  ;;  %4670 = vmatprep.subr.bf16.mxu0 %v4669_v5  ;;  %v1695_v4 = vld [vmem:[#allocation7 + $0x13e0] sm:$0xff]  ;;  %v1693_v5 = vld [vmem:[#allocation7 + $0x13d0] sm:$0xff]  ;;  %v1730_v54 = vld [vmem:[#allocation7 + $0x14f8] sm:$0xff] }
 0x27a   :  { %5182 = vmatprep.subr.bf16.mxu1 %v5181_v12  ;;  %v1704_v12 = vld [vmem:[#allocation7 + $0x1428] sm:$0xff]  ;;  %v4687_v17 = vpack.c.bf16 %v1695_v4, %v1691_v3  ;;  %v1727_v3 = vld [vmem:[#allocation7 + $0x14e0] sm:$0xff]  ;;  %v1725_v4 = vld [vmem:[#allocation7 + $0x14d0] sm:$0xff] }
 0x27b   :  { %v1762_v53 = vld [vmem:[#allocation7 + $0x15f8] sm:$0xff] }
 0x27c   :  { %4672 = vmatpush1.bf16.msra.mxu0 %v4671_v23  ;;  %v5199_v23 = vpack.c.bf16 %v1697_v20, %v1693_v5  ;;  %v5213_v5 = vpack.c.bf16 %v1730_v54, %v1726_v9  ;;  %v1732_v20 = vld [vmem:[#allocation7 + $0x1508] sm:$0xff]  ;;  %v1759_v9 = vld [vmem:[#allocation7 + $0x15e0] sm:$0xff]  ;;  %v1757_v54 = vld [vmem:[#allocation7 + $0x15d0] sm:$0xff] }
 0x27d   :  { %5184 = vmatpush1.bf16.msra.mxu1 %v5183_v24  ;;  %4674 = vmatprep.subr.bf16.mxu0 %v4673_v25  ;;  %v4689_v24 = vpack.c.bf16 %v1704_v12, %v1700_v11  ;;  %v1699_v25 = vld [vmem:[#allocation7 + $0x1400] sm:$0xff]  ;;  %v1736_v11 = vld [vmem:[#allocation7 + $0x1528] sm:$0xff]  ;;  %v1734_v12 = vld [vmem:[#allocation7 + $0x1518] sm:$0xff] }
 0x27e   :  { %5186 = vmatprep.subr.bf16.mxu1 %v5185_v28  ;;  %v1705_v28 = vld [vmem:[#allocation7 + $0x1430] sm:$0xff]  ;;  %v4691_v16 = vpack.c.bf16 %v1703_v26, %v1699_v25  ;;  %v5217_v25 = vpack.c.bf16 %v1738_v13, %v1734_v12  ;;  %v1767_v12 = vld [vmem:[#allocation7 + $0x1620] sm:$0xff] }
 0x27f   :  { %v5203_v30 = vpack.c.bf16 %v1705_v28, %v1701_v27  ;;  %v1737_v26 = vld [vmem:[#allocation7 + $0x1530] sm:$0xff]  ;;  %v1744_v27 = vld [vmem:[#allocation7 + $0x1568] sm:$0xff]  ;;  %v1742_v28 = vld [vmem:[#allocation7 + $0x1558] sm:$0xff] }
 0x280   :  { %4676 = vmatpush1.bf16.msra.mxu0 %v4675_v37  ;;  %v1714_v37 = vld [vmem:[#allocation7 + $0x1478] sm:$0xff]  ;;  %v1765_v13 = vld [vmem:[#allocation7 + $0x1610] sm:$0xff] }
 0x281   :  { %5188 = vmatpush1.bf16.msra.mxu1 %v5187_v18  ;;  %4678 = vmatprep.subr.bf16.mxu0 %v4677_v34  ;;  %v1051_v18 = vmax.f32 %v826_v22, 0.0  ;;  %v1707_v34 = vld [vmem:[#allocation7 + $0x1440] sm:$0xff]  ;;  %v5205_v52 = vpack.c.bf16 %v1714_v37, %v1710_v36 }
 0x282   :  { %5190 = vmatprep.subr.bf16.mxu1 %v5189_v38  ;;  %v1713_v38 = vld [vmem:[#allocation7 + $0x1470] sm:$0xff]  ;;  %v1731_v22 = vld [vmem:[#allocation7 + $0x1500] sm:$0xff] }
 0x283   :  { %v1739_v36 = vld [vmem:[#allocation7 + $0x1540] sm:$0xff] }
 0x284   :  { %4680 = vmatpush1.bf16.msra.mxu0 %v4679_v10  ;;  %v4695_v10 = vpack.c.bf16 %v1711_v6, %v1707_v34  ;;  %v1743_v37 = vld [vmem:[#allocation7 + $0x1560] sm:$0xff]  ;;  %v1745_v34 = vld [vmem:[#allocation7 + $0x1570] sm:$0xff]  ;;  %v1748_v6 = vld [vmem:[#allocation7 + $0x1588] sm:$0xff] }
 0x285   :  { %5192 = vmatpush1.bf16.msra.mxu1 %v5191_v46  ;;  %4682 = vmatprep.subr.bf16.mxu0 %v4681_v48  ;;  %v5207_v46 = vpack.c.bf16 %v1713_v38, %v1709_v0  ;;  %v4697_v48 = vpack.c.bf16 %v1720_v40, %v1716_v39  ;;  %v1752_v0 = vld [vmem:[#allocation7 + $0x15a8] sm:$0xff]  ;;  %v1754_v38 = vld [vmem:[#allocation7 + $0x15b8] sm:$0xff]  ;;  %v4711_v39 = vpack.c.bf16 %v1743_v37, %v1739_v36 }
 0x286   :  { %5194 = vmatprep.subr.bf16.mxu1 %v5193_v55  ;;  %v5209_v55 = vpack.c.bf16 %v1722_v44, %v1718_v42  ;;  %v1751_v42 = vld [vmem:[#allocation7 + $0x15a0] sm:$0xff]  ;;  %v1749_v44 = vld [vmem:[#allocation7 + $0x1590] sm:$0xff]  ;;  %v1784_v36 = vld [vmem:[#allocation7 + $0x16a8] sm:$0xff] }
 0x287   :  { %v1782_v37 = vld [vmem:[#allocation7 + $0x1698] sm:$0xff] }
 0x288   :  { %4684 = vmatpush1.bf16.msra.mxu0 %v4683_v59  ;;  %v4699_v59 = vpack.c.bf16 %v1719_v51, %v1715_v49  ;;  %v1760_v49 = vld [vmem:[#allocation7 + $0x15e8] sm:$0xff]  ;;  %v1758_v51 = vld [vmem:[#allocation7 + $0x15d8] sm:$0xff] }
 0x289   :  { %5196 = vmatpush1.bf16.msra.mxu1 %v5195_v63  ;;  %4686 = vmatprep.subr.bf16.mxu0 %v4685_v2  ;;  %v4701_v63 = vpack.c.bf16 %v1728_v58, %v1724_v57  ;;  %v1723_v2 = vld [vmem:[#allocation7 + $0x14c0] sm:$0xff] }
 0x28a   :  { %5198 = vmatprep.subr.bf16.mxu1 %v5197_v8  ;;  %v1729_v8 = vld [vmem:[#allocation7 + $0x14f0] sm:$0xff]  ;;  %v4703_v14 = vpack.c.bf16 %v1727_v3, %v1723_v2  ;;  %v1755_v58 = vld [vmem:[#allocation7 + $0x15c0] sm:$0xff]  ;;  %v1768_v2 = vld [vmem:[#allocation7 + $0x1628] sm:$0xff] }
 0x28b   :  { %v5215_v43 = vpack.c.bf16 %v1729_v8, %v1725_v4  ;;  %v1766_v3 = vld [vmem:[#allocation7 + $0x1618] sm:$0xff] }
 0x28c   :  { %4688 = vmatpush1.bf16.msra.mxu0 %v4687_v17  ;;  %v4705_v17 = vpack.c.bf16 %v1736_v11, %v1732_v20  ;;  %v1770_v4 = vld [vmem:[#allocation7 + $0x1638] sm:$0xff]  ;;  %v1763_v11 = vld [vmem:[#allocation7 + $0x1600] sm:$0xff] }
 0x28d   :  { %5200 = vmatpush1.bf16.msra.mxu1 %v5199_v23  ;;  %4690 = vmatprep.subr.bf16.mxu0 %v4689_v24  ;;  %v1735_v23 = vld [vmem:[#allocation7 + $0x1520] sm:$0xff]  ;;  %v1733_v24 = vld [vmem:[#allocation7 + $0x1510] sm:$0xff] }
 0x28e   :  { %5202 = vmatprep.subr.bf16.mxu1 %v5201_v41  ;;  %v1740_v41 = vld [vmem:[#allocation7 + $0x1548] sm:$0xff]  ;;  %v4707_v32 = vpack.c.bf16 %v1735_v23, %v1731_v22  ;;  %v5219_v33 = vpack.c.bf16 %v1737_v26, %v1733_v24  ;;  %v1774_v23 = vld [vmem:[#allocation7 + $0x1658] sm:$0xff] }
 0x28f   :  { %2454 = vmatmul.mubr.f32.vlgmr.msra.gmra.mrb[8].mxu0 %v1051_v18  ;;  %v1776_v22 = vld [vmem:[#allocation7 + $0x1668] sm:$0xff]  ;;  %v1778_v24 = vld [vmem:[#allocation7 + $0x1678] sm:$0xff] }
 0x290   :  { %3022 = vmatmul.mubr.f32.vlgmr.msra.gmra.mrb[8].mxu1 %v1051_v18  ;;  %4692 = vmatpush1.bf16.msra.mxu0 %v4691_v16  ;;  %v4709_v16 = vpack.c.bf16 %v1744_v27, %v1740_v41  ;;  %v1741_v18 = vld [vmem:[#allocation7 + $0x1550] sm:$0xff]  ;;  %v1771_v27 = vld [vmem:[#allocation7 + $0x1640] sm:$0xff] }
 0x291   :  { %2524 = vmatprep.mubr.f32.mxu0 %v1054_v50  ;;  %5204 = vmatpush1.bf16.msra.mxu1 %v5203_v30  ;;  %v5221_v30 = vpack.c.bf16 %v1746_v29, %v1742_v28  ;;  %v5223_v40 = vpack.c.bf16 %v1745_v34, %v1741_v18  ;;  %v1775_v28 = vld [vmem:[#allocation7 + $0x1660] sm:$0xff]  ;;  %v1773_v29 = vld [vmem:[#allocation7 + $0x1650] sm:$0xff]  ;;  %v1786_v18 = vld [vmem:[#allocation7 + $0x16b8] sm:$0xff] }
 0x292   :  { %3092 = vmatprep.mubr.f32.mxu1 %v1054_v50  ;;  %4694 = vmatprep.subr.bf16.mxu0 %v4693_v35  ;;  %v1750_v35 = vld [vmem:[#allocation7 + $0x1598] sm:$0xff]  ;;  %v4713_v50 = vpack.c.bf16 %v1752_v0, %v1748_v6  ;;  %v1779_v0 = vld [vmem:[#allocation7 + $0x1680] sm:$0xff] }
 0x293   :  { %5206 = vmatprep.subr.bf16.mxu1 %v5205_v52  ;;  %v1747_v52 = vld [vmem:[#allocation7 + $0x1580] sm:$0xff] }
 0x294   :  { %4696 = vmatpush1.bf16.msra.mxu0 %v4695_v10  ;;  %v5225_v10 = vpack.c.bf16 %v1754_v38, %v1750_v35  ;;  %v1783_v35 = vld [vmem:[#allocation7 + $0x16a0] sm:$0xff]  ;;  %v1781_v38 = vld [vmem:[#allocation7 + $0x1690] sm:$0xff] }
 0x295   :  { %5208 = vmatpush1.bf16.msra.mxu1 %v5207_v46  ;;  %4698 = vmatprep.subr.bf16.mxu0 %v4697_v48  ;;  %v1753_v46 = vld [vmem:[#allocation7 + $0x15b0] sm:$0xff]  ;;  %v1756_v48 = vld [vmem:[#allocation7 + $0x15c8] sm:$0xff] }
 0x296   :  { %5210 = vmatprep.subr.bf16.mxu1 %v5209_v55  ;;  %v4715_v55 = vpack.c.bf16 %v1751_v42, %v1747_v52  ;;  %v5227_v56 = vpack.c.bf16 %v1753_v46, %v1749_v44  ;;  %v4717_v57 = vpack.c.bf16 %v1760_v49, %v1756_v48  ;;  %v1792_v52 = vld [vmem:[#allocation7 + $0x16e8] sm:$0xff]  ;;  %v1790_v42 = vld [vmem:[#allocation7 + $0x16d8] sm:$0xff]  ;;  %v1787_v49 = vld [vmem:[#allocation7 + $0x16c0] sm:$0xff] }
 0x297   :  { %v1794_v44 = vld [vmem:[#allocation7 + $0x16f8] sm:$0xff] }
 0x298   :  { %4700 = vmatpush1.bf16.msra.mxu0 %v4699_v59  ;;  %v5229_v59 = vpack.c.bf16 %v1762_v53, %v1758_v51  ;;  %v1791_v51 = vld [vmem:[#allocation7 + $0x16e0] sm:$0xff]  ;;  %v1789_v53 = vld [vmem:[#allocation7 + $0x16d0] sm:$0xff] }
 0x299   :  { %5212 = vmatpush1.bf16.msra.mxu1 %v5211_v61  ;;  %4702 = vmatprep.subr.bf16.mxu0 %v4701_v63  ;;  %v1761_v61 = vld [vmem:[#allocation7 + $0x15f0] sm:$0xff]  ;;  %v1764_v63 = vld [vmem:[#allocation7 + $0x1608] sm:$0xff] }
 0x29a   :  { %5214 = vmatprep.subr.bf16.mxu1 %v5213_v5  ;;  %v4719_v5 = vpack.c.bf16 %v1759_v9, %v1755_v58  ;;  %v5231_v8 = vpack.c.bf16 %v1761_v61, %v1757_v54  ;;  %v4721_v20 = vpack.c.bf16 %v1768_v2, %v1764_v63  ;;  %v1800_v58 = vld [vmem:[#allocation7 + $0x1728] sm:$0xff]  ;;  %v1798_v9 = vld [vmem:[#allocation7 + $0x1718] sm:$0xff]  ;;  %v1795_v2 = vld [vmem:[#allocation7 + $0x1700] sm:$0xff] }
 0x29b   :  { %v1802_v54 = vld [vmem:[#allocation7 + $0x1738] sm:$0xff] }
 0x29c   :  { %4704 = vmatpush1.bf16.msra.mxu0 %v4703_v14  ;;  %v5233_v14 = vpack.c.bf16 %v1770_v4, %v1766_v3  ;;  %v1799_v3 = vld [vmem:[#allocation7 + $0x1720] sm:$0xff]  ;;  %v1797_v4 = vld [vmem:[#allocation7 + $0x1710] sm:$0xff] }
 0x29d   :  { %5216 = vmatpush1.bf16.msra.mxu1 %v5215_v43  ;;  %4706 = vmatprep.subr.bf16.mxu0 %v4705_v17  ;;  %v1769_v43 = vld [vmem:[#allocation7 + $0x1630] sm:$0xff]  ;;  %v1772_v17 = vld [vmem:[#allocation7 + $0x1648] sm:$0xff] }
 0x29e   :  { %5218 = vmatprep.subr.bf16.mxu1 %v5217_v25  ;;  %v4723_v25 = vpack.c.bf16 %v1767_v12, %v1763_v11  ;;  %v5235_v26 = vpack.c.bf16 %v1769_v43, %v1765_v13  ;;  %v4725_v41 = vpack.c.bf16 %v1776_v22, %v1772_v17  ;;  %v1808_v11 = vld [vmem:[#allocation7 + $0x1768] sm:$0xff]  ;;  %v1806_v12 = vld [vmem:[#allocation7 + $0x1758] sm:$0xff]  ;;  %v1803_v22 = vld [vmem:[#allocation7 + $0x1740] sm:$0xff] }
 0x29f   :  { %v1810_v13 = vld [vmem:[#allocation7 + $0x1778] sm:$0xff] }
 0x2a0   :  { %4708 = vmatpush1.bf16.msra.mxu0 %v4707_v32  ;;  %v5237_v32 = vpack.c.bf16 %v1778_v24, %v1774_v23  ;;  %v1807_v23 = vld [vmem:[#allocation7 + $0x1760] sm:$0xff]  ;;  %v1805_v24 = vld [vmem:[#allocation7 + $0x1750] sm:$0xff] }
 0x2a1   :  { %5220 = vmatpush1.bf16.msra.mxu1 %v5219_v33  ;;  %4710 = vmatprep.subr.bf16.mxu0 %v4709_v16  ;;  %v1777_v33 = vld [vmem:[#allocation7 + $0x1670] sm:$0xff]  ;;  %v1780_v16 = vld [vmem:[#allocation7 + $0x1688] sm:$0xff] }
 0x2a2   :  { %5222 = vmatprep.subr.bf16.mxu1 %v5221_v30  ;;  %v4727_v30 = vpack.c.bf16 %v1775_v28, %v1771_v27  ;;  %v5239_v34 = vpack.c.bf16 %v1777_v33, %v1773_v29  ;;  %v4729_v6 = vpack.c.bf16 %v1784_v36, %v1780_v16  ;;  %v1816_v27 = vld [vmem:[#allocation7 + $0x17a8] sm:$0xff]  ;;  %v1814_v28 = vld [vmem:[#allocation7 + $0x1798] sm:$0xff]  ;;  %v1811_v36 = vld [vmem:[#allocation7 + $0x1780] sm:$0xff] }
 0x2a3   :  { %v1818_v29 = vld [vmem:[#allocation7 + $0x17b8] sm:$0xff] }
 0x2a4   :  { %4712 = vmatpush1.bf16.msra.mxu0 %v4711_v39  ;;  %v5241_v39 = vpack.c.bf16 %v1786_v18, %v1782_v37  ;;  %v1815_v37 = vld [vmem:[#allocation7 + $0x17a0] sm:$0xff]  ;;  %v1813_v18 = vld [vmem:[#allocation7 + $0x1790] sm:$0xff] }
 0x2a5   :  { %5224 = vmatpush1.bf16.msra.mxu1 %v5223_v40  ;;  %4714 = vmatprep.subr.bf16.mxu0 %v4713_v50  ;;  %v1785_v40 = vld [vmem:[#allocation7 + $0x16b0] sm:$0xff]  ;;  %v1788_v50 = vld [vmem:[#allocation7 + $0x16c8] sm:$0xff] }
 0x2a6   :  { %5226 = vmatprep.subr.bf16.mxu1 %v5225_v10  ;;  %v4731_v10 = vpack.c.bf16 %v1783_v35, %v1779_v0  ;;  %v5243_v46 = vpack.c.bf16 %v1785_v40, %v1781_v38  ;;  %v4733_v48 = vpack.c.bf16 %v1792_v52, %v1788_v50  ;;  %v1824_v0 = vld [vmem:[#allocation7 + $0x17e8] sm:$0xff]  ;;  %v1822_v35 = vld [vmem:[#allocation7 + $0x17d8] sm:$0xff]  ;;  %v438_v40 = vrot.slane %v6262_v60, %v6202_v31 }
 0x2a7   :  { %v1826_v38 = vld [vmem:[#allocation7 + $0x17f8] sm:$0xff] }
 0x2a8   :  { %4716 = vmatpush1.bf16.msra.mxu0 %v4715_v55  ;;  %v5245_v55 = vpack.c.bf16 %v1794_v44, %v1790_v42  ;;  %v1819_v42 = vld [vmem:[#allocation7 + $0x17c0] sm:$0xff] }
 0x2a9   :  { %5228 = vmatpush1.bf16.msra.mxu1 %v5227_v56  ;;  %4718 = vmatprep.subr.bf16.mxu0 %v4717_v57  ;;  %v1793_v56 = vld [vmem:[#allocation7 + $0x16f0] sm:$0xff]  ;;  %v1796_v57 = vld [vmem:[#allocation7 + $0x1708] sm:$0xff]  ;;  %v1823_v44 = vld [vmem:[#allocation7 + $0x17e0] sm:$0xff] }
 0x2aa   :  { %5230 = vmatprep.subr.bf16.mxu1 %v5229_v59  ;;  %v4735_v59 = vpack.c.bf16 %v1791_v51, %v1787_v49  ;;  %v5247_v61 = vpack.c.bf16 %v1793_v56, %v1789_v53  ;;  %v4737_v63 = vpack.c.bf16 %v1800_v58, %v1796_v57  ;;  %v1828_v49 = vld [vmem:[#allocation7 + $0x1808] sm:$0xff]  ;;  %v1830_v53 = vld [vmem:[#allocation7 + $0x1818] sm:$0xff]  ;;  %v4751_v56 = vpack.c.bf16 %v1823_v44, %v1819_v42 }
 0x2ab   :  { %v1832_v51 = vld [vmem:[#allocation7 + $0x1828] sm:$0xff]  ;;  %v897_v57 = vadd.f32 %v6216_v45, %v438_v40  ;;  %v1862_v44 = vld [vmem:[#allocation7 + $0x1918] sm:$0xff] }
 0x2ac   :  { %4720 = vmatpush1.bf16.msra.mxu0 %v4719_v5  ;;  %v5249_v5 = vpack.c.bf16 %v1802_v54, %v1798_v9  ;;  %v4753_v58 = vpack.c.bf16 %v1832_v51, %v1828_v49  ;;  %v1827_v9 = vld [vmem:[#allocation7 + $0x1800] sm:$0xff]  ;;  %v1864_v42 = vld [vmem:[#allocation7 + $0x1928] sm:$0xff] }
 0x2ad   :  { %5232 = vmatpush1.bf16.msra.mxu1 %v5231_v8  ;;  %4722 = vmatprep.subr.bf16.mxu0 %v4721_v20  ;;  %v1801_v8 = vld [vmem:[#allocation7 + $0x1730] sm:$0xff]  ;;  %v1804_v20 = vld [vmem:[#allocation7 + $0x1748] sm:$0xff]  ;;  %v1831_v54 = vld [vmem:[#allocation7 + $0x1820] sm:$0xff] }
 0x2ae   :  { %5234 = vmatprep.subr.bf16.mxu1 %v5233_v14  ;;  %v4739_v14 = vpack.c.bf16 %v1799_v3, %v1795_v2  ;;  %v5251_v43 = vpack.c.bf16 %v1801_v8, %v1797_v4  ;;  %v4741_v17 = vpack.c.bf16 %v1808_v11, %v1804_v20  ;;  %v1836_v2 = vld [vmem:[#allocation7 + $0x1848] sm:$0xff]  ;;  %v4755_v4 = vpack.c.bf16 %v1831_v54, %v1827_v9  ;;  %v1842_v8 = vld [vmem:[#allocation7 + $0x1878] sm:$0xff]  ;;  %v1835_v11 = vld [vmem:[#allocation7 + $0x1840] sm:$0xff] }
 0x2af   :  { %v1840_v3 = vld [vmem:[#allocation7 + $0x1868] sm:$0xff]  ;;  %v1053_v20 = vmax.f32 %v897_v57, 0.0  ;;  %v1859_v51 = vld [vmem:[#allocation7 + $0x1900] sm:$0xff]  ;;  %v1865_v57 = vld [vmem:[#allocation7 + $0x1930] sm:$0xff] }
 0x2b0   :  { %4724 = vmatpush1.bf16.msra.mxu0 %v4723_v25  ;;  %v5253_v25 = vpack.c.bf16 %v1810_v13, %v1806_v12  ;;  %v1839_v12 = vld [vmem:[#allocation7 + $0x1860] sm:$0xff]  ;;  %v1837_v13 = vld [vmem:[#allocation7 + $0x1850] sm:$0xff]  ;;  %v1870_v9 = vld [vmem:[#allocation7 + $0x1958] sm:$0xff] }
 0x2b1   :  { %5236 = vmatpush1.bf16.msra.mxu1 %v5235_v26  ;;  %4726 = vmatprep.subr.bf16.mxu0 %v4725_v41  ;;  %v1809_v26 = vld [vmem:[#allocation7 + $0x1770] sm:$0xff]  ;;  %v1812_v41 = vld [vmem:[#allocation7 + $0x1788] sm:$0xff]  ;;  %v1874_v54 = vld [vmem:[#allocation7 + $0x1978] sm:$0xff] }
 0x2b2   :  { %5238 = vmatprep.subr.bf16.mxu1 %v5237_v32  ;;  %v4743_v32 = vpack.c.bf16 %v1807_v23, %v1803_v22  ;;  %v5255_v33 = vpack.c.bf16 %v1809_v26, %v1805_v24  ;;  %v4745_v16 = vpack.c.bf16 %v1816_v27, %v1812_v41  ;;  %v1848_v22 = vld [vmem:[#allocation7 + $0x18a8] sm:$0xff]  ;;  %v1056_v23 = vmax.f32 %v6231_v15, 0.0  ;;  %v1850_v26 = vld [vmem:[#allocation7 + $0x18b8] sm:$0xff] }
 0x2b3   :  { %v4759_v41 = vpack.c.bf16 %v1839_v12, %v1835_v11  ;;  %v1856_v15 = vld [vmem:[#allocation7 + $0x18e8] sm:$0xff]  ;;  %v1878_v11 = vld [vmem:[#allocation7 + $0x1998] sm:$0xff] }
 0x2b4   :  { %4728 = vmatpush1.bf16.msra.mxu0 %v4727_v30  ;;  %v5257_v30 = vpack.c.bf16 %v1818_v29, %v1814_v28  ;;  %v1843_v29 = vld [vmem:[#allocation7 + $0x1880] sm:$0xff]  ;;  %v1882_v12 = vld [vmem:[#allocation7 + $0x19b8] sm:$0xff] }
 0x2b5   :  { %5240 = vmatpush1.bf16.msra.mxu1 %v5239_v34  ;;  %4730 = vmatprep.subr.bf16.mxu0 %v4729_v6  ;;  %v1817_v34 = vld [vmem:[#allocation7 + $0x17b0] sm:$0xff]  ;;  %v1820_v6 = vld [vmem:[#allocation7 + $0x17c8] sm:$0xff] }
 0x2b6   :  { %5242 = vmatprep.subr.bf16.mxu1 %v5241_v39  ;;  %v4747_v39 = vpack.c.bf16 %v1815_v37, %v1811_v36  ;;  %v5259_v50 = vpack.c.bf16 %v1817_v34, %v1813_v18  ;;  %v4749_v52 = vpack.c.bf16 %v1824_v0, %v1820_v6  ;;  %v1849_v36 = vld [vmem:[#allocation7 + $0x18b0] sm:$0xff]  ;;  %v1852_v37 = vld [vmem:[#allocation7 + $0x18c8] sm:$0xff]  ;;  %v1854_v18 = vld [vmem:[#allocation7 + $0x18d8] sm:$0xff] }
 0x2b7   :  { %v4765_v0 = vpack.c.bf16 %v1856_v15, %v1852_v37  ;;  %v1885_v37 = vld [vmem:[#allocation7 + $0x19d0] sm:$0xff] }
 0x2b8   :  { %4732 = vmatpush1.bf16.msra.mxu0 %v4731_v10  ;;  %v1821_v10 = vld [vmem:[#allocation7 + $0x17d0] sm:$0xff] }
 0x2b9   :  { %5244 = vmatpush1.bf16.msra.mxu1 %v5243_v46  ;;  %4734 = vmatprep.subr.bf16.mxu0 %v4733_v48  ;;  %v5261_v46 = vpack.c.bf16 %v1826_v38, %v1822_v35  ;;  %v1825_v48 = vld [vmem:[#allocation7 + $0x17f0] sm:$0xff]  ;;  %v1851_v35 = vld [vmem:[#allocation7 + $0x18c0] sm:$0xff] }
 0x2ba   :  { %5246 = vmatprep.subr.bf16.mxu1 %v5245_v55  ;;  %v1834_v55 = vld [vmem:[#allocation7 + $0x1838] sm:$0xff]  ;;  %v5263_v60 = vpack.c.bf16 %v1825_v48, %v1821_v10  ;;  %v1855_v38 = vld [vmem:[#allocation7 + $0x18e0] sm:$0xff] }
 0x2bb   :  { %v1866_v10 = vld [vmem:[#allocation7 + $0x1938] sm:$0xff] }
 0x2bc   :  { %4736 = vmatpush1.bf16.msra.mxu0 %v4735_v59  ;;  %v5265_v59 = vpack.c.bf16 %v1834_v55, %v1830_v53  ;;  %v1863_v53 = vld [vmem:[#allocation7 + $0x1920] sm:$0xff]  ;;  %v1861_v55 = vld [vmem:[#allocation7 + $0x1910] sm:$0xff] }
 0x2bd   :  { %5248 = vmatpush1.bf16.msra.mxu1 %v5247_v61  ;;  %4738 = vmatprep.subr.bf16.mxu0 %v4737_v63  ;;  %v1829_v61 = vld [vmem:[#allocation7 + $0x1810] sm:$0xff] }
 0x2be   :  { %5250 = vmatprep.subr.bf16.mxu1 %v5249_v5  ;;  %v1833_v63 = vld [vmem:[#allocation7 + $0x1830] sm:$0xff]  ;;  %v1838_v5 = vld [vmem:[#allocation7 + $0x1858] sm:$0xff] }
 0x2bf   :  { %v5267_v45 = vpack.c.bf16 %v1833_v63, %v1829_v61  ;;  %v5269_v24 = vpack.c.bf16 %v1842_v8, %v1838_v5  ;;  %v5283_v61 = vpack.c.bf16 %v1865_v57, %v1861_v55  ;;  %v5285_v5 = vpack.c.bf16 %v1874_v54, %v1870_v9  ;;  %v1873_v8 = vld [vmem:[#allocation7 + $0x1970] sm:$0xff]  ;;  %v1903_v57 = vld [vmem:[#allocation7 + $0x1a60] sm:$0xff]  ;;  %v1908_v54 = vld [vmem:[#allocation7 + $0x1a88] sm:$0xff] }
 0x2c0   :  { %4740 = vmatpush1.bf16.msra.mxu0 %v4739_v14  ;;  %v4757_v14 = vpack.c.bf16 %v1840_v3, %v1836_v2  ;;  %v1867_v2 = vld [vmem:[#allocation7 + $0x1940] sm:$0xff]  ;;  %v1905_v9 = vld [vmem:[#allocation7 + $0x1a70] sm:$0xff] }
 0x2c1   :  { %5252 = vmatpush1.bf16.msra.mxu1 %v5251_v43  ;;  %4742 = vmatprep.subr.bf16.mxu0 %v4741_v17  ;;  %v1841_v43 = vld [vmem:[#allocation7 + $0x1870] sm:$0xff]  ;;  %v1844_v17 = vld [vmem:[#allocation7 + $0x1888] sm:$0xff]  ;;  %v1871_v3 = vld [vmem:[#allocation7 + $0x1960] sm:$0xff] }
 0x2c2   :  { %5254 = vmatprep.subr.bf16.mxu1 %v5253_v25  ;;  %v1846_v25 = vld [vmem:[#allocation7 + $0x1898] sm:$0xff]  ;;  %v5271_v27 = vpack.c.bf16 %v1841_v43, %v1837_v13  ;;  %v4761_v28 = vpack.c.bf16 %v1848_v22, %v1844_v17  ;;  %v4775_v13 = vpack.c.bf16 %v1871_v3, %v1867_v2  ;;  %v1875_v17 = vld [vmem:[#allocation7 + $0x1980] sm:$0xff] }
 0x2c3   :  { %v1879_v22 = vld [vmem:[#allocation7 + $0x19a0] sm:$0xff] }
 0x2c4   :  { %4744 = vmatpush1.bf16.msra.mxu0 %v4743_v32  ;;  %v1847_v32 = vld [vmem:[#allocation7 + $0x18a0] sm:$0xff] }
 0x2c5   :  { %5256 = vmatpush1.bf16.msra.mxu1 %v5255_v33  ;;  %4746 = vmatprep.subr.bf16.mxu0 %v4745_v16  ;;  %v1845_v33 = vld [vmem:[#allocation7 + $0x1890] sm:$0xff]  ;;  %v5273_v16 = vpack.c.bf16 %v1850_v26, %v1846_v25  ;;  %v4763_v34 = vpack.c.bf16 %v1847_v32, %v1843_v29  ;;  %v1884_v26 = vld [vmem:[#allocation7 + $0x19c8] sm:$0xff]  ;;  %v4779_v29 = vpack.c.bf16 %v1879_v22, %v1875_v17 }
 0x2c6   :  { %5258 = vmatprep.subr.bf16.mxu1 %v5257_v30  ;;  %v1858_v30 = vld [vmem:[#allocation7 + $0x18f8] sm:$0xff]  ;;  %v5275_v6 = vpack.c.bf16 %v1849_v36, %v1845_v33  ;;  %v1881_v25 = vld [vmem:[#allocation7 + $0x19b0] sm:$0xff]  ;;  %v1887_v36 = vld [vmem:[#allocation7 + $0x19e0] sm:$0xff] }
 0x2c7   :  { %v5277_v40 = vpack.c.bf16 %v1858_v30, %v1854_v18  ;;  %v1889_v18 = vld [vmem:[#allocation7 + $0x19f0] sm:$0xff]  ;;  %v1892_v30 = vld [vmem:[#allocation7 + $0x1a08] sm:$0xff] }
 0x2c8   :  { %4748 = vmatpush1.bf16.msra.mxu0 %v4747_v39  ;;  %v1853_v39 = vld [vmem:[#allocation7 + $0x18d0] sm:$0xff] }
 0x2c9   :  { %5260 = vmatpush1.bf16.msra.mxu1 %v5259_v50  ;;  %4750 = vmatprep.subr.bf16.mxu0 %v4749_v52  ;;  %v1857_v50 = vld [vmem:[#allocation7 + $0x18f0] sm:$0xff]  ;;  %v1860_v52 = vld [vmem:[#allocation7 + $0x1908] sm:$0xff] }
 0x2ca   :  { %5262 = vmatprep.subr.bf16.mxu1 %v5261_v46  ;;  %v4767_v46 = vpack.c.bf16 %v1855_v38, %v1851_v35  ;;  %v5279_v48 = vpack.c.bf16 %v1857_v50, %v1853_v39  ;;  %v4769_v49 = vpack.c.bf16 %v1864_v42, %v1860_v52  ;;  %v5295_v38 = vpack.c.bf16 %v1889_v18, %v1885_v37  ;;  %v1895_v50 = vld [vmem:[#allocation7 + $0x1a20] sm:$0xff]  ;;  %v1893_v52 = vld [vmem:[#allocation7 + $0x1a10] sm:$0xff] }
 0x2cb   :  { %v1927_v18 = vld [vmem:[#allocation7 + $0x1b20] sm:$0xff] }
 0x2cc   :  { %4752 = vmatpush1.bf16.msra.mxu0 %v4751_v56  ;;  %v5281_v56 = vpack.c.bf16 %v1866_v10, %v1862_v44  ;;  %v1897_v44 = vld [vmem:[#allocation7 + $0x1a30] sm:$0xff]  ;;  %v1900_v10 = vld [vmem:[#allocation7 + $0x1a48] sm:$0xff] }
 0x2cd   :  { %5264 = vmatpush1.bf16.msra.mxu1 %v5263_v60  ;;  %4754 = vmatprep.subr.bf16.mxu0 %v4753_v58  ;;  %v1868_v60 = vld [vmem:[#allocation7 + $0x1948] sm:$0xff] }
 0x2ce   :  { %5266 = vmatprep.subr.bf16.mxu1 %v5265_v59  ;;  %v1872_v58 = vld [vmem:[#allocation7 + $0x1968] sm:$0xff]  ;;  %v4771_v59 = vpack.c.bf16 %v1863_v53, %v1859_v51  ;;  %v5299_v53 = vpack.c.bf16 %v1897_v44, %v1893_v52  ;;  %v1935_v44 = vld [vmem:[#allocation7 + $0x1b60] sm:$0xff] }
 0x2cf   :  { %2525 = vmatmul.mubr.f32.vlgmr.msra.gmra.mrb[8].mxu0 %v1053_v20  ;;  %v4773_v63 = vpack.c.bf16 %v1872_v58, %v1868_v60  ;;  %v1901_v60 = vld [vmem:[#allocation7 + $0x1a50] sm:$0xff] }
 0x2d0   :  { %3093 = vmatmul.mubr.f32.vlgmr.msra.gmra.mrb[8].mxu1 %v1053_v20  ;;  %4756 = vmatpush1.bf16.msra.mxu0 %v4755_v4  ;;  %v1869_v4 = vld [vmem:[#allocation7 + $0x1950] sm:$0xff]  ;;  %v1876_v20 = vld [vmem:[#allocation7 + $0x1988] sm:$0xff]  ;;  %v5303_v3 = vpack.c.bf16 %v1905_v9, %v1901_v60  ;;  %v1943_v9 = vld [vmem:[#allocation7 + $0x1ba0] sm:$0xff] }
 0x2d1   :  { %2595 = vmatprep.mubr.f32.mxu0 %v1056_v23  ;;  %5268 = vmatpush1.bf16.msra.mxu1 %v5267_v45  ;;  %v1880_v45 = vld [vmem:[#allocation7 + $0x19a8] sm:$0xff] }
 0x2d2   :  { %3163 = vmatprep.mubr.f32.mxu1 %v1056_v23  ;;  %4758 = vmatprep.subr.bf16.mxu0 %v4757_v14  ;;  %v5287_v14 = vpack.c.bf16 %v1873_v8, %v1869_v4  ;;  %v4777_v43 = vpack.c.bf16 %v1880_v45, %v1876_v20  ;;  %v1877_v23 = vld [vmem:[#allocation7 + $0x1990] sm:$0xff]  ;;  %v1911_v8 = vld [vmem:[#allocation7 + $0x1aa0] sm:$0xff] }
 0x2d3   :  { %5270 = vmatprep.subr.bf16.mxu1 %v5269_v24  ;;  %v5289_v24 = vpack.c.bf16 %v1882_v12, %v1878_v11  ;;  %v5291_v32 = vpack.c.bf16 %v1881_v25, %v1877_v23  ;;  %v1909_v20 = vld [vmem:[#allocation7 + $0x1a90] sm:$0xff]  ;;  %v1916_v12 = vld [vmem:[#allocation7 + $0x1ac8] sm:$0xff]  ;;  %v1919_v25 = vld [vmem:[#allocation7 + $0x1ae0] sm:$0xff] }
 0x2d4   :  { %4760 = vmatpush1.bf16.msra.mxu0 %v4759_v41  ;;  %v1888_v41 = vld [vmem:[#allocation7 + $0x19e8] sm:$0xff]  ;;  %v1913_v11 = vld [vmem:[#allocation7 + $0x1ab0] sm:$0xff] }
 0x2d5   :  { %5272 = vmatpush1.bf16.msra.mxu1 %v5271_v27  ;;  %4762 = vmatprep.subr.bf16.mxu0 %v4761_v28  ;;  %v1886_v27 = vld [vmem:[#allocation7 + $0x19d8] sm:$0xff]  ;;  %v4781_v33 = vpack.c.bf16 %v1888_v41, %v1884_v26  ;;  %v5307_v22 = vpack.c.bf16 %v1913_v11, %v1909_v20  ;;  %v1917_v26 = vld [vmem:[#allocation7 + $0x1ad0] sm:$0xff]  ;;  %v1951_v11 = vld [vmem:[#allocation7 + $0x1be0] sm:$0xff] }
 0x2d6   :  { %5274 = vmatprep.subr.bf16.mxu1 %v5273_v16  ;;  %v1890_v28 = vld [vmem:[#allocation7 + $0x19f8] sm:$0xff]  ;;  %v1883_v16 = vld [vmem:[#allocation7 + $0x19c0] sm:$0xff] }
 0x2d7   :  { %v5293_v15 = vpack.c.bf16 %v1890_v28, %v1886_v27  ;;  %v4783_v35 = vpack.c.bf16 %v1887_v36, %v1883_v16  ;;  %v1921_v27 = vld [vmem:[#allocation7 + $0x1af0] sm:$0xff]  ;;  %v1924_v28 = vld [vmem:[#allocation7 + $0x1b08] sm:$0xff] }
 0x2d8   :  { %4764 = vmatpush1.bf16.msra.mxu0 %v4763_v34  ;;  %v1896_v34 = vld [vmem:[#allocation7 + $0x1a28] sm:$0xff]  ;;  %v5311_v36 = vpack.c.bf16 %v1921_v27, %v1917_v26  ;;  %v1959_v27 = vld [vmem:[#allocation7 + $0x1c20] sm:$0xff] }
 0x2d9   :  { %5276 = vmatpush1.bf16.msra.mxu1 %v5275_v6  ;;  %4766 = vmatprep.subr.bf16.mxu0 %v4765_v0  ;;  %v1894_v6 = vld [vmem:[#allocation7 + $0x1a18] sm:$0xff]  ;;  %v4785_v39 = vpack.c.bf16 %v1896_v34, %v1892_v30  ;;  %v1925_v30 = vld [vmem:[#allocation7 + $0x1b10] sm:$0xff] }
 0x2da   :  { %5278 = vmatprep.subr.bf16.mxu1 %v5277_v40  ;;  %v1898_v0 = vld [vmem:[#allocation7 + $0x1a38] sm:$0xff]  ;;  %v1891_v40 = vld [vmem:[#allocation7 + $0x1a00] sm:$0xff] }
 0x2db   :  { %v5297_v42 = vpack.c.bf16 %v1898_v0, %v1894_v6  ;;  %v4787_v51 = vpack.c.bf16 %v1895_v50, %v1891_v40  ;;  %v1929_v6 = vld [vmem:[#allocation7 + $0x1b30] sm:$0xff]  ;;  %v1932_v0 = vld [vmem:[#allocation7 + $0x1b48] sm:$0xff] }
 0x2dc   :  { %4768 = vmatpush1.bf16.msra.mxu0 %v4767_v46  ;;  %v1904_v46 = vld [vmem:[#allocation7 + $0x1a68] sm:$0xff]  ;;  %v5315_v50 = vpack.c.bf16 %v1929_v6, %v1925_v30  ;;  %v1967_v6 = vld [vmem:[#allocation7 + $0x1c60] sm:$0xff] }
 0x2dd   :  { %5280 = vmatpush1.bf16.msra.mxu1 %v5279_v48  ;;  %4770 = vmatprep.subr.bf16.mxu0 %v4769_v49  ;;  %v1902_v48 = vld [vmem:[#allocation7 + $0x1a58] sm:$0xff]  ;;  %v4789_v55 = vpack.c.bf16 %v1904_v46, %v1900_v10  ;;  %v1933_v10 = vld [vmem:[#allocation7 + $0x1b50] sm:$0xff] }
 0x2de   :  { %5282 = vmatprep.subr.bf16.mxu1 %v5281_v56  ;;  %v1906_v49 = vld [vmem:[#allocation7 + $0x1a78] sm:$0xff]  ;;  %v1899_v56 = vld [vmem:[#allocation7 + $0x1a40] sm:$0xff] }
 0x2df   :  { %v5301_v58 = vpack.c.bf16 %v1906_v49, %v1902_v48  ;;  %v4791_v2 = vpack.c.bf16 %v1903_v57, %v1899_v56  ;;  %v1937_v48 = vld [vmem:[#allocation7 + $0x1b70] sm:$0xff]  ;;  %v1940_v49 = vld [vmem:[#allocation7 + $0x1b88] sm:$0xff] }
 0x2e0   :  { %4772 = vmatpush1.bf16.msra.mxu0 %v4771_v59  ;;  %v1912_v59 = vld [vmem:[#allocation7 + $0x1aa8] sm:$0xff]  ;;  %v5319_v57 = vpack.c.bf16 %v1937_v48, %v1933_v10  ;;  %v1971_v48 = vld [vmem:[#allocation7 + $0x1c80] sm:$0xff] }
 0x2e1   :  { %5284 = vmatpush1.bf16.msra.mxu1 %v5283_v61  ;;  %4774 = vmatprep.subr.bf16.mxu0 %v4773_v63  ;;  %v1910_v61 = vld [vmem:[#allocation7 + $0x1a98] sm:$0xff]  ;;  %v4793_v4 = vpack.c.bf16 %v1912_v59, %v1908_v54  ;;  %v1941_v54 = vld [vmem:[#allocation7 + $0x1b90] sm:$0xff] }
 0x2e2   :  { %5286 = vmatprep.subr.bf16.mxu1 %v5285_v5  ;;  %v1914_v63 = vld [vmem:[#allocation7 + $0x1ab8] sm:$0xff]  ;;  %v1907_v5 = vld [vmem:[#allocation7 + $0x1a80] sm:$0xff] }
 0x2e3   :  { %v5305_v45 = vpack.c.bf16 %v1914_v63, %v1910_v61  ;;  %v4795_v17 = vpack.c.bf16 %v1911_v8, %v1907_v5  ;;  %v1945_v61 = vld [vmem:[#allocation7 + $0x1bb0] sm:$0xff]  ;;  %v1948_v63 = vld [vmem:[#allocation7 + $0x1bc8] sm:$0xff] }
 0x2e4   :  { %4776 = vmatpush1.bf16.msra.mxu0 %v4775_v13  ;;  %v1920_v13 = vld [vmem:[#allocation7 + $0x1ae8] sm:$0xff]  ;;  %v5323_v8 = vpack.c.bf16 %v1945_v61, %v1941_v54  ;;  %v1983_v61 = vld [vmem:[#allocation7 + $0x1ce0] sm:$0xff] }
 0x2e5   :  { %5288 = vmatpush1.bf16.msra.mxu1 %v5287_v14  ;;  %4778 = vmatprep.subr.bf16.mxu0 %v4777_v43  ;;  %v1918_v14 = vld [vmem:[#allocation7 + $0x1ad8] sm:$0xff]  ;;  %v4797_v23 = vpack.c.bf16 %v1920_v13, %v1916_v12  ;;  %v1949_v12 = vld [vmem:[#allocation7 + $0x1bd0] sm:$0xff] }
 0x2e6   :  { %5290 = vmatprep.subr.bf16.mxu1 %v5289_v24  ;;  %v1922_v43 = vld [vmem:[#allocation7 + $0x1af8] sm:$0xff]  ;;  %v1915_v24 = vld [vmem:[#allocation7 + $0x1ac0] sm:$0xff] }
 0x2e7   :  { %v5309_v41 = vpack.c.bf16 %v1922_v43, %v1918_v14  ;;  %v4799_v16 = vpack.c.bf16 %v1919_v25, %v1915_v24  ;;  %v1953_v14 = vld [vmem:[#allocation7 + $0x1bf0] sm:$0xff]  ;;  %v1956_v43 = vld [vmem:[#allocation7 + $0x1c08] sm:$0xff] }
 0x2e8   :  { %4780 = vmatpush1.bf16.msra.mxu0 %v4779_v29  ;;  %v1928_v29 = vld [vmem:[#allocation7 + $0x1b28] sm:$0xff]  ;;  %v5327_v25 = vpack.c.bf16 %v1953_v14, %v1949_v12  ;;  %v1991_v14 = vld [vmem:[#allocation7 + $0x1d20] sm:$0xff] }
 0x2e9   :  { %5292 = vmatpush1.bf16.msra.mxu1 %v5291_v32  ;;  %4782 = vmatprep.subr.bf16.mxu0 %v4781_v33  ;;  %v1926_v32 = vld [vmem:[#allocation7 + $0x1b18] sm:$0xff]  ;;  %v4801_v37 = vpack.c.bf16 %v1928_v29, %v1924_v28  ;;  %v1957_v29 = vld [vmem:[#allocation7 + $0x1c10] sm:$0xff] }
 0x2ea   :  { %5294 = vmatprep.subr.bf16.mxu1 %v5293_v15  ;;  %v1930_v33 = vld [vmem:[#allocation7 + $0x1b38] sm:$0xff]  ;;  %v1923_v15 = vld [vmem:[#allocation7 + $0x1b00] sm:$0xff] }
 0x2eb   :  { %v5313_v34 = vpack.c.bf16 %v1930_v33, %v1926_v32  ;;  %v4803_v40 = vpack.c.bf16 %v1927_v18, %v1923_v15  ;;  %v1961_v32 = vld [vmem:[#allocation7 + $0x1c30] sm:$0xff]  ;;  %v1964_v33 = vld [vmem:[#allocation7 + $0x1c48] sm:$0xff]  ;;  %v1970_v15 = vld [vmem:[#allocation7 + $0x1c78] sm:$0xff]  ;;  %v1055_v18 = vmax.f32 %v6229_v1, 0.0 }
 0x2ec   :  { %4784 = vmatpush1.bf16.msra.mxu0 %v4783_v35  ;;  %v1936_v35 = vld [vmem:[#allocation7 + $0x1b68] sm:$0xff]  ;;  %v5331_v30 = vpack.c.bf16 %v1961_v32, %v1957_v29  ;;  %v1995_v29 = vld [vmem:[#allocation7 + $0x1d40] sm:$0xff] }
 0x2ed   :  { %5296 = vmatpush1.bf16.msra.mxu1 %v5295_v38  ;;  %4786 = vmatprep.subr.bf16.mxu0 %v4785_v39  ;;  %v1934_v38 = vld [vmem:[#allocation7 + $0x1b58] sm:$0xff]  ;;  %v4805_v52 = vpack.c.bf16 %v1936_v35, %v1932_v0  ;;  %v1965_v0 = vld [vmem:[#allocation7 + $0x1c50] sm:$0xff]  ;;  %v1999_v32 = vld [vmem:[#allocation7 + $0x1d60] sm:$0xff] }
 0x2ee   :  { %5298 = vmatprep.subr.bf16.mxu1 %v5297_v42  ;;  %v1938_v39 = vld [vmem:[#allocation7 + $0x1b78] sm:$0xff]  ;;  %v1931_v42 = vld [vmem:[#allocation7 + $0x1b40] sm:$0xff] }
 0x2ef   :  { %v5317_v46 = vpack.c.bf16 %v1938_v39, %v1934_v38  ;;  %v4807_v56 = vpack.c.bf16 %v1935_v44, %v1931_v42  ;;  %v1969_v38 = vld [vmem:[#allocation7 + $0x1c70] sm:$0xff]  ;;  %v1972_v39 = vld [vmem:[#allocation7 + $0x1c88] sm:$0xff]  ;;  %v1974_v42 = vld [vmem:[#allocation7 + $0x1c98] sm:$0xff] }
 0x2f0   :  { %4788 = vmatpush1.bf16.msra.mxu0 %v4787_v51  ;;  %v1944_v51 = vld [vmem:[#allocation7 + $0x1ba8] sm:$0xff]  ;;  %v1978_v44 = vld [vmem:[#allocation7 + $0x1cb8] sm:$0xff]  ;;  %v5335_v10 = vpack.c.bf16 %v1969_v38, %v1965_v0  ;;  %v2007_v38 = vld [vmem:[#allocation7 + $0x1da0] sm:$0xff] }
 0x2f1   :  { %5300 = vmatpush1.bf16.msra.mxu1 %v5299_v53  ;;  %4790 = vmatprep.subr.bf16.mxu0 %v4789_v55  ;;  %v1942_v53 = vld [vmem:[#allocation7 + $0x1b98] sm:$0xff]  ;;  %v4809_v60 = vpack.c.bf16 %v1944_v51, %v1940_v49  ;;  %v1975_v49 = vld [vmem:[#allocation7 + $0x1ca0] sm:$0xff]  ;;  %v1973_v51 = vld [vmem:[#allocation7 + $0x1c90] sm:$0xff] }
 0x2f2   :  { %5302 = vmatprep.subr.bf16.mxu1 %v5301_v58  ;;  %v1946_v55 = vld [vmem:[#allocation7 + $0x1bb8] sm:$0xff]  ;;  %v1939_v58 = vld [vmem:[#allocation7 + $0x1b80] sm:$0xff] }
 0x2f3   :  { %v5321_v59 = vpack.c.bf16 %v1946_v55, %v1942_v53  ;;  %v4811_v5 = vpack.c.bf16 %v1943_v9, %v1939_v58  ;;  %v5337_v53 = vpack.c.bf16 %v1978_v44, %v1974_v42  ;;  %v1977_v55 = vld [vmem:[#allocation7 + $0x1cb0] sm:$0xff]  ;;  %v4827_v58 = vpack.c.bf16 %v1975_v49, %v1971_v48  ;;  %v2016_v42 = vld [vmem:[#allocation7 + $0x1de8] sm:$0xff]  ;;  %v2014_v44 = vld [vmem:[#allocation7 + $0x1dd8] sm:$0xff] }
 0x2f4   :  { %4792 = vmatpush1.bf16.msra.mxu0 %v4791_v2  ;;  %v1952_v2 = vld [vmem:[#allocation7 + $0x1be8] sm:$0xff]  ;;  %v5339_v9 = vpack.c.bf16 %v1977_v55, %v1973_v51  ;;  %v2011_v49 = vld [vmem:[#allocation7 + $0x1dc0] sm:$0xff] }
 0x2f5   :  { %5304 = vmatpush1.bf16.msra.mxu1 %v5303_v3  ;;  %4794 = vmatprep.subr.bf16.mxu0 %v4793_v4  ;;  %v1950_v3 = vld [vmem:[#allocation7 + $0x1bd8] sm:$0xff]  ;;  %v4813_v20 = vpack.c.bf16 %v1952_v2, %v1948_v63  ;;  %v1981_v63 = vld [vmem:[#allocation7 + $0x1cd0] sm:$0xff]  ;;  %v2015_v51 = vld [vmem:[#allocation7 + $0x1de0] sm:$0xff] }
 0x2f6   :  { %5306 = vmatprep.subr.bf16.mxu1 %v5305_v45  ;;  %v1954_v4 = vld [vmem:[#allocation7 + $0x1bf8] sm:$0xff]  ;;  %v1947_v45 = vld [vmem:[#allocation7 + $0x1bc0] sm:$0xff] }
 0x2f7   :  { %v5325_v13 = vpack.c.bf16 %v1954_v4, %v1950_v3  ;;  %v4815_v24 = vpack.c.bf16 %v1951_v11, %v1947_v45  ;;  %v1985_v3 = vld [vmem:[#allocation7 + $0x1cf0] sm:$0xff]  ;;  %v1988_v4 = vld [vmem:[#allocation7 + $0x1d08] sm:$0xff] }
 0x2f8   :  { %4796 = vmatpush1.bf16.msra.mxu0 %v4795_v17  ;;  %v1960_v17 = vld [vmem:[#allocation7 + $0x1c28] sm:$0xff]  ;;  %v5343_v11 = vpack.c.bf16 %v1985_v3, %v1981_v63  ;;  %v2023_v63 = vld [vmem:[#allocation7 + $0x1e20] sm:$0xff] }
 0x2f9   :  { %5308 = vmatpush1.bf16.msra.mxu1 %v5307_v22  ;;  %4798 = vmatprep.subr.bf16.mxu0 %v4797_v23  ;;  %v1958_v22 = vld [vmem:[#allocation7 + $0x1c18] sm:$0xff]  ;;  %v4817_v26 = vpack.c.bf16 %v1960_v17, %v1956_v43  ;;  %v1989_v43 = vld [vmem:[#allocation7 + $0x1d10] sm:$0xff] }
 0x2fa   :  { %5310 = vmatprep.subr.bf16.mxu1 %v5309_v41  ;;  %v1962_v23 = vld [vmem:[#allocation7 + $0x1c38] sm:$0xff]  ;;  %v1955_v41 = vld [vmem:[#allocation7 + $0x1c00] sm:$0xff] }
 0x2fb   :  { %v5329_v28 = vpack.c.bf16 %v1962_v23, %v1958_v22  ;;  %v1993_v22 = vld [vmem:[#allocation7 + $0x1d30] sm:$0xff]  ;;  %v1996_v23 = vld [vmem:[#allocation7 + $0x1d48] sm:$0xff] }
 0x2fc   :  { %4800 = vmatpush1.bf16.msra.mxu0 %v4799_v16  ;;  %v1968_v16 = vld [vmem:[#allocation7 + $0x1c68] sm:$0xff] }
 0x2fd   :  { %5312 = vmatpush1.bf16.msra.mxu1 %v5311_v36  ;;  %4802 = vmatprep.subr.bf16.mxu0 %v4801_v37  ;;  %v4819_v36 = vpack.c.bf16 %v1959_v27, %v1955_v41  ;;  %v1966_v37 = vld [vmem:[#allocation7 + $0x1c58] sm:$0xff]  ;;  %v4821_v35 = vpack.c.bf16 %v1968_v16, %v1964_v33  ;;  %v5347_v27 = vpack.c.bf16 %v1993_v22, %v1989_v43  ;;  %v1997_v33 = vld [vmem:[#allocation7 + $0x1d50] sm:$0xff]  ;;  %v2031_v43 = vld [vmem:[#allocation7 + $0x1e60] sm:$0xff] }
 0x2fe   :  { %5314 = vmatprep.subr.bf16.mxu1 %v5313_v34  ;;  %v1963_v34 = vld [vmem:[#allocation7 + $0x1c40] sm:$0xff] }
 0x2ff   :  { %v4823_v1 = vpack.c.bf16 %v1967_v6, %v1963_v34  ;;  %v4839_v34 = vpack.c.bf16 %v1999_v32, %v1995_v29  ;;  %v2035_v32 = vld [vmem:[#allocation7 + $0x1e80] sm:$0xff] }
 0x300   :  { %4804 = vmatpush1.bf16.msra.mxu0 %v4803_v40  ;;  %v1976_v40 = vld [vmem:[#allocation7 + $0x1ca8] sm:$0xff] }
 0x301   :  { %5316 = vmatpush1.bf16.msra.mxu1 %v5315_v50  ;;  %4806 = vmatprep.subr.bf16.mxu0 %v4805_v52  ;;  %v1058_v50 = vmax.f32 %v6243_v7, 0.0  ;;  %v5333_v52 = vpack.c.bf16 %v1970_v15, %v1966_v37  ;;  %v1984_v7 = vld [vmem:[#allocation7 + $0x1ce8] sm:$0xff] }
 0x302   :  { %5318 = vmatprep.subr.bf16.mxu1 %v5317_v46  ;;  %v4825_v46 = vpack.c.bf16 %v1976_v40, %v1972_v39  ;;  %v2004_v37 = vld [vmem:[#allocation7 + $0x1d88] sm:$0xff]  ;;  %v2005_v39 = vld [vmem:[#allocation7 + $0x1d90] sm:$0xff] }
 0x303   :  { %v2008_v15 = vld [vmem:[#allocation7 + $0x1da8] sm:$0xff] }
 0x304   :  { %4808 = vmatpush1.bf16.msra.mxu0 %v4807_v56  ;;  %v1980_v56 = vld [vmem:[#allocation7 + $0x1cc8] sm:$0xff]  ;;  %v4841_v0 = vpack.c.bf16 %v2008_v15, %v2004_v37  ;;  %v2041_v37 = vld [vmem:[#allocation7 + $0x1eb0] sm:$0xff] }
 0x305   :  { %5320 = vmatpush1.bf16.msra.mxu1 %v5319_v57  ;;  %4810 = vmatprep.subr.bf16.mxu0 %v4809_v60  ;;  %v1982_v57 = vld [vmem:[#allocation7 + $0x1cd8] sm:$0xff]  ;;  %v4829_v54 = vpack.c.bf16 %v1984_v7, %v1980_v56  ;;  %v2017_v56 = vld [vmem:[#allocation7 + $0x1df0] sm:$0xff]  ;;  %v2020_v7 = vld [vmem:[#allocation7 + $0x1e08] sm:$0xff] }
 0x306   :  { %5322 = vmatprep.subr.bf16.mxu1 %v5321_v59  ;;  %v1986_v60 = vld [vmem:[#allocation7 + $0x1cf8] sm:$0xff]  ;;  %v1979_v59 = vld [vmem:[#allocation7 + $0x1cc0] sm:$0xff]  ;;  %v2044_v15 = vld [vmem:[#allocation7 + $0x1ec8] sm:$0xff] }
 0x307   :  { %v5341_v2 = vpack.c.bf16 %v1986_v60, %v1982_v57  ;;  %v4831_v45 = vpack.c.bf16 %v1983_v61, %v1979_v59  ;;  %v2024_v57 = vld [vmem:[#allocation7 + $0x1e28] sm:$0xff]  ;;  %v2022_v60 = vld [vmem:[#allocation7 + $0x1e18] sm:$0xff]  ;;  %v2019_v61 = vld [vmem:[#allocation7 + $0x1e00] sm:$0xff] }
 0x308   :  { %4812 = vmatpush1.bf16.msra.mxu0 %v4811_v5  ;;  %v1992_v5 = vld [vmem:[#allocation7 + $0x1d28] sm:$0xff]  ;;  %v4849_v59 = vpack.c.bf16 %v2024_v57, %v2020_v7  ;;  %v2057_v7 = vld [vmem:[#allocation7 + $0x1f30] sm:$0xff] }
 0x309   :  { %5324 = vmatpush1.bf16.msra.mxu1 %v5323_v8  ;;  %4814 = vmatprep.subr.bf16.mxu0 %v4813_v20  ;;  %v1990_v8 = vld [vmem:[#allocation7 + $0x1d18] sm:$0xff]  ;;  %v4833_v12 = vpack.c.bf16 %v1992_v5, %v1988_v4  ;;  %v2025_v4 = vld [vmem:[#allocation7 + $0x1e30] sm:$0xff]  ;;  %v2028_v5 = vld [vmem:[#allocation7 + $0x1e48] sm:$0xff] }
 0x30a   :  { %5326 = vmatprep.subr.bf16.mxu1 %v5325_v13  ;;  %v1994_v20 = vld [vmem:[#allocation7 + $0x1d38] sm:$0xff]  ;;  %v1987_v13 = vld [vmem:[#allocation7 + $0x1d00] sm:$0xff]  ;;  %v2060_v57 = vld [vmem:[#allocation7 + $0x1f48] sm:$0xff] }
 0x30b   :  { %v5345_v17 = vpack.c.bf16 %v1994_v20, %v1990_v8  ;;  %v4835_v41 = vpack.c.bf16 %v1991_v14, %v1987_v13  ;;  %v2032_v8 = vld [vmem:[#allocation7 + $0x1e68] sm:$0xff]  ;;  %v2030_v20 = vld [vmem:[#allocation7 + $0x1e58] sm:$0xff]  ;;  %v2027_v14 = vld [vmem:[#allocation7 + $0x1e40] sm:$0xff] }
 0x30c   :  { %4816 = vmatpush1.bf16.msra.mxu0 %v4815_v24  ;;  %v2000_v24 = vld [vmem:[#allocation7 + $0x1d68] sm:$0xff]  ;;  %v4853_v13 = vpack.c.bf16 %v2032_v8, %v2028_v5  ;;  %v2065_v5 = vld [vmem:[#allocation7 + $0x1f70] sm:$0xff] }
 0x30d   :  { %5328 = vmatpush1.bf16.msra.mxu1 %v5327_v25  ;;  %4818 = vmatprep.subr.bf16.mxu0 %v4817_v26  ;;  %v1998_v25 = vld [vmem:[#allocation7 + $0x1d58] sm:$0xff]  ;;  %v2068_v8 = vld [vmem:[#allocation7 + $0x1f88] sm:$0xff] }
 0x30e   :  { %5330 = vmatprep.subr.bf16.mxu1 %v5329_v28  ;;  %v2002_v26 = vld [vmem:[#allocation7 + $0x1d78] sm:$0xff]  ;;  %v4837_v28 = vpack.c.bf16 %v2000_v24, %v1996_v23  ;;  %v2033_v23 = vld [vmem:[#allocation7 + $0x1e70] sm:$0xff]  ;;  %v2036_v24 = vld [vmem:[#allocation7 + $0x1e88] sm:$0xff] }
 0x30f   :  { %2596 = vmatmul.mubr.f32.vlgmr.msra.gmra.mrb[8].mxu0 %v1055_v18  ;;  %v5349_v16 = vpack.c.bf16 %v2002_v26, %v1998_v25  ;;  %v2040_v25 = vld [vmem:[#allocation7 + $0x1ea8] sm:$0xff]  ;;  %v2038_v26 = vld [vmem:[#allocation7 + $0x1e98] sm:$0xff] }
 0x310   :  { %3164 = vmatmul.mubr.f32.vlgmr.msra.gmra.mrb[8].mxu1 %v1055_v18  ;;  %4820 = vmatpush1.bf16.msra.mxu0 %v4819_v36  ;;  %v2001_v36 = vld [vmem:[#allocation7 + $0x1d70] sm:$0xff]  ;;  %v2006_v18 = vld [vmem:[#allocation7 + $0x1d98] sm:$0xff]  ;;  %v4857_v29 = vpack.c.bf16 %v2040_v25, %v2036_v24  ;;  %v2076_v25 = vld [vmem:[#allocation7 + $0x1fc8] sm:$0xff] }
 0x311   :  { %2666 = vmatprep.mubr.f32.mxu0 %v1058_v50  ;;  %5332 = vmatpush1.bf16.msra.mxu1 %v5331_v30  ;;  %v2010_v30 = vld [vmem:[#allocation7 + $0x1db8] sm:$0xff]  ;;  %v5351_v6 = vpack.c.bf16 %v2001_v36, %v1997_v33  ;;  %v2039_v33 = vld [vmem:[#allocation7 + $0x1ea0] sm:$0xff]  ;;  %v2073_v24 = vld [vmem:[#allocation7 + $0x1fb0] sm:$0xff] }
 0x312   :  { %3234 = vmatprep.mubr.f32.mxu1 %v1058_v50  ;;  %4822 = vmatprep.subr.bf16.mxu0 %v4821_v35  ;;  %v2003_v35 = vld [vmem:[#allocation7 + $0x1d80] sm:$0xff]  ;;  %v5353_v40 = vpack.c.bf16 %v2010_v30, %v2006_v18  ;;  %v2009_v50 = vld [vmem:[#allocation7 + $0x1db0] sm:$0xff]  ;;  %v2048_v18 = vld [vmem:[#allocation7 + $0x1ee8] sm:$0xff] }
 0x313   :  { %5334 = vmatprep.subr.bf16.mxu1 %v5333_v52  ;;  %v2012_v52 = vld [vmem:[#allocation7 + $0x1dc8] sm:$0xff]  ;;  %v2046_v30 = vld [vmem:[#allocation7 + $0x1ed8] sm:$0xff] }
 0x314   :  { %4824 = vmatpush1.bf16.msra.mxu0 %v4823_v1  ;;  %v2018_v1 = vld [vmem:[#allocation7 + $0x1df8] sm:$0xff]  ;;  %v4845_v48 = vpack.c.bf16 %v2016_v42, %v2012_v52  ;;  %v2049_v52 = vld [vmem:[#allocation7 + $0x1ef0] sm:$0xff]  ;;  %v2052_v42 = vld [vmem:[#allocation7 + $0x1f08] sm:$0xff] }
 0x315   :  { %5336 = vmatpush1.bf16.msra.mxu1 %v5335_v10  ;;  %4826 = vmatprep.subr.bf16.mxu0 %v4825_v46  ;;  %v4843_v10 = vpack.c.bf16 %v2007_v38, %v2003_v35  ;;  %v5355_v46 = vpack.c.bf16 %v2009_v50, %v2005_v39  ;;  %v5357_v55 = vpack.c.bf16 %v2018_v1, %v2014_v44  ;;  %v2043_v38 = vld [vmem:[#allocation7 + $0x1ec0] sm:$0xff]  ;;  %v2056_v44 = vld [vmem:[#allocation7 + $0x1f28] sm:$0xff]  ;;  %v2054_v1 = vld [vmem:[#allocation7 + $0x1f18] sm:$0xff] }
 0x316   :  { %5338 = vmatprep.subr.bf16.mxu1 %v5337_v53  ;;  %v2013_v53 = vld [vmem:[#allocation7 + $0x1dd0] sm:$0xff]  ;;  %v4861_v35 = vpack.c.bf16 %v2048_v18, %v2044_v15  ;;  %v2047_v39 = vld [vmem:[#allocation7 + $0x1ee0] sm:$0xff] }
 0x317   :  { %v2081_v15 = vld [vmem:[#allocation7 + $0x1ff0] sm:$0xff] }
 0x318   :  { %4828 = vmatpush1.bf16.msra.mxu0 %v4827_v58  ;;  %v2026_v58 = vld [vmem:[#allocation7 + $0x1e38] sm:$0xff]  ;;  %v3246_v18 = vld [vmem:[#allocation10 + $0x8] sm:$0xff] }
 0x319   :  { %5340 = vmatpush1.bf16.msra.mxu1 %v5339_v9  ;;  %4830 = vmatprep.subr.bf16.mxu0 %v4829_v54  ;;  %v4847_v9 = vpack.c.bf16 %v2015_v51, %v2011_v49  ;;  %v5359_v54 = vpack.c.bf16 %v2017_v56, %v2013_v53  ;;  %v5361_v3 = vpack.c.bf16 %v2026_v58, %v2022_v60  ;;  %v2051_v51 = vld [vmem:[#allocation7 + $0x1f00] sm:$0xff]  ;;  %v2064_v60 = vld [vmem:[#allocation7 + $0x1f68] sm:$0xff]  ;;  %v2062_v58 = vld [vmem:[#allocation7 + $0x1f58] sm:$0xff] }
 0x31a   :  { %5342 = vmatprep.subr.bf16.mxu1 %v5341_v2  ;;  %v2021_v2 = vld [vmem:[#allocation7 + $0x1e10] sm:$0xff]  ;;  %v4865_v49 = vpack.c.bf16 %v2056_v44, %v2052_v42  ;;  %v2055_v53 = vld [vmem:[#allocation7 + $0x1f20] sm:$0xff] }
 0x31b   :  { %v3251_v42 = vld [vmem:[#allocation10 + $0x30] sm:$0xff]  ;;  %v3254_v44 = vld [vmem:[#allocation10 + $0x48] sm:$0xff] }
 0x31c   :  { %4832 = vmatpush1.bf16.msra.mxu0 %v4831_v45  ;;  %v2034_v45 = vld [vmem:[#allocation7 + $0x1e78] sm:$0xff] }
 0x31d   :  { %5344 = vmatpush1.bf16.msra.mxu1 %v5343_v11  ;;  %4834 = vmatprep.subr.bf16.mxu0 %v4833_v12  ;;  %v4851_v11 = vpack.c.bf16 %v2023_v63, %v2019_v61  ;;  %v5363_v12 = vpack.c.bf16 %v2025_v4, %v2021_v2  ;;  %v5365_v22 = vpack.c.bf16 %v2034_v45, %v2030_v20  ;;  %v2059_v63 = vld [vmem:[#allocation7 + $0x1f40] sm:$0xff]  ;;  %v2072_v20 = vld [vmem:[#allocation7 + $0x1fa8] sm:$0xff]  ;;  %v2070_v45 = vld [vmem:[#allocation7 + $0x1f98] sm:$0xff] }
 0x31e   :  { %5346 = vmatprep.subr.bf16.mxu1 %v5345_v17  ;;  %v2029_v17 = vld [vmem:[#allocation7 + $0x1e50] sm:$0xff]  ;;  %v4869_v61 = vpack.c.bf16 %v2064_v60, %v2060_v57  ;;  %v2063_v2 = vld [vmem:[#allocation7 + $0x1f60] sm:$0xff] }
 0x31f   :  { %v3259_v60 = vld [vmem:[#allocation10 + $0x70] sm:$0xff] }
 0x320   :  { %4836 = vmatpush1.bf16.msra.mxu0 %v4835_v41  ;;  %v2042_v41 = vld [vmem:[#allocation7 + $0x1eb8] sm:$0xff] }
 0x321   :  { %5348 = vmatpush1.bf16.msra.mxu1 %v5347_v27  ;;  %4838 = vmatprep.subr.bf16.mxu0 %v4837_v28  ;;  %v4855_v27 = vpack.c.bf16 %v2031_v43, %v2027_v14  ;;  %v5367_v28 = vpack.c.bf16 %v2033_v23, %v2029_v17  ;;  %v5369_v36 = vpack.c.bf16 %v2042_v41, %v2038_v26  ;;  %v2067_v43 = vld [vmem:[#allocation7 + $0x1f80] sm:$0xff]  ;;  %v2080_v26 = vld [vmem:[#allocation7 + $0x1fe8] sm:$0xff]  ;;  %v2078_v41 = vld [vmem:[#allocation7 + $0x1fd8] sm:$0xff] }
 0x322   :  { %5350 = vmatprep.subr.bf16.mxu1 %v5349_v16  ;;  %v2037_v16 = vld [vmem:[#allocation7 + $0x1e90] sm:$0xff]  ;;  %v4873_v14 = vpack.c.bf16 %v2072_v20, %v2068_v8  ;;  %v2071_v17 = vld [vmem:[#allocation7 + $0x1fa0] sm:$0xff] }
 0x323   :  { %v3267_v8 = vld [vmem:[#allocation10 + $0xb0] sm:$0xff]  ;;  %v3270_v20 = vld [vmem:[#allocation10 + $0xc8] sm:$0xff] }
 0x324   :  { %4840 = vmatpush1.bf16.msra.mxu0 %v4839_v34  ;;  %v2050_v34 = vld [vmem:[#allocation7 + $0x1ef8] sm:$0xff] }
 0x325   :  { %5352 = vmatpush1.bf16.msra.mxu1 %v5351_v6  ;;  %4842 = vmatprep.subr.bf16.mxu0 %v4841_v0  ;;  %v4859_v6 = vpack.c.bf16 %v2039_v33, %v2035_v32  ;;  %v5371_v0 = vpack.c.bf16 %v2041_v37, %v2037_v16  ;;  %v5373_v50 = vpack.c.bf16 %v2050_v34, %v2046_v30  ;;  %v2075_v33 = vld [vmem:[#allocation7 + $0x1fc0] sm:$0xff]  ;;  %v3250_v30 = vld [vmem:[#allocation10 + $0x28] sm:$0xff] }
 0x326   :  { %5354 = vmatprep.subr.bf16.mxu1 %v5353_v40  ;;  %v2045_v40 = vld [vmem:[#allocation7 + $0x1ed0] sm:$0xff]  ;;  %v4877_v32 = vpack.c.bf16 %v2080_v26, %v2076_v25  ;;  %v2079_v16 = vld [vmem:[#allocation7 + $0x1fe0] sm:$0xff] }
 0x327   :  { %v3248_v34 = vld [vmem:[#allocation10 + $0x18] sm:$0xff]  ;;  %v3275_v25 = vld [vmem:[#allocation10 + $0xf0] sm:$0xff]  ;;  %v3278_v26 = vld [vmem:[#allocation10 + $0x108] sm:$0xff] }
 0x328   :  { %4844 = vmatpush1.bf16.msra.mxu0 %v4843_v10  ;;  %v2058_v10 = vld [vmem:[#allocation7 + $0x1f38] sm:$0xff] }
 0x329   :  { %5356 = vmatpush1.bf16.msra.mxu1 %v5355_v46  ;;  %4846 = vmatprep.subr.bf16.mxu0 %v4845_v48  ;;  %v4863_v46 = vpack.c.bf16 %v2047_v39, %v2043_v38  ;;  %v5375_v48 = vpack.c.bf16 %v2049_v52, %v2045_v40  ;;  %v5377_v56 = vpack.c.bf16 %v2058_v10, %v2054_v1  ;;  %v3245_v39 = vld [vmem:[#allocation10] sm:$0xff]  ;;  %v3258_v1 = vld [vmem:[#allocation10 + $0x68] sm:$0xff]  ;;  %v3256_v10 = vld [vmem:[#allocation10 + $0x58] sm:$0xff] }
 0x32a   :  { %5358 = vmatprep.subr.bf16.mxu1 %v5357_v55  ;;  %v2053_v55 = vld [vmem:[#allocation7 + $0x1f10] sm:$0xff]  ;;  %v5393_v38 = vpack.c.bf16 %v3250_v30, %v3246_v18  ;;  %v3249_v40 = vld [vmem:[#allocation10 + $0x20] sm:$0xff] }
 0x32b   :  { %v3283_v18 = vld [vmem:[#allocation10 + $0x130] sm:$0xff]  ;;  %v3286_v30 = vld [vmem:[#allocation10 + $0x148] sm:$0xff] }
 0x32c   :  { %4848 = vmatpush1.bf16.msra.mxu0 %v4847_v9  ;;  %v2066_v9 = vld [vmem:[#allocation7 + $0x1f78] sm:$0xff] }
 0x32d   :  { %5360 = vmatpush1.bf16.msra.mxu1 %v5359_v54  ;;  %4850 = vmatprep.subr.bf16.mxu0 %v4849_v59  ;;  %v4867_v54 = vpack.c.bf16 %v2055_v53, %v2051_v51  ;;  %v5379_v59 = vpack.c.bf16 %v2057_v7, %v2053_v55  ;;  %v5381_v4 = vpack.c.bf16 %v2066_v9, %v2062_v58  ;;  %v3253_v55 = vld [vmem:[#allocation10 + $0x40] sm:$0xff]  ;;  %v3255_v7 = vld [vmem:[#allocation10 + $0x50] sm:$0xff]  ;;  %v3262_v58 = vld [vmem:[#allocation10 + $0x88] sm:$0xff] }
 0x32e   :  { %5362 = vmatprep.subr.bf16.mxu1 %v5361_v3  ;;  %v2061_v3 = vld [vmem:[#allocation7 + $0x1f50] sm:$0xff]  ;;  %v5397_v53 = vpack.c.bf16 %v3258_v1, %v3254_v44 }
 0x32f   :  { %v3266_v9 = vld [vmem:[#allocation10 + $0xa8] sm:$0xff]  ;;  %v3291_v44 = vld [vmem:[#allocation10 + $0x170] sm:$0xff] }
 0x330   :  { %4852 = vmatpush1.bf16.msra.mxu0 %v4851_v11  ;;  %v2074_v11 = vld [vmem:[#allocation7 + $0x1fb8] sm:$0xff]  ;;  %v3294_v1 = vld [vmem:[#allocation10 + $0x188] sm:$0xff] }
 0x331   :  { %5364 = vmatpush1.bf16.msra.mxu1 %v5363_v12  ;;  %4854 = vmatprep.subr.bf16.mxu0 %v4853_v13  ;;  %v4871_v12 = vpack.c.bf16 %v2063_v2, %v2059_v63  ;;  %v5383_v13 = vpack.c.bf16 %v2065_v5, %v2061_v3  ;;  %v5385_v23 = vpack.c.bf16 %v2074_v11, %v2070_v45  ;;  %v3261_v2 = vld [vmem:[#allocation10 + $0x80] sm:$0xff]  ;;  %v3274_v45 = vld [vmem:[#allocation10 + $0xe8] sm:$0xff]  ;;  %v3272_v11 = vld [vmem:[#allocation10 + $0xd8] sm:$0xff] }
 0x332   :  { %5366 = vmatprep.subr.bf16.mxu1 %v5365_v22  ;;  %v2069_v22 = vld [vmem:[#allocation7 + $0x1f90] sm:$0xff]  ;;  %v5401_v63 = vpack.c.bf16 %v3266_v9, %v3262_v58  ;;  %v3265_v3 = vld [vmem:[#allocation10 + $0xa0] sm:$0xff] }
 0x333   :  { %v3302_v58 = vld [vmem:[#allocation10 + $0x1c8] sm:$0xff] }
 0x334   :  { %4856 = vmatpush1.bf16.msra.mxu0 %v4855_v27  ;;  %v2082_v27 = vld [vmem:[#allocation7 + $0x1ff8] sm:$0xff]  ;;  %v3306_v9 = vld [vmem:[#allocation10 + $0x1e8] sm:$0xff] }
 0x335   :  { %5368 = vmatpush1.bf16.msra.mxu1 %v5367_v28  ;;  %4858 = vmatprep.subr.bf16.mxu0 %v4857_v29  ;;  %v4875_v28 = vpack.c.bf16 %v2071_v17, %v2067_v43  ;;  %v5387_v29 = vpack.c.bf16 %v2073_v24, %v2069_v22  ;;  %v5389_v37 = vpack.c.bf16 %v2082_v27, %v2078_v41  ;;  %v3269_v17 = vld [vmem:[#allocation10 + $0xc0] sm:$0xff]  ;;  %v3282_v41 = vld [vmem:[#allocation10 + $0x128] sm:$0xff]  ;;  %v3280_v27 = vld [vmem:[#allocation10 + $0x118] sm:$0xff] }
 0x336   :  { %5370 = vmatprep.subr.bf16.mxu1 %v5369_v36  ;;  %v2077_v36 = vld [vmem:[#allocation7 + $0x1fd0] sm:$0xff]  ;;  %v5405_v43 = vpack.c.bf16 %v3274_v45, %v3270_v20  ;;  %v3273_v22 = vld [vmem:[#allocation10 + $0xe0] sm:$0xff] }
 0x337   :  { %v3310_v20 = vld [vmem:[#allocation10 + $0x208] sm:$0xff] }
 0x338   :  { %4860 = vmatpush1.bf16.msra.mxu0 %v4859_v6  ;;  %v3252_v6 = vld [vmem:[#allocation10 + $0x38] sm:$0xff]  ;;  %v3314_v45 = vld [vmem:[#allocation10 + $0x228] sm:$0xff] }
 0x339   :  { %5372 = vmatpush1.bf16.msra.mxu1 %v5371_v0  ;;  %4862 = vmatprep.subr.bf16.mxu0 %v4861_v35  ;;  %v4879_v0 = vpack.c.bf16 %v2079_v16, %v2075_v33  ;;  %v5391_v35 = vpack.c.bf16 %v2081_v15, %v2077_v36  ;;  %v5521_v52 = vpack.c.bf16 %v3252_v6, %v3248_v34  ;;  %v3277_v16 = vld [vmem:[#allocation10 + $0x100] sm:$0xff]  ;;  %v3290_v34 = vld [vmem:[#allocation10 + $0x168] sm:$0xff]  ;;  %v3288_v6 = vld [vmem:[#allocation10 + $0x158] sm:$0xff] }
 0x33a   :  { %5374 = vmatprep.subr.bf16.mxu1 %v5373_v50  ;;  %v3247_v50 = vld [vmem:[#allocation10 + $0x10] sm:$0xff]  ;;  %v5409_v33 = vpack.c.bf16 %v3282_v41, %v3278_v26  ;;  %v3281_v36 = vld [vmem:[#allocation10 + $0x120] sm:$0xff]  ;;  %v3318_v26 = vld [vmem:[#allocation10 + $0x248] sm:$0xff] }
 0x33b   :  { %v5523_v51 = vpack.c.bf16 %v3251_v42, %v3247_v50  ;;  %v3289_v50 = vld [vmem:[#allocation10 + $0x160] sm:$0xff]  ;;  %v3322_v41 = vld [vmem:[#allocation10 + $0x268] sm:$0xff] }
 0x33c   :  { %4864 = vmatpush1.bf16.msra.mxu0 %v4863_v46  ;;  %v3260_v46 = vld [vmem:[#allocation10 + $0x78] sm:$0xff] }
 0x33d   :  { %5376 = vmatpush1.bf16.msra.mxu1 %v5375_v48  ;;  %4866 = vmatprep.subr.bf16.mxu0 %v4865_v49  ;;  %v5395_v48 = vpack.c.bf16 %v3249_v40, %v3245_v39  ;;  %v1057_v49 = vmax.f32 %v6241_v62, 0.0  ;;  %v5525_v57 = vpack.c.bf16 %v3260_v46, %v3256_v10  ;;  %v5527_v62 = vpack.c.bf16 %v3259_v60, %v3255_v7  ;;  %v3285_v40 = vld [vmem:[#allocation10 + $0x140] sm:$0xff]  ;;  %v3298_v10 = vld [vmem:[#allocation10 + $0x1a8] sm:$0xff]  ;;  %v3296_v46 = vld [vmem:[#allocation10 + $0x198] sm:$0xff] }
 0x33e   :  { %5378 = vmatprep.subr.bf16.mxu1 %v5377_v56  ;;  %v3257_v56 = vld [vmem:[#allocation10 + $0x60] sm:$0xff]  ;;  %v5413_v39 = vpack.c.bf16 %v3290_v34, %v3286_v30  ;;  %v3295_v7 = vld [vmem:[#allocation10 + $0x190] sm:$0xff]  ;;  %v3326_v30 = vld [vmem:[#allocation10 + $0x288] sm:$0xff] }
 0x33f   :  { %v3299_v60 = vld [vmem:[#allocation10 + $0x1b0] sm:$0xff]  ;;  %v3330_v34 = vld [vmem:[#allocation10 + $0x2a8] sm:$0xff] }
 0x340   :  { %4868 = vmatpush1.bf16.msra.mxu0 %v4867_v54  ;;  %v3264_v54 = vld [vmem:[#allocation10 + $0x98] sm:$0xff] }
 0x341   :  { %5380 = vmatpush1.bf16.msra.mxu1 %v5379_v59  ;;  %4870 = vmatprep.subr.bf16.mxu0 %v4869_v61  ;;  %v3268_v59 = vld [vmem:[#allocation10 + $0xb8] sm:$0xff]  ;;  %v5399_v61 = vpack.c.bf16 %v3257_v56, %v3253_v55  ;;  %v3293_v55 = vld [vmem:[#allocation10 + $0x180] sm:$0xff] }
 0x342   :  { %5382 = vmatprep.subr.bf16.mxu1 %v5381_v4  ;;  %v3263_v4 = vld [vmem:[#allocation10 + $0x90] sm:$0xff]  ;;  %v5529_v5 = vpack.c.bf16 %v3268_v59, %v3264_v54  ;;  %v3297_v56 = vld [vmem:[#allocation10 + $0x1a0] sm:$0xff]  ;;  %v3304_v54 = vld [vmem:[#allocation10 + $0x1d8] sm:$0xff] }
 0x343   :  { %v3308_v59 = vld [vmem:[#allocation10 + $0x1f8] sm:$0xff] }
 0x344   :  { %4872 = vmatpush1.bf16.msra.mxu0 %v4871_v12  ;;  %v3276_v12 = vld [vmem:[#allocation10 + $0xf8] sm:$0xff] }
 0x345   :  { %5384 = vmatpush1.bf16.msra.mxu1 %v5383_v13  ;;  %4874 = vmatprep.subr.bf16.mxu0 %v4873_v14  ;;  %v5403_v13 = vpack.c.bf16 %v3265_v3, %v3261_v2  ;;  %v5531_v14 = vpack.c.bf16 %v3267_v8, %v3263_v4  ;;  %v5533_v24 = vpack.c.bf16 %v3276_v12, %v3272_v11  ;;  %v3301_v2 = vld [vmem:[#allocation10 + $0x1c0] sm:$0xff]  ;;  %v3303_v4 = vld [vmem:[#allocation10 + $0x1d0] sm:$0xff]  ;;  %v3312_v11 = vld [vmem:[#allocation10 + $0x218] sm:$0xff] }
 0x346   :  { %5386 = vmatprep.subr.bf16.mxu1 %v5385_v23  ;;  %v3271_v23 = vld [vmem:[#allocation10 + $0xd0] sm:$0xff]  ;;  %v3305_v3 = vld [vmem:[#allocation10 + $0x1e0] sm:$0xff]  ;;  %v3316_v12 = vld [vmem:[#allocation10 + $0x238] sm:$0xff] }
 0x347   :  { %v3307_v8 = vld [vmem:[#allocation10 + $0x1f0] sm:$0xff] }
 0x348   :  { %4876 = vmatpush1.bf16.msra.mxu0 %v4875_v28  ;;  %v3284_v28 = vld [vmem:[#allocation10 + $0x138] sm:$0xff] }
 0x349   :  { %5388 = vmatpush1.bf16.msra.mxu1 %v5387_v29  ;;  %4878 = vmatprep.subr.bf16.mxu0 %v4877_v32  ;;  %v5407_v29 = vpack.c.bf16 %v3273_v22, %v3269_v17  ;;  %v5535_v32 = vpack.c.bf16 %v3275_v25, %v3271_v23  ;;  %v5537_v15 = vpack.c.bf16 %v3284_v28, %v3280_v27  ;;  %v3309_v17 = vld [vmem:[#allocation10 + $0x200] sm:$0xff]  ;;  %v3311_v23 = vld [vmem:[#allocation10 + $0x210] sm:$0xff]  ;;  %v3320_v27 = vld [vmem:[#allocation10 + $0x258] sm:$0xff] }
 0x34a   :  { %5390 = vmatprep.subr.bf16.mxu1 %v5389_v37  ;;  %v3279_v37 = vld [vmem:[#allocation10 + $0x110] sm:$0xff]  ;;  %v3313_v22 = vld [vmem:[#allocation10 + $0x220] sm:$0xff]  ;;  %v3324_v28 = vld [vmem:[#allocation10 + $0x278] sm:$0xff] }
 0x34b   :  { %v3315_v25 = vld [vmem:[#allocation10 + $0x230] sm:$0xff] }
 0x34c   :  { %4880 = vmatpush1.bf16.msra.mxu0 %v4879_v0  ;;  %v3292_v0 = vld [vmem:[#allocation10 + $0x178] sm:$0xff] }
 0x34d   :  { %5392 = vmatpush1.bf16.msra.mxu1 %v5391_v35  ;;  %5394 = vmatprep.subr.bf16.mxu0 %v5393_v38  ;;  %v5411_v35 = vpack.c.bf16 %v3281_v36, %v3277_v16  ;;  %v5539_v38 = vpack.c.bf16 %v3283_v18, %v3279_v37  ;;  %v5541_v42 = vpack.c.bf16 %v3292_v0, %v3288_v6  ;;  %v3317_v16 = vld [vmem:[#allocation10 + $0x240] sm:$0xff]  ;;  %v3319_v37 = vld [vmem:[#allocation10 + $0x250] sm:$0xff]  ;;  %v3328_v6 = vld [vmem:[#allocation10 + $0x298] sm:$0xff] }
 0x34e   :  { %5522 = vmatprep.subr.bf16.mxu1 %v5521_v52  ;;  %v3287_v52 = vld [vmem:[#allocation10 + $0x150] sm:$0xff]  ;;  %v3321_v36 = vld [vmem:[#allocation10 + $0x260] sm:$0xff]  ;;  %v3332_v0 = vld [vmem:[#allocation10 + $0x2b8] sm:$0xff] }
 0x34f   :  { %2667 = vmatmul.mubr.f32.vlgmr.msra.gmra.mrb[8].mxu0 %v1057_v49  ;;  %v3323_v18 = vld [vmem:[#allocation10 + $0x270] sm:$0xff] }
 0x350   :  { %3235 = vmatmul.mubr.f32.vlgmr.msra.gmra.mrb[8].mxu1 %v1057_v49  ;;  %5396 = vmatpush1.bf16.msra.mxu0 %v5395_v48  ;;  %v3300_v48 = vld [vmem:[#allocation10 + $0x1b8] sm:$0xff]  ;;  %v5415_v49 = vpack.c.bf16 %v3289_v50, %v3285_v40  ;;  %v3325_v40 = vld [vmem:[#allocation10 + $0x280] sm:$0xff] }
 0x351   :  { %5524 = vmatpush1.bf16.msra.mxu1 %v5523_v51  ;;  %5398 = vmatprep.subr.bf16.mxu0 %v5397_v53  ;;  %v5543_v51 = vpack.c.bf16 %v3291_v44, %v3287_v52  ;;  %v5417_v53 = vpack.c.bf16 %v3298_v10, %v3294_v1  ;;  %v3329_v50 = vld [vmem:[#allocation10 + $0x2a0] sm:$0xff]  ;;  %v3327_v52 = vld [vmem:[#allocation10 + $0x290] sm:$0xff]  ;;  %v3334_v1 = vld [vmem:[#allocation10 + $0x2c8] sm:$0xff] }
 0x352   :  { %5526 = vmatprep.subr.bf16.mxu1 %v5525_v57  ;;  %v5545_v57 = vpack.c.bf16 %v3300_v48, %v3296_v46  ;;  %v3331_v44 = vld [vmem:[#allocation10 + $0x2b0] sm:$0xff]  ;;  %v3338_v10 = vld [vmem:[#allocation10 + $0x2e8] sm:$0xff]  ;;  %v3336_v46 = vld [vmem:[#allocation10 + $0x2d8] sm:$0xff] }
 0x353   :  { %v3340_v48 = vld [vmem:[#allocation10 + $0x2f8] sm:$0xff] }
 0x354   :  { %5400 = vmatpush1.bf16.msra.mxu0 %v5399_v61  ;;  %v5419_v61 = vpack.c.bf16 %v3297_v56, %v3293_v55  ;;  %v3333_v55 = vld [vmem:[#allocation10 + $0x2c0] sm:$0xff] }
 0x355   :  { %5528 = vmatpush1.bf16.msra.mxu1 %v5527_v62  ;;  %5402 = vmatprep.subr.bf16.mxu0 %v5401_v63  ;;  %v5547_v62 = vpack.c.bf16 %v3299_v60, %v3295_v7  ;;  %v5421_v63 = vpack.c.bf16 %v3306_v9, %v3302_v58  ;;  %v3337_v56 = vld [vmem:[#allocation10 + $0x2e0] sm:$0xff]  ;;  %v3335_v7 = vld [vmem:[#allocation10 + $0x2d0] sm:$0xff]  ;;  %v3342_v58 = vld [vmem:[#allocation10 + $0x308] sm:$0xff] }
 0x356   :  { %5530 = vmatprep.subr.bf16.mxu1 %v5529_v5  ;;  %v5549_v5 = vpack.c.bf16 %v3308_v59, %v3304_v54  ;;  %v3339_v60 = vld [vmem:[#allocation10 + $0x2f0] sm:$0xff]  ;;  %v3346_v9 = vld [vmem:[#allocation10 + $0x328] sm:$0xff]  ;;  %v3344_v54 = vld [vmem:[#allocation10 + $0x318] sm:$0xff] }
 0x357   :  { %v3348_v59 = vld [vmem:[#allocation10 + $0x338] sm:$0xff] }
 0x358   :  { %5404 = vmatpush1.bf16.msra.mxu0 %v5403_v13  ;;  %v5423_v13 = vpack.c.bf16 %v3305_v3, %v3301_v2  ;;  %v3341_v2 = vld [vmem:[#allocation10 + $0x300] sm:$0xff] }
 0x359   :  { %5532 = vmatpush1.bf16.msra.mxu1 %v5531_v14  ;;  %5406 = vmatprep.subr.bf16.mxu0 %v5405_v43  ;;  %v5551_v14 = vpack.c.bf16 %v3307_v8, %v3303_v4  ;;  %v5425_v43 = vpack.c.bf16 %v3314_v45, %v3310_v20  ;;  %v3345_v3 = vld [vmem:[#allocation10 + $0x320] sm:$0xff]  ;;  %v3343_v4 = vld [vmem:[#allocation10 + $0x310] sm:$0xff]  ;;  %v3350_v20 = vld [vmem:[#allocation10 + $0x348] sm:$0xff] }
 0x35a   :  { %5534 = vmatprep.subr.bf16.mxu1 %v5533_v24  ;;  %v5553_v24 = vpack.c.bf16 %v3316_v12, %v3312_v11  ;;  %v3347_v8 = vld [vmem:[#allocation10 + $0x330] sm:$0xff]  ;;  %v3354_v45 = vld [vmem:[#allocation10 + $0x368] sm:$0xff]  ;;  %v3352_v11 = vld [vmem:[#allocation10 + $0x358] sm:$0xff] }
 0x35b   :  { %v3356_v12 = vld [vmem:[#allocation10 + $0x378] sm:$0xff] }
 0x35c   :  { %5408 = vmatpush1.bf16.msra.mxu0 %v5407_v29  ;;  %v5427_v29 = vpack.c.bf16 %v3313_v22, %v3309_v17  ;;  %v3349_v17 = vld [vmem:[#allocation10 + $0x340] sm:$0xff] }
 0x35d   :  { %5536 = vmatpush1.bf16.msra.mxu1 %v5535_v32  ;;  %5410 = vmatprep.subr.bf16.mxu0 %v5409_v33  ;;  %v5555_v32 = vpack.c.bf16 %v3315_v25, %v3311_v23  ;;  %v5429_v33 = vpack.c.bf16 %v3322_v41, %v3318_v26  ;;  %v3353_v22 = vld [vmem:[#allocation10 + $0x360] sm:$0xff]  ;;  %v3351_v23 = vld [vmem:[#allocation10 + $0x350] sm:$0xff]  ;;  %v3358_v26 = vld [vmem:[#allocation10 + $0x388] sm:$0xff] }
 0x35e   :  { %5538 = vmatprep.subr.bf16.mxu1 %v5537_v15  ;;  %v5557_v15 = vpack.c.bf16 %v3324_v28, %v3320_v27  ;;  %v3355_v25 = vld [vmem:[#allocation10 + $0x370] sm:$0xff]  ;;  %v3362_v41 = vld [vmem:[#allocation10 + $0x3a8] sm:$0xff]  ;;  %v3360_v27 = vld [vmem:[#allocation10 + $0x398] sm:$0xff] }
 0x35f   :  { %v3364_v28 = vld [vmem:[#allocation10 + $0x3b8] sm:$0xff] }
 0x360   :  { %5412 = vmatpush1.bf16.msra.mxu0 %v5411_v35  ;;  %v5431_v35 = vpack.c.bf16 %v3321_v36, %v3317_v16  ;;  %v3357_v16 = vld [vmem:[#allocation10 + $0x380] sm:$0xff] }
 0x361   :  { %5540 = vmatpush1.bf16.msra.mxu1 %v5539_v38  ;;  %5414 = vmatprep.subr.bf16.mxu0 %v5413_v39  ;;  %v5559_v38 = vpack.c.bf16 %v3323_v18, %v3319_v37  ;;  %v5433_v39 = vpack.c.bf16 %v3330_v34, %v3326_v30  ;;  %v3361_v36 = vld [vmem:[#allocation10 + $0x3a0] sm:$0xff]  ;;  %v5577_v37 = vpack.c.bf16 %v3364_v28, %v3360_v27  ;;  %v3363_v18 = vld [vmem:[#allocation10 + $0x3b0] sm:$0xff]  ;;  %v3394_v27 = vld [vmem:[#allocation10 + $0x4a8] sm:$0xff] }
 0x362   :  { %5542 = vmatprep.subr.bf16.mxu1 %v5541_v42  ;;  %v5561_v42 = vpack.c.bf16 %v3332_v0, %v3328_v6  ;;  %v5451_v30 = vpack.c.bf16 %v3361_v36, %v3357_v16  ;;  %v3366_v6 = vld [vmem:[#allocation10 + $0x3c8] sm:$0xff]  ;;  %v3392_v28 = vld [vmem:[#allocation10 + $0x498] sm:$0xff]  ;;  %v3389_v36 = vld [vmem:[#allocation10 + $0x480] sm:$0xff] }
 0x363   :  { %v3370_v0 = vld [vmem:[#allocation10 + $0x3e8] sm:$0xff] }
 0x364   :  { %5416 = vmatpush1.bf16.msra.mxu0 %v5415_v49  ;;  %v5435_v49 = vpack.c.bf16 %v3329_v50, %v3325_v40  ;;  %v3365_v40 = vld [vmem:[#allocation10 + $0x3c0] sm:$0xff] }
 0x365   :  { %5544 = vmatpush1.bf16.msra.mxu1 %v5543_v51  ;;  %5418 = vmatprep.subr.bf16.mxu0 %v5417_v53  ;;  %v5563_v51 = vpack.c.bf16 %v3331_v44, %v3327_v52  ;;  %v5437_v53 = vpack.c.bf16 %v3338_v10, %v3334_v1  ;;  %v3369_v50 = vld [vmem:[#allocation10 + $0x3e0] sm:$0xff]  ;;  %v3367_v44 = vld [vmem:[#allocation10 + $0x3d0] sm:$0xff] }
 0x366   :  { %5546 = vmatprep.subr.bf16.mxu1 %v5545_v57  ;;  %v5565_v57 = vpack.c.bf16 %v3340_v48, %v3336_v46  ;;  %v3371_v1 = vld [vmem:[#allocation10 + $0x3f0] sm:$0xff]  ;;  %v3374_v46 = vld [vmem:[#allocation10 + $0x408] sm:$0xff] }
 0x367   :  { %v5583_v10 = vpack.c.bf16 %v3371_v1, %v3367_v44  ;;  %v3378_v48 = vld [vmem:[#allocation10 + $0x428] sm:$0xff]  ;;  %v3399_v1 = vld [vmem:[#allocation10 + $0x4d0] sm:$0xff] }
 0x368   :  { %5420 = vmatpush1.bf16.msra.mxu0 %v5419_v61  ;;  %v5439_v61 = vpack.c.bf16 %v3337_v56, %v3333_v55  ;;  %v6277_v56 = vld [vmem:[#allocation8] sm:$0xf] }
 0x369   :  { %5548 = vmatpush1.bf16.msra.mxu1 %v5547_v62  ;;  %5422 = vmatprep.subr.bf16.mxu0 %v5421_v63  ;;  %v5567_v62 = vpack.c.bf16 %v3339_v60, %v3335_v7  ;;  %v5441_v63 = vpack.c.bf16 %v3346_v9, %v3342_v58  ;;  %v2088_v7 = vrot.slane %v6277_v56, %v6175_v19  ;;  %v3373_v9 = vld [vmem:[#allocation10 + $0x400] sm:$0xff] }
 0x36a   :  { %5550 = vmatprep.subr.bf16.mxu1 %v5549_v5  ;;  %v5569_v5 = vpack.c.bf16 %v3348_v59, %v3344_v54  ;;  %v2100_v60 = vrot.slane %v6277_v56, %v6187_v47 }
 0x36c   :  { %5424 = vmatpush1.bf16.msra.mxu0 %v5423_v13  ;;  %v5443_v13 = vpack.c.bf16 %v3345_v3, %v3341_v2  ;;  %v3379_v2 = vld [vmem:[#allocation10 + $0x430] sm:$0xff] }
 0x36d   :  { %5552 = vmatpush1.bf16.msra.mxu1 %v5551_v14  ;;  %5426 = vmatprep.subr.bf16.mxu0 %v5425_v43  ;;  %v5571_v14 = vpack.c.bf16 %v3347_v8, %v3343_v4  ;;  %v5445_v43 = vpack.c.bf16 %v3354_v45, %v3350_v20  ;;  %v3386_v20 = vld [vmem:[#allocation10 + $0x468] sm:$0xff]  ;;  %v3384_v45 = vld [vmem:[#allocation10 + $0x458] sm:$0xff] }
 0x36e   :  { %5554 = vmatprep.subr.bf16.mxu1 %v5553_v24  ;;  %v5573_v24 = vpack.c.bf16 %v3356_v12, %v3352_v11  ;;  %v3388_v11 = vld [vmem:[#allocation10 + $0x478] sm:$0xff] }
 0x370   :  { %5428 = vmatpush1.bf16.msra.mxu0 %v5427_v29  ;;  %v5447_v29 = vpack.c.bf16 %v3353_v22, %v3349_v17  ;;  %v3385_v17 = vld [vmem:[#allocation10 + $0x460] sm:$0xff] }
 0x371   :  { %5556 = vmatpush1.bf16.msra.mxu1 %v5555_v32  ;;  %5430 = vmatprep.subr.bf16.mxu0 %v5429_v33  ;;  %v5575_v32 = vpack.c.bf16 %v3355_v25, %v3351_v23  ;;  %v5449_v33 = vpack.c.bf16 %v3362_v41, %v3358_v26  ;;  %v3383_v23 = vld [vmem:[#allocation10 + $0x450] sm:$0xff]  ;;  %v3390_v25 = vld [vmem:[#allocation10 + $0x488] sm:$0xff]  ;;  %v5589_v41 = vpack.c.bf16 %v3388_v11, %v3384_v45 }
 0x372   :  { %5558 = vmatprep.subr.bf16.mxu1 %v5557_v15  ;;  %v3359_v15 = vld [vmem:[#allocation10 + $0x390] sm:$0xff] }
 0x373   :  { %v5579_v34 = vpack.c.bf16 %v3363_v18, %v3359_v15  ;;  %v5465_v15 = vpack.c.bf16 %v3394_v27, %v3390_v25  ;;  %v3415_v11 = vld [vmem:[#allocation10 + $0x550] sm:$0xff]  ;;  %v3425_v25 = vld [vmem:[#allocation10 + $0x5a0] sm:$0xff] }
 0x374   :  { %5432 = vmatpush1.bf16.msra.mxu0 %v5431_v35  ;;  %v3368_v35 = vld [vmem:[#allocation10 + $0x3d8] sm:$0xff]  ;;  %v3423_v27 = vld [vmem:[#allocation10 + $0x590] sm:$0xff] }
 0x375   :  { %5560 = vmatpush1.bf16.msra.mxu1 %v5559_v38  ;;  %5434 = vmatprep.subr.bf16.mxu0 %v5433_v39  ;;  %v5453_v38 = vpack.c.bf16 %v3370_v0, %v3366_v6  ;;  %v3372_v39 = vld [vmem:[#allocation10 + $0x3f8] sm:$0xff]  ;;  %v3398_v6 = vld [vmem:[#allocation10 + $0x4c8] sm:$0xff] }
 0x376   :  { %5562 = vmatprep.subr.bf16.mxu1 %v5561_v42  ;;  %v5581_v52 = vpack.c.bf16 %v3372_v39, %v3368_v35  ;;  %v5455_v42 = vpack.c.bf16 %v3369_v50, %v3365_v40  ;;  %v3402_v0 = vld [vmem:[#allocation10 + $0x4e8] sm:$0xff]  ;;  %v3400_v35 = vld [vmem:[#allocation10 + $0x4d8] sm:$0xff]  ;;  %v3397_v50 = vld [vmem:[#allocation10 + $0x4c0] sm:$0xff] }
 0x378   :  { %5436 = vmatpush1.bf16.msra.mxu0 %v5435_v49  ;;  %v3376_v49 = vld [vmem:[#allocation10 + $0x418] sm:$0xff] }
 0x379   :  { %5564 = vmatpush1.bf16.msra.mxu1 %v5563_v51  ;;  %5438 = vmatprep.subr.bf16.mxu0 %v5437_v53  ;;  %v5457_v51 = vpack.c.bf16 %v3378_v48, %v3374_v46  ;;  %v3380_v53 = vld [vmem:[#allocation10 + $0x438] sm:$0xff]  ;;  %v3406_v46 = vld [vmem:[#allocation10 + $0x508] sm:$0xff] }
 0x37a   :  { %5566 = vmatprep.subr.bf16.mxu1 %v5565_v57  ;;  %v5585_v55 = vpack.c.bf16 %v3380_v53, %v3376_v49  ;;  %v2092_v57 = vrot.slane %v6277_v56, %v6180_v21  ;;  %v3410_v48 = vld [vmem:[#allocation10 + $0x528] sm:$0xff]  ;;  %v3408_v49 = vld [vmem:[#allocation10 + $0x518] sm:$0xff] }
 0x37c   :  { %5440 = vmatpush1.bf16.msra.mxu0 %v5439_v61 }
 0x37d   :  { %5568 = vmatpush1.bf16.msra.mxu1 %v5567_v62  ;;  %5442 = vmatprep.subr.bf16.mxu0 %v5441_v63  ;;  %v3377_v62 = vld [vmem:[#allocation10 + $0x420] sm:$0xff]  ;;  %v3375_v63 = vld [vmem:[#allocation10 + $0x410] sm:$0xff] }
 0x37e   :  { %5570 = vmatprep.subr.bf16.mxu1 %v5569_v5  ;;  %v3382_v5 = vld [vmem:[#allocation10 + $0x448] sm:$0xff] }
 0x37f   :  { %v5461_v26 = vpack.c.bf16 %v3386_v20, %v3382_v5  ;;  %v3413_v5 = vld [vmem:[#allocation10 + $0x540] sm:$0xff] }
 0x380   :  { %5444 = vmatpush1.bf16.msra.mxu0 %v5443_v13  ;;  %v5459_v13 = vpack.c.bf16 %v3377_v62, %v3373_v9  ;;  %v3407_v9 = vld [vmem:[#allocation10 + $0x510] sm:$0xff]  ;;  %v3418_v62 = vld [vmem:[#allocation10 + $0x568] sm:$0xff] }
 0x381   :  { %5572 = vmatpush1.bf16.msra.mxu1 %v5571_v14  ;;  %5446 = vmatprep.subr.bf16.mxu0 %v5445_v43  ;;  %v5587_v14 = vpack.c.bf16 %v3379_v2, %v3375_v63  ;;  %v3381_v43 = vld [vmem:[#allocation10 + $0x440] sm:$0xff]  ;;  %v3416_v63 = vld [vmem:[#allocation10 + $0x558] sm:$0xff] }
 0x382   :  { %5574 = vmatprep.subr.bf16.mxu1 %v5573_v24  ;;  %v3387_v24 = vld [vmem:[#allocation10 + $0x470] sm:$0xff]  ;;  %v3420_v2 = vld [vmem:[#allocation10 + $0x578] sm:$0xff] }
 0x383   :  { %v5591_v16 = vpack.c.bf16 %v3387_v24, %v3383_v23  ;;  %v5605_v45 = vpack.c.bf16 %v3420_v2, %v3416_v63  ;;  %v3421_v24 = vld [vmem:[#allocation10 + $0x580] sm:$0xff]  ;;  %v3454_v63 = vld [vmem:[#allocation10 + $0x688] sm:$0xff] }
 0x384   :  { %5448 = vmatpush1.bf16.msra.mxu0 %v5447_v29  ;;  %v3396_v29 = vld [vmem:[#allocation10 + $0x4b8] sm:$0xff]  ;;  %v3458_v2 = vld [vmem:[#allocation10 + $0x6a8] sm:$0xff] }
 0x385   :  { %5576 = vmatpush1.bf16.msra.mxu1 %v5575_v32  ;;  %5450 = vmatprep.subr.bf16.mxu0 %v5449_v33  ;;  %v5463_v33 = vpack.c.bf16 %v3385_v17, %v3381_v43  ;;  %v5593_v18 = vpack.c.bf16 %v3396_v29, %v3392_v28  ;;  %v3424_v43 = vld [vmem:[#allocation10 + $0x598] sm:$0xff]  ;;  %v3427_v28 = vld [vmem:[#allocation10 + $0x5b0] sm:$0xff]  ;;  %v3430_v29 = vld [vmem:[#allocation10 + $0x5c8] sm:$0xff] }
 0x386   :  { %5578 = vmatprep.subr.bf16.mxu1 %v5577_v37  ;;  %v3393_v37 = vld [vmem:[#allocation10 + $0x4a0] sm:$0xff]  ;;  %v3428_v17 = vld [vmem:[#allocation10 + $0x5b8] sm:$0xff] }
 0x387   :  { %v5467_v39 = vpack.c.bf16 %v3393_v37, %v3389_v36  ;;  %v5483_v36 = vpack.c.bf16 %v3425_v25, %v3421_v24  ;;  %v5611_v37 = vpack.c.bf16 %v3427_v28, %v3423_v27 }
 0x388   :  { %5452 = vmatpush1.bf16.msra.mxu0 %v5451_v30  ;;  %v3391_v30 = vld [vmem:[#allocation10 + $0x490] sm:$0xff] }
 0x389   :  { %5580 = vmatpush1.bf16.msra.mxu1 %v5579_v34  ;;  %5454 = vmatprep.subr.bf16.mxu0 %v5453_v38  ;;  %v3395_v34 = vld [vmem:[#allocation10 + $0x4b0] sm:$0xff]  ;;  %v3404_v38 = vld [vmem:[#allocation10 + $0x4f8] sm:$0xff] }
 0x38a   :  { %5582 = vmatprep.subr.bf16.mxu1 %v5581_v52  ;;  %v5595_v40 = vpack.c.bf16 %v3395_v34, %v3391_v30  ;;  %v3401_v52 = vld [vmem:[#allocation10 + $0x4e0] sm:$0xff]  ;;  %v5597_v44 = vpack.c.bf16 %v3404_v38, %v3400_v35  ;;  %v3438_v35 = vld [vmem:[#allocation10 + $0x608] sm:$0xff] }
 0x38b   :  { %v5471_v53 = vpack.c.bf16 %v3401_v52, %v3397_v50  ;;  %v3442_v38 = vld [vmem:[#allocation10 + $0x628] sm:$0xff] }
 0x38c   :  { %5456 = vmatpush1.bf16.msra.mxu0 %v5455_v42  ;;  %v5469_v42 = vpack.c.bf16 %v3402_v0, %v3398_v6  ;;  %v3431_v6 = vld [vmem:[#allocation10 + $0x5d0] sm:$0xff] }
 0x38d   :  { %5584 = vmatpush1.bf16.msra.mxu1 %v5583_v10  ;;  %5458 = vmatprep.subr.bf16.mxu0 %v5457_v51  ;;  %v3403_v10 = vld [vmem:[#allocation10 + $0x4f0] sm:$0xff]  ;;  %v3412_v51 = vld [vmem:[#allocation10 + $0x538] sm:$0xff] }
 0x38e   :  { %5586 = vmatprep.subr.bf16.mxu1 %v5585_v55  ;;  %v5599_v55 = vpack.c.bf16 %v3403_v10, %v3399_v1  ;;  %v3435_v0 = vld [vmem:[#allocation10 + $0x5f0] sm:$0xff]  ;;  %v5489_v1 = vpack.c.bf16 %v3442_v38, %v3438_v35 }
 0x38f   :  { %v5615_v52 = vpack.c.bf16 %v3435_v0, %v3431_v6  ;;  %v3471_v35 = vld [vmem:[#allocation10 + $0x710] sm:$0xff] }
 0x390   :  { %v3475_v38 = vld [vmem:[#allocation10 + $0x730] sm:$0xff] }
 0x422   :  { %v2668_v58 = vpop.f32.mrb[8].mxu0 }
 0x423   :  { %v5713_v54 = vadd.f32 %v2668_v58, %v2088_v7  ;;  %v6285_v59 = vpop.f32.mrb[8].mxu1  ;;  %v2670_v61 = vpop.f32.mrb[9].mxu0  ;;  %v3405_v7 = vld [vmem:[#allocation10 + $0x500] sm:$0xff]  ;;  %v5601_v58 = vpack.c.bf16 %v3412_v51, %v3408_v49  ;;  %v3446_v49 = vld [vmem:[#allocation10 + $0x648] sm:$0xff] }
 0x424   :  { %v5714_v3 = vadd.f32 %v2670_v61, %v2092_v57  ;;  %v3238_v4 = vpop.f32.mrb[9].mxu1  ;;  %v3409_v57 = vld [vmem:[#allocation10 + $0x520] sm:$0xff]  ;;  %v3414_v61 = vld [vmem:[#allocation10 + $0x548] sm:$0xff] }
 0x425   :  { %v5716_v8 = vadd.f32 %v3238_v4, %v2100_v60  ;;  %v3241_v22 = vmax.f32 %v5713_v54, 0.0  ;;  %v5473_v60 = vpack.c.bf16 %v3410_v48, %v3406_v46  ;;  %v3411_v54 = vld [vmem:[#allocation10 + $0x530] sm:$0xff]  ;;  %v5477_v20 = vpack.c.bf16 %v3418_v62, %v3414_v61  ;;  %v3450_v51 = vld [vmem:[#allocation10 + $0x668] sm:$0xff] }
 0x426   :  { %v3242_v12 = vmax.f32 %v5714_v3, 0.0  ;;  %v5475_v3 = vpack.c.bf16 %v3409_v57, %v3405_v7  ;;  %v5603_v4 = vpack.c.bf16 %v3411_v54, %v3407_v9  ;;  %v3439_v46 = vld [vmem:[#allocation10 + $0x610] sm:$0xff]  ;;  %v5493_v9 = vpack.c.bf16 %v3450_v51, %v3446_v49 }
 0x427   :  { %v3244_v32 = vmax.f32 %v5716_v8, 0.0  ;;  %v3417_v8 = vld [vmem:[#allocation10 + $0x560] sm:$0xff]  ;;  %v3443_v48 = vld [vmem:[#allocation10 + $0x630] sm:$0xff] }
 0x428   :  { %3587 = vmatprep.mubr.f32.mxu0 %v3242_v12  ;;  %3729 = vmatprep.mubr.f32.mxu1 %v3242_v12  ;;  %v3419_v12 = vld [vmem:[#allocation10 + $0x570] sm:$0xff]  ;;  %v5619_v57 = vpack.c.bf16 %v3443_v48, %v3439_v46 }
 0x429   :  { %3588 = vmatmul.mubr.f32.vlgmr.msra.gmra.mrb[10].mxu0 %v3241_v22  ;;  %3730 = vmatmul.mubr.f32.vlgmr.msra.gmra.mrb[10].mxu1 %v3241_v22  ;;  %v5479_v22 = vpack.c.bf16 %v3417_v8, %v3413_v5  ;;  %v5607_v23 = vpack.c.bf16 %v3419_v12, %v3415_v11  ;;  %v3447_v61 = vld [vmem:[#allocation10 + $0x650] sm:$0xff]  ;;  %v5497_v11 = vpack.c.bf16 %v3458_v2, %v3454_v63 }
 0x42a   :  { %5460 = vmatpush1.bf16.msra.mxu0 %v5459_v13  ;;  %5588 = vmatpush1.bf16.msra.mxu1 %v5587_v14  ;;  %v3422_v13 = vld [vmem:[#allocation10 + $0x588] sm:$0xff]  ;;  %v3451_v62 = vld [vmem:[#allocation10 + $0x670] sm:$0xff] }
 0x42b   :  { %3658 = vmatprep.mubr.f32.mxu0 %v3244_v32  ;;  %3800 = vmatprep.mubr.f32.mxu1 %v3244_v32  ;;  %v3426_v14 = vld [vmem:[#allocation10 + $0x5a8] sm:$0xff]  ;;  %v5623_v8 = vpack.c.bf16 %v3451_v62, %v3447_v61  ;;  %v3479_v49 = vld [vmem:[#allocation10 + $0x750] sm:$0xff] }
 0x42c   :  { %5462 = vmatprep.subr.bf16.mxu0 %v5461_v26  ;;  %5590 = vmatprep.subr.bf16.mxu1 %v5589_v41  ;;  %v5481_v26 = vpack.c.bf16 %v3426_v14, %v3422_v13  ;;  %v5609_v41 = vpack.c.bf16 %v3428_v17, %v3424_v43  ;;  %v3434_v32 = vld [vmem:[#allocation10 + $0x5e8] sm:$0xff]  ;;  %v3455_v13 = vld [vmem:[#allocation10 + $0x690] sm:$0xff] }
 0x42d   :  { %v5485_v30 = vpack.c.bf16 %v3434_v32, %v3430_v29  ;;  %v3459_v14 = vld [vmem:[#allocation10 + $0x6b0] sm:$0xff]  ;;  %v3462_v43 = vld [vmem:[#allocation10 + $0x6c8] sm:$0xff] }
 0x42e   :  { %5464 = vmatpush1.bf16.msra.mxu0 %v5463_v33  ;;  %5592 = vmatpush1.bf16.msra.mxu1 %v5591_v16  ;;  %v3432_v33 = vld [vmem:[#allocation10 + $0x5d8] sm:$0xff]  ;;  %v3466_v17 = vld [vmem:[#allocation10 + $0x6e8] sm:$0xff]  ;;  %v5627_v25 = vpack.c.bf16 %v3459_v14, %v3455_v13  ;;  %v3463_v29 = vld [vmem:[#allocation10 + $0x6d0] sm:$0xff]  ;;  %v2096_v13 = vrot.slane %v6277_v56, %v6202_v31 }
 0x42f   :  { %5466 = vmatprep.subr.bf16.mxu0 %v5465_v15  ;;  %5594 = vmatprep.subr.bf16.mxu1 %v5593_v18  ;;  %v3436_v16 = vld [vmem:[#allocation10 + $0x5f8] sm:$0xff]  ;;  %v3429_v15 = vld [vmem:[#allocation10 + $0x5c0] sm:$0xff]  ;;  %v5501_v27 = vpack.c.bf16 %v3466_v17, %v3462_v43  ;;  %v3467_v32 = vld [vmem:[#allocation10 + $0x6f0] sm:$0xff] }
 0x430   :  { %v3433_v18 = vld [vmem:[#allocation10 + $0x5e0] sm:$0xff]  ;;  %v5613_v34 = vpack.c.bf16 %v3436_v16, %v3432_v33  ;;  %v3470_v33 = vld [vmem:[#allocation10 + $0x708] sm:$0xff]  ;;  %v3483_v51 = vld [vmem:[#allocation10 + $0x770] sm:$0xff] }
 0x431   :  { %v5487_v50 = vpack.c.bf16 %v3433_v18, %v3429_v15  ;;  %v3474_v16 = vld [vmem:[#allocation10 + $0x728] sm:$0xff]  ;;  %v5631_v18 = vpack.c.bf16 %v3467_v32, %v3463_v29  ;;  %v3487_v63 = vld [vmem:[#allocation10 + $0x790] sm:$0xff]  ;;  %v5715_v32 = vadd.f32 %v6285_v59, %v2096_v13 }
 0x432   :  { %5468 = vmatpush1.bf16.msra.mxu0 %v5467_v39  ;;  %5596 = vmatpush1.bf16.msra.mxu1 %v5595_v40  ;;  %v3440_v39 = vld [vmem:[#allocation10 + $0x618] sm:$0xff]  ;;  %v5505_v6 = vpack.c.bf16 %v3474_v16, %v3470_v33  ;;  %v3491_v2 = vld [vmem:[#allocation10 + $0x7b0] sm:$0xff]  ;;  %v3843_v16 = vld [vmem:[#allocation13 + $0x100] sm:$0xff] }
 0x433   :  { %5470 = vmatprep.subr.bf16.mxu0 %v5469_v42  ;;  %5598 = vmatprep.subr.bf16.mxu1 %v5597_v44  ;;  %v3444_v40 = vld [vmem:[#allocation10 + $0x638] sm:$0xff]  ;;  %v3437_v42 = vld [vmem:[#allocation10 + $0x600] sm:$0xff]  ;;  %v3495_v17 = vld [vmem:[#allocation10 + $0x7d0] sm:$0xff] }
 0x434   :  { %v3441_v44 = vld [vmem:[#allocation10 + $0x620] sm:$0xff]  ;;  %v5617_v10 = vpack.c.bf16 %v3444_v40, %v3440_v39  ;;  %v3478_v39 = vld [vmem:[#allocation10 + $0x748] sm:$0xff] }
 0x435   :  { %v5491_v7 = vpack.c.bf16 %v3441_v44, %v3437_v42  ;;  %v3482_v40 = vld [vmem:[#allocation10 + $0x768] sm:$0xff]  ;;  %v5635_v44 = vpack.c.bf16 %v3475_v38, %v3471_v35  ;;  %v3814_v35 = vld [vmem:[#allocation13 + $0x18] sm:$0xff]  ;;  %v3243_v38 = vmax.f32 %v5715_v32, 0.0  ;;  %v3821_v32 = vld [vmem:[#allocation13 + $0x50] sm:$0xff] }
 0x436   :  { %5472 = vmatpush1.bf16.msra.mxu0 %v5471_v53  ;;  %5600 = vmatpush1.bf16.msra.mxu1 %v5599_v55  ;;  %v3448_v53 = vld [vmem:[#allocation10 + $0x658] sm:$0xff]  ;;  %v5509_v46 = vpack.c.bf16 %v3482_v40, %v3478_v39  ;;  %v3812_v29 = vld [vmem:[#allocation13 + $0x8] sm:$0xff] }
 0x437   :  { %5474 = vmatprep.subr.bf16.mxu0 %v5473_v60  ;;  %5602 = vmatprep.subr.bf16.mxu1 %v5601_v58  ;;  %v3452_v55 = vld [vmem:[#allocation10 + $0x678] sm:$0xff]  ;;  %v3445_v60 = vld [vmem:[#allocation10 + $0x640] sm:$0xff] }
 0x438   :  { %v3449_v58 = vld [vmem:[#allocation10 + $0x660] sm:$0xff]  ;;  %v5621_v54 = vpack.c.bf16 %v3452_v55, %v3448_v53  ;;  %v3486_v53 = vld [vmem:[#allocation10 + $0x788] sm:$0xff]  ;;  %v3845_v40 = vld [vmem:[#allocation13 + $0x110] sm:$0xff] }
 0x439   :  { %v5495_v5 = vpack.c.bf16 %v3449_v58, %v3445_v60  ;;  %v3490_v55 = vld [vmem:[#allocation10 + $0x7a8] sm:$0xff]  ;;  %v5639_v58 = vpack.c.bf16 %v3483_v51, %v3479_v49 }
 0x43a   :  { %5476 = vmatpush1.bf16.msra.mxu0 %v5475_v3  ;;  %5604 = vmatpush1.bf16.msra.mxu1 %v5603_v4  ;;  %v3456_v3 = vld [vmem:[#allocation10 + $0x698] sm:$0xff]  ;;  %v5513_v61 = vpack.c.bf16 %v3490_v55, %v3486_v53  ;;  %v3816_v49 = vld [vmem:[#allocation13 + $0x28] sm:$0xff]  ;;  %v3847_v55 = vld [vmem:[#allocation13 + $0x120] sm:$0xff] }
 0x43b   :  { %5478 = vmatprep.subr.bf16.mxu0 %v5477_v20  ;;  %5606 = vmatprep.subr.bf16.mxu1 %v5605_v45  ;;  %v3460_v4 = vld [vmem:[#allocation10 + $0x6b8] sm:$0xff]  ;;  %v3453_v20 = vld [vmem:[#allocation10 + $0x680] sm:$0xff] }
 0x43c   :  { %v3457_v45 = vld [vmem:[#allocation10 + $0x6a0] sm:$0xff]  ;;  %v5625_v12 = vpack.c.bf16 %v3460_v4, %v3456_v3  ;;  %v3494_v3 = vld [vmem:[#allocation10 + $0x7c8] sm:$0xff] }
 0x43d   :  { %v5499_v24 = vpack.c.bf16 %v3457_v45, %v3453_v20  ;;  %v3498_v4 = vld [vmem:[#allocation10 + $0x7e8] sm:$0xff]  ;;  %v5643_v45 = vpack.c.bf16 %v3491_v2, %v3487_v63  ;;  %v3818_v63 = vld [vmem:[#allocation13 + $0x38] sm:$0xff] }
 0x43e   :  { %5480 = vmatpush1.bf16.msra.mxu0 %v5479_v22  ;;  %5608 = vmatpush1.bf16.msra.mxu1 %v5607_v23  ;;  %v3464_v22 = vld [vmem:[#allocation10 + $0x6d8] sm:$0xff]  ;;  %v5517_v14 = vpack.c.bf16 %v3498_v4, %v3494_v3 }
 0x43f   :  { %5482 = vmatprep.subr.bf16.mxu0 %v5481_v26  ;;  %5610 = vmatprep.subr.bf16.mxu1 %v5609_v41  ;;  %v3468_v23 = vld [vmem:[#allocation10 + $0x6f8] sm:$0xff]  ;;  %v3461_v26 = vld [vmem:[#allocation10 + $0x6c0] sm:$0xff] }
 0x440   :  { %v3465_v41 = vld [vmem:[#allocation10 + $0x6e0] sm:$0xff]  ;;  %v5629_v28 = vpack.c.bf16 %v3468_v23, %v3464_v22  ;;  %v3499_v22 = vld [vmem:[#allocation10 + $0x7f0] sm:$0xff] }
 0x441   :  { %v5503_v15 = vpack.c.bf16 %v3465_v41, %v3461_v26  ;;  %v3827_v23 = vld [vmem:[#allocation13 + $0x80] sm:$0xff]  ;;  %v3860_v26 = vld [vmem:[#allocation13 + $0x188] sm:$0xff]  ;;  %v3849_v4 = vld [vmem:[#allocation13 + $0x130] sm:$0xff] }
 0x442   :  { %5484 = vmatpush1.bf16.msra.mxu0 %v5483_v36  ;;  %5612 = vmatpush1.bf16.msra.mxu1 %v5611_v37  ;;  %v3472_v36 = vld [vmem:[#allocation10 + $0x718] sm:$0xff] }
 0x443   :  { %5486 = vmatprep.subr.bf16.mxu0 %v5485_v30  ;;  %5614 = vmatprep.subr.bf16.mxu1 %v5613_v34  ;;  %v3476_v37 = vld [vmem:[#allocation10 + $0x738] sm:$0xff]  ;;  %v3469_v30 = vld [vmem:[#allocation10 + $0x700] sm:$0xff] }
 0x444   :  { %v3473_v34 = vld [vmem:[#allocation10 + $0x720] sm:$0xff]  ;;  %v5633_v0 = vpack.c.bf16 %v3476_v37, %v3472_v36  ;;  %v3844_v36 = vld [vmem:[#allocation13 + $0x108] sm:$0xff]  ;;  %v3829_v37 = vld [vmem:[#allocation13 + $0x90] sm:$0xff] }
 0x445   :  { %v5507_v42 = vpack.c.bf16 %v3473_v34, %v3469_v30  ;;  %v3862_v30 = vld [vmem:[#allocation13 + $0x198] sm:$0xff] }
 0x446   :  { %5488 = vmatpush1.bf16.msra.mxu0 %v5487_v50  ;;  %5616 = vmatpush1.bf16.msra.mxu1 %v5615_v52  ;;  %v3480_v50 = vld [vmem:[#allocation10 + $0x758] sm:$0xff] }
 0x447   :  { %5490 = vmatprep.subr.bf16.mxu0 %v5489_v1  ;;  %5618 = vmatprep.subr.bf16.mxu1 %v5617_v10  ;;  %v3484_v52 = vld [vmem:[#allocation10 + $0x778] sm:$0xff]  ;;  %v3477_v1 = vld [vmem:[#allocation10 + $0x740] sm:$0xff] }
 0x448   :  { %v3481_v10 = vld [vmem:[#allocation10 + $0x760] sm:$0xff]  ;;  %v5637_v48 = vpack.c.bf16 %v3484_v52, %v3480_v50 }
 0x449   :  { %v5511_v60 = vpack.c.bf16 %v3481_v10, %v3477_v1  ;;  %v3846_v50 = vld [vmem:[#allocation13 + $0x118] sm:$0xff]  ;;  %v3831_v52 = vld [vmem:[#allocation13 + $0xa0] sm:$0xff]  ;;  %v3864_v1 = vld [vmem:[#allocation13 + $0x1a8] sm:$0xff] }
 0x44a   :  { %5492 = vmatpush1.bf16.msra.mxu0 %v5491_v7  ;;  %5620 = vmatpush1.bf16.msra.mxu1 %v5619_v57  ;;  %v3488_v7 = vld [vmem:[#allocation10 + $0x798] sm:$0xff] }
 0x44b   :  { %5494 = vmatprep.subr.bf16.mxu0 %v5493_v9  ;;  %5622 = vmatprep.subr.bf16.mxu1 %v5621_v54  ;;  %v3492_v57 = vld [vmem:[#allocation10 + $0x7b8] sm:$0xff]  ;;  %v3485_v9 = vld [vmem:[#allocation10 + $0x780] sm:$0xff] }
 0x44c   :  { %v3489_v54 = vld [vmem:[#allocation10 + $0x7a0] sm:$0xff]  ;;  %v5641_v62 = vpack.c.bf16 %v3492_v57, %v3488_v7  ;;  %v3848_v7 = vld [vmem:[#allocation13 + $0x128] sm:$0xff]  ;;  %v3833_v57 = vld [vmem:[#allocation13 + $0xb0] sm:$0xff] }
 0x44d   :  { %v5515_v20 = vpack.c.bf16 %v3489_v54, %v3485_v9  ;;  %v3866_v9 = vld [vmem:[#allocation13 + $0x1b8] sm:$0xff] }
 0x44e   :  { %5496 = vmatpush1.bf16.msra.mxu0 %v5495_v5  ;;  %5624 = vmatpush1.bf16.msra.mxu1 %v5623_v8  ;;  %v3496_v5 = vld [vmem:[#allocation10 + $0x7d8] sm:$0xff] }
 0x44f   :  { %5498 = vmatprep.subr.bf16.mxu0 %v5497_v11  ;;  %5626 = vmatprep.subr.bf16.mxu1 %v5625_v12  ;;  %v3500_v8 = vld [vmem:[#allocation10 + $0x7f8] sm:$0xff]  ;;  %v3493_v11 = vld [vmem:[#allocation10 + $0x7c0] sm:$0xff] }
 0x450   :  { %v3497_v12 = vld [vmem:[#allocation10 + $0x7e0] sm:$0xff]  ;;  %v5645_v43 = vpack.c.bf16 %v3500_v8, %v3496_v5 }
 0x451   :  { %v5519_v41 = vpack.c.bf16 %v3497_v12, %v3493_v11  ;;  %v3850_v5 = vld [vmem:[#allocation13 + $0x138] sm:$0xff]  ;;  %v3835_v8 = vld [vmem:[#allocation13 + $0xc0] sm:$0xff]  ;;  %v3868_v11 = vld [vmem:[#allocation13 + $0x1c8] sm:$0xff] }
 0x452   :  { %5500 = vmatpush1.bf16.msra.mxu0 %v5499_v24  ;;  %5628 = vmatpush1.bf16.msra.mxu1 %v5627_v25  ;;  %v3828_v24 = vld [vmem:[#allocation13 + $0x88] sm:$0xff]  ;;  %v3859_v25 = vld [vmem:[#allocation13 + $0x180] sm:$0xff]  ;;  %v5695_v13 = vpack.c.bf16 %v3850_v5, %v3849_v4 }
 0x453   :  { %5502 = vmatprep.subr.bf16.mxu0 %v5501_v27  ;;  %5630 = vmatprep.subr.bf16.mxu1 %v5629_v28  ;;  %v5647_v27 = vpack.c.bf16 %v3499_v22, %v3495_v17  ;;  %v3811_v28 = vld [vmem:[#allocation13] sm:$0xff]  ;;  %v5649_v56 = vpack.c.bf16 %v3828_v24, %v3827_v23  ;;  %v5681_v33 = vpack.c.bf16 %v3860_v26, %v3859_v25  ;;  %v3852_v24 = vld [vmem:[#allocation13 + $0x148] sm:$0xff]  ;;  %v3837_v25 = vld [vmem:[#allocation13 + $0xd0] sm:$0xff] }
 0x454   :  { %v5651_v34 = vpack.c.bf16 %v3812_v29, %v3811_v28  ;;  %v3851_v23 = vld [vmem:[#allocation13 + $0x140] sm:$0xff]  ;;  %v3838_v26 = vld [vmem:[#allocation13 + $0xd8] sm:$0xff] }
 0x455   :  { %v5699_v29 = vpack.c.bf16 %v3852_v24, %v3851_v23 }
 0x456   :  { %5504 = vmatpush1.bf16.msra.mxu0 %v5503_v15  ;;  %5632 = vmatpush1.bf16.msra.mxu1 %v5631_v18  ;;  %v3830_v15 = vld [vmem:[#allocation13 + $0x98] sm:$0xff]  ;;  %v3861_v18 = vld [vmem:[#allocation13 + $0x190] sm:$0xff] }
 0x457   :  { %5506 = vmatprep.subr.bf16.mxu0 %v5505_v6  ;;  %5634 = vmatprep.subr.bf16.mxu1 %v5633_v0  ;;  %v5683_v6 = vpack.c.bf16 %v3844_v36, %v3843_v16  ;;  %v3813_v0 = vld [vmem:[#allocation13 + $0x10] sm:$0xff]  ;;  %v5653_v59 = vpack.c.bf16 %v3830_v15, %v3829_v37  ;;  %v5685_v39 = vpack.c.bf16 %v3862_v30, %v3861_v18  ;;  %v3854_v37 = vld [vmem:[#allocation13 + $0x158] sm:$0xff]  ;;  %v3839_v15 = vld [vmem:[#allocation13 + $0xe0] sm:$0xff] }
 0x458   :  { %v5655_v10 = vpack.c.bf16 %v3814_v35, %v3813_v0  ;;  %v3853_v36 = vld [vmem:[#allocation13 + $0x150] sm:$0xff]  ;;  %v3840_v18 = vld [vmem:[#allocation13 + $0xe8] sm:$0xff]  ;;  %v3871_v30 = vld [vmem:[#allocation13 + $0x1e0] sm:$0xff] }
 0x459   :  { %v5703_v0 = vpack.c.bf16 %v3854_v37, %v3853_v36  ;;  %v5673_v35 = vpack.c.bf16 %v3840_v18, %v3839_v15 }
 0x45a   :  { %5508 = vmatpush1.bf16.msra.mxu0 %v5507_v42  ;;  %5636 = vmatpush1.bf16.msra.mxu1 %v5635_v44  ;;  %v3832_v42 = vld [vmem:[#allocation13 + $0xa8] sm:$0xff]  ;;  %v3863_v44 = vld [vmem:[#allocation13 + $0x1a0] sm:$0xff] }
 0x45b   :  { %5510 = vmatprep.subr.bf16.mxu0 %v5509_v46  ;;  %5638 = vmatprep.subr.bf16.mxu1 %v5637_v48  ;;  %v5687_v46 = vpack.c.bf16 %v3846_v50, %v3845_v40  ;;  %v3815_v48 = vld [vmem:[#allocation13 + $0x20] sm:$0xff]  ;;  %v5657_v51 = vpack.c.bf16 %v3832_v42, %v3831_v52  ;;  %v5689_v53 = vpack.c.bf16 %v3864_v1, %v3863_v44  ;;  %v3856_v52 = vld [vmem:[#allocation13 + $0x168] sm:$0xff]  ;;  %v3841_v44 = vld [vmem:[#allocation13 + $0xf0] sm:$0xff] }
 0x45c   :  { %v5659_v54 = vpack.c.bf16 %v3816_v49, %v3815_v48  ;;  %v3855_v40 = vld [vmem:[#allocation13 + $0x160] sm:$0xff]  ;;  %v3842_v1 = vld [vmem:[#allocation13 + $0xf8] sm:$0xff]  ;;  %v3825_v49 = vld [vmem:[#allocation13 + $0x70] sm:$0xff] }
 0x45d   :  { %v5707_v42 = vpack.c.bf16 %v3856_v52, %v3855_v40  ;;  %v3874_v48 = vld [vmem:[#allocation13 + $0x1f8] sm:$0xff] }
 0x45e   :  { %5512 = vmatpush1.bf16.msra.mxu0 %v5511_v60  ;;  %5640 = vmatpush1.bf16.msra.mxu1 %v5639_v58  ;;  %v3834_v60 = vld [vmem:[#allocation13 + $0xb8] sm:$0xff]  ;;  %v3865_v58 = vld [vmem:[#allocation13 + $0x1b0] sm:$0xff] }
 0x45f   :  { %5514 = vmatprep.subr.bf16.mxu0 %v5513_v61  ;;  %5642 = vmatprep.subr.bf16.mxu1 %v5641_v62  ;;  %v5691_v61 = vpack.c.bf16 %v3848_v7, %v3847_v55  ;;  %v3817_v62 = vld [vmem:[#allocation13 + $0x30] sm:$0xff]  ;;  %v5661_v2 = vpack.c.bf16 %v3834_v60, %v3833_v57  ;;  %v5693_v3 = vpack.c.bf16 %v3866_v9, %v3865_v58  ;;  %v3858_v57 = vld [vmem:[#allocation13 + $0x178] sm:$0xff] }
 0x460   :  { %v5663_v12 = vpack.c.bf16 %v3818_v63, %v3817_v62  ;;  %v3857_v7 = vld [vmem:[#allocation13 + $0x170] sm:$0xff]  ;;  %v3501_v58 = vld [vmem:[#allocation11] sm:$0xf] }
 0x461   :  { %v5711_v60 = vpack.c.bf16 %v3858_v57, %v3857_v7  ;;  %v3506_v9 = vrot.slane %v3501_v58, %v6175_v19  ;;  %v3518_v62 = vrot.slane %v3501_v58, %v6187_v47 }
 0x462   :  { %5516 = vmatpush1.bf16.msra.mxu0 %v5515_v20  ;;  %5644 = vmatpush1.bf16.msra.mxu1 %v5643_v45  ;;  %v3836_v20 = vld [vmem:[#allocation13 + $0xc8] sm:$0xff]  ;;  %v3867_v45 = vld [vmem:[#allocation13 + $0x1c0] sm:$0xff] }
 0x463   :  { %5518 = vmatprep.subr.bf16.mxu0 %v5517_v14  ;;  %5646 = vmatprep.subr.bf16.mxu1 %v5645_v43  ;;  %v3819_v14 = vld [vmem:[#allocation13 + $0x40] sm:$0xff]  ;;  %v3820_v43 = vld [vmem:[#allocation13 + $0x48] sm:$0xff]  ;;  %v5665_v17 = vpack.c.bf16 %v3836_v20, %v3835_v8  ;;  %v5697_v22 = vpack.c.bf16 %v3868_v11, %v3867_v45 }
 0x464   :  { %v5667_v28 = vpack.c.bf16 %v3820_v43, %v3819_v14 }
 0x466   :  { %5520 = vmatpush1.bf16.msra.mxu0 %v5519_v41  ;;  %5648 = vmatpush1.bf16.msra.mxu1 %v5647_v27  ;;  %v3869_v41 = vld [vmem:[#allocation13 + $0x1d0] sm:$0xff]  ;;  %v3870_v27 = vld [vmem:[#allocation13 + $0x1d8] sm:$0xff] }
 0x467   :  { %5650 = vmatprep.subr.bf16.mxu0 %v5649_v56  ;;  %5682 = vmatprep.subr.bf16.mxu1 %v5681_v33  ;;  %v3822_v56 = vld [vmem:[#allocation13 + $0x58] sm:$0xff]  ;;  %v5669_v33 = vpack.c.bf16 %v3838_v26, %v3837_v25  ;;  %v5701_v16 = vpack.c.bf16 %v3870_v27, %v3869_v41 }
 0x469   :  { %3659 = vmatmul.mubr.f32.vlgmr.msra.gmra.mrb[10].mxu0 %v3243_v38  ;;  %3801 = vmatmul.mubr.f32.vlgmr.msra.gmra.mrb[10].mxu1 %v3243_v38 }
 0x46a   :  { %5652 = vmatpush3.bf16.msra.mxu0 %v5651_v34  ;;  %5684 = vmatpush3.bf16.msra.mxu1 %v5683_v6  ;;  %v3872_v34 = vld [vmem:[#allocation13 + $0x1e8] sm:$0xff]  ;;  %v5671_v6 = vpack.c.bf16 %v3822_v56, %v3821_v32 }
 0x46b   :  { %5654 = vmatprep.subr.bf16.mxu0 %v5653_v59  ;;  %5686 = vmatprep.subr.bf16.mxu1 %v5685_v39  ;;  %v5705_v38 = vpack.c.bf16 %v3872_v34, %v3871_v30  ;;  %v3823_v59 = vld [vmem:[#allocation13 + $0x60] sm:$0xff]  ;;  %v3824_v39 = vld [vmem:[#allocation13 + $0x68] sm:$0xff] }
 0x46c   :  { %v5675_v50 = vpack.c.bf16 %v3824_v39, %v3823_v59 }
 0x46e   :  { %5656 = vmatpush3.bf16.msra.mxu0 %v5655_v10  ;;  %5688 = vmatpush3.bf16.msra.mxu1 %v5687_v46  ;;  %v3873_v10 = vld [vmem:[#allocation13 + $0x1f0] sm:$0xff]  ;;  %v5677_v46 = vpack.c.bf16 %v3842_v1, %v3841_v44 }
 0x46f   :  { %5658 = vmatprep.subr.bf16.mxu0 %v5657_v51  ;;  %5690 = vmatprep.subr.bf16.mxu1 %v5689_v53  ;;  %v3826_v51 = vld [vmem:[#allocation13 + $0x78] sm:$0xff]  ;;  %v5709_v53 = vpack.c.bf16 %v3874_v48, %v3873_v10 }
 0x470   :  { %v5679_v55 = vpack.c.bf16 %v3826_v51, %v3825_v49 }
 0x472   :  { %5660 = vmatpush3.bf16.msra.mxu0 %v5659_v54  ;;  %5692 = vmatpush3.bf16.msra.mxu1 %v5691_v61  ;;  %v3514_v54 = vrot.slane %v3501_v58, %v6202_v31  ;;  %v3510_v61 = vrot.slane %v3501_v58, %v6180_v21  ;;  %v4042_v31 = vld [vmem:[#allocation14] ss:$0 sm:$0xff] }
 0x473   :  { %5662 = vmatprep.subr.bf16.mxu0 %v5661_v2  ;;  %5694 = vmatprep.subr.bf16.mxu1 %v5693_v3 }
 0x476   :  { %5664 = vmatpush3.bf16.msra.mxu0 %v5663_v12  ;;  %5696 = vmatpush3.bf16.msra.mxu1 %v5695_v13 }
 0x477   :  { %5666 = vmatprep.subr.bf16.mxu0 %v5665_v17  ;;  %5698 = vmatprep.subr.bf16.mxu1 %v5697_v22 }
 0x47a   :  { %5668 = vmatpush3.bf16.msra.mxu0 %v5667_v28  ;;  %5700 = vmatpush3.bf16.msra.mxu1 %v5699_v29 }
 0x47b   :  { %5670 = vmatprep.subr.bf16.mxu0 %v5669_v33  ;;  %5702 = vmatprep.subr.bf16.mxu1 %v5701_v16 }
 0x47e   :  { %5672 = vmatpush3.bf16.msra.mxu0 %v5671_v6  ;;  %5704 = vmatpush3.bf16.msra.mxu1 %v5703_v0 }
 0x47f   :  { %5674 = vmatprep.subr.bf16.mxu0 %v5673_v35  ;;  %5706 = vmatprep.subr.bf16.mxu1 %v5705_v38 }
 0x482   :  { %5676 = vmatpush3.bf16.msra.mxu0 %v5675_v50  ;;  %5708 = vmatpush3.bf16.msra.mxu1 %v5707_v42 }
 0x483   :  { %5678 = vmatprep.subr.bf16.mxu0 %v5677_v46  ;;  %5710 = vmatprep.subr.bf16.mxu1 %v5709_v53 }
 0x486   :  { %5680 = vmatpush3.bf16.msra.mxu0 %v5679_v55  ;;  %5712 = vmatpush3.bf16.msra.mxu1 %v5711_v60 }
 0x53c   :  { %v3660_v63 = vpop.f32.mrb[10].mxu0  ;;  %v3802_v2 = vpop.f32.mrb[10].mxu1 }
 0x53d   :  { %v5717_v3 = vadd.f32 %v3660_v63, %v3506_v9  ;;  %v5719_v4 = vadd.f32 %v3802_v2, %v3514_v54  ;;  %v3662_v5 = vpop.f32.mrb[11].mxu0  ;;  %v3804_v8 = vpop.f32.mrb[11].mxu1 }
 0x53e   :  { %v5718_v20 = vadd.f32 %v3662_v5, %v3510_v61  ;;  %v5720_v45 = vadd.f32 %v3804_v8, %v3518_v62 }
 0x53f   :  { %v3807_v13 = vmax.f32 %v5717_v3, 0.0  ;;  %v3809_v14 = vmax.f32 %v5719_v4, 0.0 }
 0x540   :  { %v3808_v11 = vmax.f32 %v5718_v20, 0.0  ;;  %v3810_v12 = vmax.f32 %v5720_v45, 0.0 }
 0x542   :  { %3946 = vmatprep.mubr.f32.mxu0 %v3808_v11  ;;  %4016 = vmatprep.mubr.f32.mxu1 %v3810_v12 }
 0x543   :  { %3947 = vmatmul.mubr.f32.vlgmr.msra.gmra.mrb[12].mxu0 %v3807_v13  ;;  %4017 = vmatmul.mubr.f32.vlgmr.msra.gmra.mrb[12].mxu1 %v3809_v14 }
 0x616   :  { %v4075_v19 = vpop.f32.mrb[12].mxu0  ;;  %v4110_v21 = vpop.f32.mrb[12].mxu1 }
 0x617   :  { %v4076_v47 = vpop.f32.mrb[13].mxu0  ;;  %v4111_v43 = vpop.f32.mrb[13].mxu1 }
 0x618   :  { %v4077_v17 = vadd.f32 %v4076_v47, %v4075_v19  ;;  %v4112_v22 = vadd.f32 %v4111_v43, %v4110_v21 }
 0x61a   :  { %v3949_v23 = vadd.f32 %v4077_v17, %v4042_v31 }
 0x61c   :  { %v4019_v24 = vadd.f32 %v4112_v22, %v3949_v23 }
 0x61e   :  { %4022 = vst [vmem:[#allocation16] sm:$0xff] %v4019_v24 }
 0x61f   :  { %5957 = shalt.err (!%p5954_p12)
}
 0x620   :  { %s5958_s19 = scalar_lea.hbm %s6315_s9, 128 }
 0x621   :  { %p5959_p13 = scmp.ne.s32.totalorder %s6315_s9, %s5958_s19  ;;  %p5962_p0 = scmp.lt.u32.totalorder %s5958_s19, %s6315_s9 }
 0x623   :  { %p5964_p1 = pnand %p5962_p0, %p5959_p13 }
 0x625   :  { %5967 = shalt.err (!%p5964_p1)
}
 0x626   :  { %4032 = dma.vmem_to_hbm [thread:$0]  %s4030_s3, 128, %s6315_s9, [#allocation4]  }
 0x627   :  { %5978 = dma.done.wait [#allocation4], 128  }
 0x628   :  { %5979 = vsyncadd [#allocation4], 4294967168 }
 0x629   :  { %4036 = vsyncpa [#allocation3], 1 }
 0x62a   :  { %4037 = vsyncpa [#allocation6], 1 }
 0x62b   :  { %4038 = vsyncpa [#allocation9], 1 }
 0x62c   :  { %4039 = vsyncpa [#allocation12], 1 }
 0x62d   :  { %4040 = vsyncpa [#allocation15], 1 }
 0x62e   :  { %4041 = vsyncpa [#allocation4], 1 }

</bundles_post_ra>
